<compile_context>
chip_gen: v7x
topology: tpu7x:2x2x1
jax: 0.10.0
libtpu: 0.0.40
codegen_flags: <defaults>
</compile_context>

<pallas_src>
import functools
import math

import jax
import jax.numpy as jnp
from jax.experimental import pallas as pl
from jax.experimental.pallas import tpu as pltpu

_MM_DTYPE = jnp.bfloat16    # MXU operand dtype (accumulation stays f32)
_ACT_DTYPE = jnp.bfloat16   # inter-kernel activation dtype


def _vmem_budget_bytes():
    """Generation-aware VMEM budget (v5e/v6e: 128 MiB physical, v7x: 64 MiB)."""
    try:
        cap = pltpu.get_tpu_info().vmem_capacity_bytes
    except Exception:
        cap = 128 * 1024 * 1024
    return int(min(cap * 0.85, 100 * 1024 * 1024))


def _pick_tile(total, target, multiple):
    """Largest tile <= target that divides `total` and is a multiple of
    `multiple`; falls back to the full extent (always legal)."""
    if total <= target:
        return total
    best = None
    for t in range(multiple, target + 1, multiple):
        if total % t == 0:
            best = t
    return best if best is not None else total


def _attn_tiles(Lq, Lk, E, heads, q_bytes, kv_bytes, out_bytes, mask_bytes,
                budget):
    q_mult = 16 if (q_bytes == 2 or out_bytes == 2) else 8
    choice = None
    for tq_t, tk_t in ((512, 1024), (256, 512), (256, 256), (128, 256),
                       (128, 128), (64, 128), (32, 128), (16, 128), (8, 128)):
        TLq = _pick_tile(Lq, tq_t, q_mult)
        TLk = _pick_tile(Lk, tk_t, 128)
        need = (4 * E * E * 2 * 2                         # 4 bf16 (E,E) weights
                + 2 * TLq * E * q_bytes                   # queries
                + 2 * 2 * TLk * E * kv_bytes              # keys + values
                + 2 * TLq * TLk * mask_bytes              # optional mask tile
                + 2 * TLq * E * 4 + 2 * TLq * heads * 4   # qp/acc + m/l scratch
                + 2 * TLq * E * out_bytes                 # output
                + 2 * TLq * TLk * 4)                      # live score slack
        choice = (TLq, TLk)
        if need <= budget * 0.8:
            return choice
    return choice


def _ffn_tiles(M, E, H, x_bytes, budget):
    m_mult = 16 if x_bytes == 2 else 8
    choice = None
    for tm_t, th_t in ((1024, 2048), (512, 1024), (256, 1024), (256, 512),
                       (128, 512), (128, 256), (64, 128), (32, 128),
                       (16, 128), (8, 128)):
        TM = _pick_tile(M, tm_t, m_mult)
        TH = _pick_tile(H, th_t, 128)
        need = (2 * TM * E * x_bytes          # x tile
                + 2 * 2 * E * TH * 2          # w1^T, w2^T tiles (bf16)
                + 2 * TM * E * 4              # resident f32 output/accumulator
                + 2 * TM * TH * 4)            # live hidden activations (slack)
        choice = (TM, TH)
        if need <= budget * 0.8:
            return choice
    return choice


# ----------------------------------------------------------------------------
# Kernels 1+2: SelfAttention (block-diag QKV proj, per-head online softmax over
# Lk tiles, fc_out) fused with residual add + LayerNorm.
# ----------------------------------------------------------------------------
def _attn_flash_kernel(*refs, heads, mask_mode, mm_dtype):
    if mask_mode == "array":
        (q_ref, k_ref, v_ref, m_in_ref,
         wq_ref, wk_ref, wv_ref, wo_ref, bo_ref, g_ref, beta_ref,
         o_ref, qp_ref, m_scr, l_scr, acc_scr) = refs
    else:
        (q_ref, k_ref, v_ref,
         wq_ref, wk_ref, wv_ref, wo_ref, bo_ref, g_ref, beta_ref,
         o_ref, qp_ref, m_scr, l_scr, acc_scr) = refs
        m_in_ref = None

    f32 = jnp.float32
    E = q_ref.shape[-1]
    D = E // heads
    TLq = q_ref.shape[1]
    TLk = k_ref.shape[1]
    kv = pl.program_id(2)

    @pl.when(kv == 0)
    def _():
        # Project queries once per (n, qi) tile; 1/sqrt(E) is folded into wq.
        qp_ref[...] = jnp.dot(q_ref[0].astype(mm_dtype), wq_ref[...],
                              preferred_element_type=f32)
        m_scr[...] = jnp.full(m_scr.shape, f32(-1e30), f32)
        l_scr[...] = jnp.zeros(l_scr.shape, f32)
        acc_scr[...] = jnp.zeros(acc_scr.shape, f32)

    # Project this K/V tile with one block-diagonal (E, E) matmul each.
    kp = jnp.dot(k_ref[0].astype(mm_dtype), wk_ref[...],
                 preferred_element_type=f32)                     # (TLk, E)
    vp = jnp.dot(v_ref[0].astype(mm_dtype), wv_ref[...],
                 preferred_element_type=f32)                     # (TLk, E)

    if mask_mode == "causal":
        q_pos = (pl.program_id(1) * TLq
                 + jax.lax.broadcasted_iota(jnp.int32, (TLq, TLk), 0))
        k_pos = kv * TLk + jax.lax.broadcasted_iota(jnp.int32, (TLq, TLk), 1)
        masked = k_pos > q_pos
    elif mask_mode == "array":
        masked = m_in_ref[0, 0] == 0
    else:
        masked = None

    qp = qp_ref[...]
    m_prev = m_scr[...]          # (TLq, heads)
    l_prev = l_scr[...]
    acc_prev = acc_scr[...]      # (TLq, E)

    # heads is a small static int -> unrolled.
    # TODO(synk): switch to lax.fori_loop over heads for heads >= 8.
    for h in range(heads):
        sl = slice(h * D, (h + 1) * D)
        qh = qp[:, sl].astype(mm_dtype)
        kh = kp[:, sl].astype(mm_dtype)
        vh = vp[:, sl].astype(mm_dtype)

        # TODO(synk): verify no per-head XLU transpose of kh is emitted here.
        s = jax.lax.dot_general(qh, kh, (((1,), (1,)), ((), ())),
                                preferred_element_type=f32)      # (TLq, TLk)
        if masked is not None:
            s = jnp.where(masked, f32(-1e20), s)

        m_old = m_prev[:, h:h + 1]
        m_new = jnp.maximum(m_old, jnp.max(s, axis=-1, keepdims=True))
        alpha = jnp.exp(m_old - m_new)
        p = jnp.exp(s - m_new)
        pv = jnp.dot(p.astype(mm_dtype), vh,
                     preferred_element_type=f32)                 # (TLq, D)

        m_scr[:, h:h + 1] = m_new
        l_scr[:, h:h + 1] = alpha * l_prev[:, h:h + 1] + jnp.sum(
            p, axis=-1, keepdims=True)
        acc_scr[:, sl] = alpha * acc_prev[:, sl] + pv

    # fc_out + residual + LayerNorm epilogue (lane-dense (TLq, E) output).
    @pl.when(kv == pl.num_programs(2) - 1)
    def _():
        inv_l = pl.reciprocal(l_scr[...], approx=True)           # (TLq, heads)
        for h in range(heads):
            sl = slice(h * D, (h + 1) * D)
            acc_scr[:, sl] = acc_scr[:, sl] * inv_l[:, h:h + 1]
        y = jnp.dot(acc_scr[...].astype(mm_dtype), wo_ref[...],
                    preferred_element_type=f32) + bo_ref[...]
        x = y + q_ref[0].astype(f32)
        mu = jnp.mean(x, axis=-1, keepdims=True)
        var = jnp.mean((x - mu) * (x - mu), axis=-1, keepdims=True)
        xn = (x - mu) * jax.lax.rsqrt(var + f32(1e-5))
        o_ref[0] = (xn * g_ref[...] + beta_ref[...]).astype(o_ref.dtype)


def _fused_attention_ln(values, keys, queries, mask, p, gamma, beta,
                        embed_size, heads, out_dtype):
    """LayerNorm(SelfAttention(values, keys, queries, mask) + queries).

    `mask` may be: an array (DMA'd as int8), None (no masking), or the string
    "causal" (mask generated in-kernel from iota -> zero HBM traffic)."""
    N, Lq, E = queries.shape
    Lk = keys.shape[1]
    assert E == embed_size and E % heads == 0

    if mask is None:
        mask_mode = "none"
    elif isinstance(mask, str):
        assert mask == "causal"
        mask_mode = "causal"
    else:
        mask_mode = "array"

    budget = _vmem_budget_bytes()
    TLq, TLk = _attn_tiles(
        Lq, Lk, E, heads,
        q_bytes=jnp.dtype(queries.dtype).itemsize,
        kv_bytes=jnp.dtype(keys.dtype).itemsize,
        out_bytes=jnp.dtype(out_dtype).itemsize,
        mask_bytes=1 if mask_mode == "array" else 0,
        budget=budget)
    grid = (N, Lq // TLq, Lk // TLk)

    in_specs = [
        pl.BlockSpec((1, TLq, E), lambda n, qi, kv: (n, qi, 0)),   # q (+resid)
        pl.BlockSpec((1, TLk, E), lambda n, qi, kv: (n, kv, 0)),   # keys
        pl.BlockSpec((1, TLk, E), lambda n, qi, kv: (n, kv, 0)),   # values
    ]
    args = [queries, keys, values]
    if mask_mode == "array":
        in_specs.append(pl.BlockSpec((1, 1, TLq, TLk),
                                     lambda n, qi, kv: (n, 0, qi, kv)))
        args.append((mask != 0).astype(jnp.int8))

    const2 = lambda n, qi, kv: (0, 0)
    in_specs += [
        pl.BlockSpec((E, E), const2),   # wq (block-diag, scale folded)
        pl.BlockSpec((E, E), const2),   # wk (block-diag)
        pl.BlockSpec((E, E), const2),   # wv (block-diag)
        pl.BlockSpec((E, E), const2),   # wo
        pl.BlockSpec((1, E), const2),   # bo
        pl.BlockSpec((1, E), const2),   # gamma
        pl.BlockSpec((1, E), const2),   # beta
    ]
    args += [p["wq_bd_t"], p["wk_bd_t"], p["wv_bd_t"], p["wo_t"],
             p["bo"].reshape(1, E), gamma.reshape(1, E), beta.reshape(1, E)]

    kernel = functools.partial(_attn_flash_kernel, heads=heads,
                               mask_mode=mask_mode, mm_dtype=_MM_DTYPE)
    return pl.pallas_call(
        kernel,
        out_shape=jax.ShapeDtypeStruct((N, Lq, E), out_dtype),
        grid=grid,
        in_specs=in_specs,
        out_specs=pl.BlockSpec((1, TLq, E), lambda n, qi, kv: (n, qi, 0)),
        scratch_shapes=[pltpu.VMEM((TLq, E), jnp.float32),       # projected q
                        pltpu.VMEM((TLq, heads), jnp.float32),   # running max
                        pltpu.VMEM((TLq, heads), jnp.float32),   # running denom
                        pltpu.VMEM((TLq, E), jnp.float32)],      # running acc
        compiler_params=pltpu.CompilerParams(
            dimension_semantics=("parallel", "parallel", "arbitrary"),
            vmem_limit_bytes=budget),
    )(*args)


# ----------------------------------------------------------------------------
# Kernel 3: FFN (Linear -> ReLU -> Linear) fused with residual add + LayerNorm,
# accumulating directly into the resident f32 output block.
# ----------------------------------------------------------------------------
def _ffn_block_kernel(x_ref, w1t_ref, b1_ref, w2t_ref, b2_ref,
                      g_ref, beta_ref, o_ref, *, mm_dtype):
    f32 = jnp.float32
    j = pl.program_id(1)

    h = jnp.dot(x_ref[...].astype(mm_dtype), w1t_ref[...],
                preferred_element_type=f32) + b1_ref[...]
    h = jnp.maximum(h, 0.0)
    part = jnp.dot(h.astype(mm_dtype), w2t_ref[...],
                   preferred_element_type=f32)

    @pl.when(j == 0)
    def _():
        o_ref[...] = part

    @pl.when(j > 0)
    def _():
        o_ref[...] += part

    @pl.when(j == pl.num_programs(1) - 1)
    def _():
        y = o_ref[...] + b2_ref[...] + x_ref[...].astype(f32)
        mu = jnp.mean(y, axis=-1, keepdims=True)
        var = jnp.mean((y - mu) * (y - mu), axis=-1, keepdims=True)
        yn = (y - mu) * jax.lax.rsqrt(var + f32(1e-5))
        o_ref[...] = (yn * g_ref[...] + beta_ref[...]).astype(o_ref.dtype)


def _fused_ffn_ln(x, p, gamma, beta, out_dtype=jnp.float32):
    """LayerNorm(FFN(x) + x)."""
    N, L, E = x.shape
    M = N * L
    H = p["w1_t"].shape[1]
    budget = _vmem_budget_bytes()
    TM, TH = _ffn_tiles(M, E, H, jnp.dtype(x.dtype).itemsize, budget)

    out = pl.pallas_call(
        functools.partial(_ffn_block_kernel, mm_dtype=_MM_DTYPE),
        out_shape=jax.ShapeDtypeStruct((M, E), out_dtype),
        grid=(M // TM, H // TH),
        in_specs=[
            pl.BlockSpec((TM, E), lambda i, j: (i, 0)),   # x (and residual)
            pl.BlockSpec((E, TH), lambda i, j: (0, j)),   # w1^T tile
            pl.BlockSpec((1, TH), lambda i, j: (0, j)),   # b1 tile
            pl.BlockSpec((TH, E), lambda i, j: (j, 0)),   # w2^T tile
            pl.BlockSpec((1, E), lambda i, j: (0, 0)),    # b2
            pl.BlockSpec((1, E), lambda i, j: (0, 0)),    # gamma
            pl.BlockSpec((1, E), lambda i, j: (0, 0)),    # beta
        ],
        out_specs=pl.BlockSpec((TM, E), lambda i, j: (i, 0)),
        compiler_params=pltpu.CompilerParams(
            dimension_semantics=("parallel", "arbitrary"),
            vmem_limit_bytes=budget),
    )(x.reshape(M, E), p["w1_t"], p["b1"].reshape(1, H),
      p["w2_t"], p["b2"].reshape(1, E),
      gamma.reshape(1, E), beta.reshape(1, E))
    return out.reshape(N, L, E)


# ----------------------------------------------------------------------------
# DecoderBlock forward (dropout == identity, eval mode)
# ----------------------------------------------------------------------------
def decoder_block_forward(x, value, key, params, src_mask=None,
                          trg_mask="causal", *, embed_size, heads):
    """DecoderBlock.forward(x, value, key, src_mask, trg_mask)."""
    # Self-attention + dropout(identity) + LayerNorm(attn + x)
    query = _fused_attention_ln(x, x, x, trg_mask, params["attention"],
                                params["norm_g"], params["norm_b"],
                                embed_size, heads, out_dtype=_ACT_DTYPE)
    tb = params["transformer_block"]
    # TransformerBlock: cross-attention + LayerNorm(attn + query)
    h = _fused_attention_ln(value, key, query, src_mask, tb["attention"],
                            tb["norm1_g"], tb["norm1_b"],
                            embed_size, heads, out_dtype=_ACT_DTYPE)
    # FFN + LayerNorm(ffn + h)
    return _fused_ffn_ln(h, tb["ffn"], tb["norm2_g"], tb["norm2_b"],
                         out_dtype=jnp.float32)


# ----------------------------------------------------------------------------
# Deterministic parameter init (shapes from the nn.Module __init__).
# Kernel-format weights are stored in bf16 once here; f32 copies are kept only
# for the pure-JAX reference check.
# ----------------------------------------------------------------------------
def _init_attention_params(key, embed_size, heads):
    D = embed_size // heads
    E = embed_size
    k1, k2, k3, k4, k5 = jax.random.split(key, 5)
    sd, se = 1.0 / math.sqrt(D), 1.0 / math.sqrt(E)
    wq = jax.random.normal(k1, (D, D), jnp.float32) * sd   # torch (out, in)
    wk = jax.random.normal(k2, (D, D), jnp.float32) * sd
    wv = jax.random.normal(k3, (D, D), jnp.float32) * sd
    wo = jax.random.normal(k4, (E, E), jnp.float32) * se
    bo = jax.random.normal(k5, (E,), jnp.float32) * 0.02
    eye = jnp.eye(heads, dtype=jnp.float32)
    # The shared Linear(D, D) applied to every head's slice of an (L, E) row is
    # exactly one block-diagonal (E, E) matmul; softmax's 1/sqrt(E) is folded
    # into the query projection.
    return dict(
        wq=wq, wk=wk, wv=wv, wo=wo, bo=bo,                       # reference path
        wq_bd_t=(jnp.kron(eye, wq.T) / math.sqrt(E)).astype(_MM_DTYPE),
        wk_bd_t=jnp.kron(eye, wk.T).astype(_MM_DTYPE),
        wv_bd_t=jnp.kron(eye, wv.T).astype(_MM_DTYPE),
        wo_t=wo.T.astype(_MM_DTYPE),
    )


def init_decoder_block_params(key, embed_size, heads, forward_expansion):
    E = embed_size
    H = forward_expansion * E
    ks = jax.random.split(key, 6)
    w1 = jax.random.normal(ks[2], (H, E), jnp.float32) * (1.0 / math.sqrt(E))
    b1 = jax.random.normal(ks[3], (H,), jnp.float32) * 0.02
    w2 = jax.random.normal(ks[4], (E, H), jnp.float32) * (1.0 / math.sqrt(H))
    b2 = jax.random.normal(ks[5], (E,), jnp.float32) * 0.02
    ffn = dict(w1=w1, b1=b1, w2=w2, b2=b2,
               w1_t=w1.T.astype(_MM_DTYPE), w2_t=w2.T.astype(_MM_DTYPE))
    return dict(
        attention=_init_attention_params(ks[0], E, heads),
        norm_g=jnp.ones((E,), jnp.float32),
        norm_b=jnp.zeros((E,), jnp.float32),
        transformer_block=dict(
            attention=_init_attention_params(ks[1], E, heads),
            norm1_g=jnp.ones((E,), jnp.float32),
            norm1_b=jnp.zeros((E,), jnp.float32),
            norm2_g=jnp.ones((E,), jnp.float32),
            norm2_b=jnp.zeros((E,), jnp.float32),
            ffn=ffn,
        ),
    )


# ----------------------------------------------------------------------------
# Pure-JAX f32 reference mirroring the PyTorch module (for tolerance check).
# ----------------------------------------------------------------------------
def _ref_self_attention(values, keys, queries, mask, p, embed_size, heads):
    N, Lq, E = queries.shape
    D = E // heads
    split = lambda t: t.reshape(t.shape[0], t.shape[1], heads, D)
    v = split(values) @ p["wv"].T
    k = split(keys) @ p["wk"].T
    q = split(queries) @ p["wq"].T
    energy = jnp.einsum('nqhd,nkhd->nhqk', q, k)
    if mask is not None:
        energy = jnp.where(mask == 0, jnp.float32(-1e20), energy)
    attn = jax.nn.softmax(energy / math.sqrt(embed_size), axis=3)
    out = jnp.einsum('nhql,nlhd->nqhd', attn, v).reshape(N, Lq, E)
    return out @ p["wo"].T + p["bo"]


def _ref_layer_norm(x, g, b):
    mu = x.mean(-1, keepdims=True)
    var = ((x - mu) ** 2).mean(-1, keepdims=True)
    return (x - mu) / jnp.sqrt(var + 1e-5) * g + b


def _ref_decoder_block(x, value, key, src_mask, trg_mask, params,
                       embed_size, heads):
    attn = _ref_self_attention(x, x, x, trg_mask, params["attention"],
                               embed_size, heads)
    query = _ref_layer_norm(attn + x, params["norm_g"], params["norm_b"])
    tb = params["transformer_block"]
    attn2 = _ref_self_attention(value, key, query, src_mask, tb["attention"],
                                embed_size, heads)
    h = _ref_layer_norm(attn2 + query, tb["norm1_g"], tb["norm1_b"])
    f = tb["ffn"]
    ff = jnp.maximum(h @ f["w1"].T + f["b1"], 0.0) @ f["w2"].T + f["b2"]
    return _ref_layer_norm(ff + h, tb["norm2_g"], tb["norm2_b"])


# ----------------------------------------------------------------------------
if __name__ == "__main__":
    N, L, EMBED, HEADS, FWD_EXP = 2, 8, 32, 4, 4

    root = jax.random.PRNGKey(0)
    k_param, k_x, k_v, k_k = jax.random.split(root, 4)

    params = init_decoder_block_params(k_param, EMBED, HEADS, FWD_EXP)

    x = jax.random.normal(k_x, (N, L, EMBED), jnp.float32)      # decoder input
    value = jax.random.normal(k_v, (N, L, EMBED), jnp.float32)  # encoder output
    key_enc = jax.random.normal(k_k, (N, L, EMBED), jnp.float32)

    # trg_mask is causal (generated in-kernel, zero HBM traffic);
    # src_mask is all-ones (no padding) -> masking skipped entirely.
    fwd = jax.jit(functools.partial(decoder_block_forward,
                                    src_mask=None, trg_mask="causal",
                                    embed_size=EMBED, heads=HEADS))
    out = fwd(x, value, key_enc, params)
    jax.block_until_ready(out)

    assert out.shape == (N, L, EMBED) and out.dtype == jnp.float32
    assert bool(jnp.all(jnp.isfinite(out)))

    # Tolerance check against a pure-JAX f32 reference of the PyTorch module
    # (kernel uses bf16 matmul operands / activations + approx reciprocal).
    trg_mask_arr = jnp.tril(jnp.ones((L, L), jnp.float32))[None, None].repeat(N, 0)
    src_mask_arr = jnp.ones((N, 1, L, L), jnp.float32)
    ref = _ref_decoder_block(x, value, key_enc, src_mask_arr, trg_mask_arr,
                             params, EMBED, HEADS)
    err = float(jnp.max(jnp.abs(out - ref)))
    assert err < 0.3, f"max |out - ref| = {err}"
    print("KERNEL_OK")
</pallas_src>

<mosaic_0001>
module attributes {stable_mosaic.version = 11 : i64} {
  func.func @_ffn_block_kernel(%arg0: i32, %arg1: i32, %arg2: memref<16x32xbf16, #tpu.memory_space<vmem>>, %arg3: memref<32x128xbf16, #tpu.memory_space<vmem>>, %arg4: memref<1x128xf32, #tpu.memory_space<vmem>>, %arg5: memref<128x32xbf16, #tpu.memory_space<vmem>>, %arg6: memref<1x32xf32, #tpu.memory_space<vmem>>, %arg7: memref<1x32xf32, #tpu.memory_space<vmem>>, %arg8: memref<1x32xf32, #tpu.memory_space<vmem>>, %arg9: memref<16x32xf32, #tpu.memory_space<vmem>>) attributes {dimension_semantics = [#tpu.dimension_semantics<parallel>, #tpu.dimension_semantics<arbitrary>], iteration_bounds = array<i64: 1, 1>, scalar_prefetch = 0 : i64, scratch_operands = 0 : i64, tpu.core_type = #tpu.core_type<tc>, window_params = [{transform_indices = @transform_0, window_bounds = array<i64: 16, 32>}, {transform_indices = @transform_1, window_bounds = array<i64: 32, 128>}, {transform_indices = @transform_2, window_bounds = array<i64: 1, 128>}, {transform_indices = @transform_3, window_bounds = array<i64: 128, 32>}, {pipeline_mode = #tpu.pipeline_mode<synchronous>, transform_indices = @transform_4, window_bounds = array<i64: 1, 32>}, {pipeline_mode = #tpu.pipeline_mode<synchronous>, transform_indices = @transform_5, window_bounds = array<i64: 1, 32>}, {pipeline_mode = #tpu.pipeline_mode<synchronous>, transform_indices = @transform_6, window_bounds = array<i64: 1, 32>}, {transform_indices = @transform_7, window_bounds = array<i64: 16, 32>}]} {
    %c0 = arith.constant 0 : index
    %c0_0 = arith.constant 0 : index
    %0 = vector.load %arg2[%c0, %c0_0] : memref<16x32xbf16, #tpu.memory_space<vmem>>, vector<16x32xbf16>
    %c0_1 = arith.constant 0 : index
    %c0_2 = arith.constant 0 : index
    %1 = vector.load %arg3[%c0_1, %c0_2] : memref<32x128xbf16, #tpu.memory_space<vmem>>, vector<32x128xbf16>
    %cst = arith.constant dense<0.000000e+00> : vector<16x128xf32>
    %2 = tpu.matmul %0, %1, %cst {dimension_numbers = #tpu.dot_dimension_numbers<[1], [0], [0], [1], [0, 0, 1, 1], [], []>} : vector<16x32xbf16>, vector<32x128xbf16>, vector<16x128xf32> -> vector<16x128xf32>
    %c0_3 = arith.constant 0 : index
    %c0_4 = arith.constant 0 : index
    %3 = vector.load %arg4[%c0_3, %c0_4] : memref<1x128xf32, #tpu.memory_space<vmem>>, vector<1x128xf32>
    %4 = vector.broadcast %3 : vector<1x128xf32> to vector<16x128xf32>
    %5 = arith.addf %2, %4 : vector<16x128xf32>
    %cst_5 = arith.constant 0.000000e+00 : f32
    %6 = vector.broadcast %cst_5 : f32 to vector<16x128xf32>
    %7 = arith.maximumf %5, %6 : vector<16x128xf32>
    %8 = arith.truncf %7 : vector<16x128xf32> to vector<16x128xbf16>
    %c0_6 = arith.constant 0 : index
    %c0_7 = arith.constant 0 : index
    %9 = vector.load %arg5[%c0_6, %c0_7] : memref<128x32xbf16, #tpu.memory_space<vmem>>, vector<128x32xbf16>
    %cst_8 = arith.constant dense<0.000000e+00> : vector<16x32xf32>
    %10 = tpu.matmul %8, %9, %cst_8 {dimension_numbers = #tpu.dot_dimension_numbers<[1], [0], [0], [1], [0, 0, 1, 1], [], []>} : vector<16x128xbf16>, vector<128x32xbf16>, vector<16x32xf32> -> vector<16x32xf32>
    %c0_i32 = arith.constant 0 : i32
    %11 = arith.cmpi eq, %arg1, %c0_i32 : i32
    %12 = arith.extui %11 : i1 to i32
    %c0_i32_9 = arith.constant 0 : i32
    %13 = arith.cmpi ne, %12, %c0_i32_9 : i32
    scf.if %13 {
      %c0_14 = arith.constant 0 : index
      %c0_15 = arith.constant 0 : index
      %20 = vector.load %arg9[%c0_14, %c0_15] : memref<16x32xf32, #tpu.memory_space<vmem>>, vector<16x32xf32>
      tpu.vector_store %arg9[%c0_14, %c0_15], %10 {strides = array<i32>} : memref<16x32xf32, #tpu.memory_space<vmem>>, vector<16x32xf32>,
    } else {
    }
    %c0_i32_10 = arith.constant 0 : i32
    %14 = arith.cmpi sgt, %arg1, %c0_i32_10 : i32
    %15 = arith.extui %14 : i1 to i32
    %c0_i32_11 = arith.constant 0 : i32
    %16 = arith.cmpi ne, %15, %c0_i32_11 : i32
    scf.if %16 {
      %c0_14 = arith.constant 0 : index
      %c0_15 = arith.constant 0 : index
      %20 = vector.load %arg9[%c0_14, %c0_15] : memref<16x32xf32, #tpu.memory_space<vmem>>, vector<16x32xf32>
      %21 = arith.addf %20, %10 : vector<16x32xf32>
      %c0_16 = arith.constant 0 : index
      %c0_17 = arith.constant 0 : index
      %22 = vector.load %arg9[%c0_16, %c0_17] : memref<16x32xf32, #tpu.memory_space<vmem>>, vector<16x32xf32>
      tpu.vector_store %arg9[%c0_16, %c0_17], %21 {strides = array<i32>} : memref<16x32xf32, #tpu.memory_space<vmem>>, vector<16x32xf32>,
    } else {
    }
    %c0_i32_12 = arith.constant 0 : i32
    %17 = arith.cmpi eq, %arg1, %c0_i32_12 : i32
    %18 = arith.extui %17 : i1 to i32
    %c0_i32_13 = arith.constant 0 : i32
    %19 = arith.cmpi ne, %18, %c0_i32_13 : i32
    scf.if %19 {
      %c0_14 = arith.constant 0 : index
      %c0_15 = arith.constant 0 : index
      %20 = vector.load %arg9[%c0_14, %c0_15] : memref<16x32xf32, #tpu.memory_space<vmem>>, vector<16x32xf32>
      %c0_16 = arith.constant 0 : index
      %c0_17 = arith.constant 0 : index
      %21 = vector.load %arg6[%c0_16, %c0_17] : memref<1x32xf32, #tpu.memory_space<vmem>>, vector<1x32xf32>
      %22 = vector.broadcast %21 : vector<1x32xf32> to vector<16x32xf32>
      %23 = arith.addf %20, %22 : vector<16x32xf32>
      %c0_18 = arith.constant 0 : index
      %c0_19 = arith.constant 0 : index
      %24 = vector.load %arg2[%c0_18, %c0_19] : memref<16x32xbf16, #tpu.memory_space<vmem>>, vector<16x32xbf16>
      %25 = arith.extf %24 : vector<16x32xbf16> to vector<16x32xf32>
      %26 = arith.addf %23, %25 : vector<16x32xf32>
      %cst_20 = arith.constant dense<0.000000e+00> : vector<16xf32>
      %27 = vector.multi_reduction <add>, %26, %cst_20 [1] : vector<16x32xf32> to vector<16xf32>
      %28 = vector.shape_cast %27 : vector<16xf32> to vector<16x1xf32>
      %cst_21 = arith.constant 3.200000e+01 : f32
      %29 = vector.broadcast %cst_21 : f32 to vector<16x1xf32>
      %30 = arith.divf %28, %29 : vector<16x1xf32>
      %31 = vector.broadcast %30 : vector<16x1xf32> to vector<16x32xf32>
      %32 = arith.subf %26, %31 : vector<16x32xf32>
      %33 = vector.broadcast %30 : vector<16x1xf32> to vector<16x32xf32>
      %34 = arith.subf %26, %33 : vector<16x32xf32>
      %35 = arith.mulf %32, %34 : vector<16x32xf32>
      %cst_22 = arith.constant dense<0.000000e+00> : vector<16xf32>
      %36 = vector.multi_reduction <add>, %35, %cst_22 [1] : vector<16x32xf32> to vector<16xf32>
      %37 = vector.shape_cast %36 : vector<16xf32> to vector<16x1xf32>
      %cst_23 = arith.constant 3.200000e+01 : f32
      %38 = vector.broadcast %cst_23 : f32 to vector<16x1xf32>
      %39 = arith.divf %37, %38 : vector<16x1xf32>
      %40 = vector.broadcast %30 : vector<16x1xf32> to vector<16x32xf32>
      %41 = arith.subf %26, %40 : vector<16x32xf32>
      %cst_24 = arith.constant 9.99999974E-6 : f32
      %42 = vector.broadcast %cst_24 : f32 to vector<16x1xf32>
      %43 = arith.addf %39, %42 : vector<16x1xf32>
      %44 = math.rsqrt %43 : vector<16x1xf32>
      %45 = vector.broadcast %44 : vector<16x1xf32> to vector<16x32xf32>
      %46 = arith.mulf %41, %45 : vector<16x32xf32>
      %c0_25 = arith.constant 0 : index
      %c0_26 = arith.constant 0 : index
      %47 = vector.load %arg7[%c0_25, %c0_26] : memref<1x32xf32, #tpu.memory_space<vmem>>, vector<1x32xf32>
      %48 = vector.broadcast %47 : vector<1x32xf32> to vector<16x32xf32>
      %49 = arith.mulf %46, %48 : vector<16x32xf32>
      %c0_27 = arith.constant 0 : index
      %c0_28 = arith.constant 0 : index
      %50 = vector.load %arg8[%c0_27, %c0_28] : memref<1x32xf32, #tpu.memory_space<vmem>>, vector<1x32xf32>
      %51 = vector.broadcast %50 : vector<1x32xf32> to vector<16x32xf32>
      %52 = arith.addf %49, %51 : vector<16x32xf32>
      %c0_29 = arith.constant 0 : index
      %c0_30 = arith.constant 0 : index
      %53 = vector.load %arg9[%c0_29, %c0_30] : memref<16x32xf32, #tpu.memory_space<vmem>>, vector<16x32xf32>
      tpu.vector_store %arg9[%c0_29, %c0_30], %52 {strides = array<i32>} : memref<16x32xf32, #tpu.memory_space<vmem>>, vector<16x32xf32>,
    } else {
    }
    return
  }
  func.func @transform_0(%arg0: i32, %arg1: i32) -> (i32, i32) {
    %c0_i32 = arith.constant 0 : i32
    %c0_i32_0 = arith.constant 0 : i32
    return %arg0, %c0_i32 : i32, i32
  }
  func.func @transform_1(%arg0: i32, %arg1: i32) -> (i32, i32) {
    %c0_i32 = arith.constant 0 : i32
    %c0_i32_0 = arith.constant 0 : i32
    return %c0_i32, %arg1 : i32, i32
  }
  func.func @transform_2(%arg0: i32, %arg1: i32) -> (i32, i32) {
    %c0_i32 = arith.constant 0 : i32
    %c0_i32_0 = arith.constant 0 : i32
    return %c0_i32, %arg1 : i32, i32
  }
  func.func @transform_3(%arg0: i32, %arg1: i32) -> (i32, i32) {
    %c0_i32 = arith.constant 0 : i32
    %c0_i32_0 = arith.constant 0 : i32
    return %arg1, %c0_i32 : i32, i32
  }
  func.func @transform_4(%arg0: i32, %arg1: i32) -> (i32, i32) {
    %c0_i32 = arith.constant 0 : i32
    %c0_i32_0 = arith.constant 0 : i32
    %c0_i32_1 = arith.constant 0 : i32
    return %c0_i32, %c0_i32_0 : i32, i32
  }
  func.func @transform_5(%arg0: i32, %arg1: i32) -> (i32, i32) {
    %c0_i32 = arith.constant 0 : i32
    %c0_i32_0 = arith.constant 0 : i32
    %c0_i32_1 = arith.constant 0 : i32
    return %c0_i32, %c0_i32_0 : i32, i32
  }
  func.func @transform_6(%arg0: i32, %arg1: i32) -> (i32, i32) {
    %c0_i32 = arith.constant 0 : i32
    %c0_i32_0 = arith.constant 0 : i32
    %c0_i32_1 = arith.constant 0 : i32
    return %c0_i32, %c0_i32_0 : i32, i32
  }
  func.func @transform_7(%arg0: i32, %arg1: i32) -> (i32, i32) {
    %c0_i32 = arith.constant 0 : i32
    %c0_i32_0 = arith.constant 0 : i32
    return %arg0, %c0_i32 : i32, i32
  }
}

module attributes {stable_mosaic.version = 11 : i64} {
  func.func @_attn_flash_kernel(%arg0: i32, %arg1: i32, %arg2: i32, %arg3: memref<1x8x32xbf16, #tpu.memory_space<vmem>>, %arg4: memref<1x8x32xf32, #tpu.memory_space<vmem>>, %arg5: memref<1x8x32xf32, #tpu.memory_space<vmem>>, %arg6: memref<32x32xbf16, #tpu.memory_space<vmem>>, %arg7: memref<32x32xbf16, #tpu.memory_space<vmem>>, %arg8: memref<32x32xbf16, #tpu.memory_space<vmem>>, %arg9: memref<32x32xbf16, #tpu.memory_space<vmem>>, %arg10: memref<1x32xf32, #tpu.memory_space<vmem>>, %arg11: memref<1x32xf32, #tpu.memory_space<vmem>>, %arg12: memref<1x32xf32, #tpu.memory_space<vmem>>, %arg13: memref<1x8x32xbf16, #tpu.memory_space<vmem>>, %arg14: memref<8x32xf32, #tpu.memory_space<vmem>>, %arg15: memref<8x4xf32, #tpu.memory_space<vmem>>, %arg16: memref<8x4xf32, #tpu.memory_space<vmem>>, %arg17: memref<8x32xf32, #tpu.memory_space<vmem>>) attributes {dimension_semantics = [#tpu.dimension_semantics<parallel>, #tpu.dimension_semantics<parallel>, #tpu.dimension_semantics<arbitrary>], iteration_bounds = array<i64: 2, 1, 1>, scalar_prefetch = 0 : i64, scratch_operands = 4 : i64, tpu.core_type = #tpu.core_type<tc>, window_params = [{transform_indices = @transform_0, window_bounds = array<i64: 1, 8, 32>}, {transform_indices = @transform_1, window_bounds = array<i64: 1, 8, 32>}, {transform_indices = @transform_2, window_bounds = array<i64: 1, 8, 32>}, {pipeline_mode = #tpu.pipeline_mode<synchronous>, transform_indices = @transform_3, window_bounds = array<i64: 32, 32>}, {pipeline_mode = #tpu.pipeline_mode<synchronous>, transform_indices = @transform_4, window_bounds = array<i64: 32, 32>}, {pipeline_mode = #tpu.pipeline_mode<synchronous>, transform_indices = @transform_5, window_bounds = array<i64: 32, 32>}, {pipeline_mode = #tpu.pipeline_mode<synchronous>, transform_indices = @transform_6, window_bounds = array<i64: 32, 32>}, {pipeline_mode = #tpu.pipeline_mode<synchronous>, transform_indices = @transform_7, window_bounds = array<i64: 1, 32>}, {pipeline_mode = #tpu.pipeline_mode<synchronous>, transform_indices = @transform_8, window_bounds = array<i64: 1, 32>}, {pipeline_mode = #tpu.pipeline_mode<synchronous>, transform_indices = @transform_9, window_bounds = array<i64: 1, 32>}, {transform_indices = @transform_10, window_bounds = array<i64: 1, 8, 32>}]} {
    %c0_i32 = arith.constant 0 : i32
    %0 = arith.cmpi eq, %arg2, %c0_i32 : i32
    %1 = arith.extui %0 : i1 to i32
    %c0_i32_0 = arith.constant 0 : i32
    %2 = arith.cmpi ne, %1, %c0_i32_0 : i32
    scf.if %2 {
      %c0_55 = arith.constant 0 : index
      %c0_56 = arith.constant 0 : index
      %c0_57 = arith.constant 0 : index
      %140 = vector.load %arg3[%c0_55, %c0_56, %c0_57] : memref<1x8x32xbf16, #tpu.memory_space<vmem>>, vector<1x8x32xbf16>
      %141 = vector.shape_cast %140 : vector<1x8x32xbf16> to vector<8x32xbf16>
      %c0_58 = arith.constant 0 : index
      %c0_59 = arith.constant 0 : index
      %142 = vector.load %arg6[%c0_58, %c0_59] : memref<32x32xbf16, #tpu.memory_space<vmem>>, vector<32x32xbf16>
      %cst_60 = arith.constant dense<0.000000e+00> : vector<8x32xf32>
      %143 = tpu.matmul %141, %142, %cst_60 {dimension_numbers = #tpu.dot_dimension_numbers<[1], [0], [0], [1], [0, 0, 1, 1], [], []>} : vector<8x32xbf16>, vector<32x32xbf16>, vector<8x32xf32> -> vector<8x32xf32>
      %c0_61 = arith.constant 0 : index
      %c0_62 = arith.constant 0 : index
      %144 = vector.load %arg14[%c0_61, %c0_62] : memref<8x32xf32, #tpu.memory_space<vmem>>, vector<8x32xf32>
      tpu.vector_store %arg14[%c0_61, %c0_62], %143 {strides = array<i32>} : memref<8x32xf32, #tpu.memory_space<vmem>>, vector<8x32xf32>,
      %cst_63 = arith.constant -1.000000e+30 : f32
      %145 = vector.broadcast %cst_63 : f32 to vector<8x4xf32>
      %c0_64 = arith.constant 0 : index
      %c0_65 = arith.constant 0 : index
      %146 = vector.load %arg15[%c0_64, %c0_65] : memref<8x4xf32, #tpu.memory_space<vmem>>, vector<8x4xf32>
      tpu.vector_store %arg15[%c0_64, %c0_65], %145 {strides = array<i32>} : memref<8x4xf32, #tpu.memory_space<vmem>>, vector<8x4xf32>,
      %cst_66 = arith.constant 0.000000e+00 : f32
      %147 = vector.broadcast %cst_66 : f32 to vector<8x4xf32>
      %c0_67 = arith.constant 0 : index
      %c0_68 = arith.constant 0 : index
      %148 = vector.load %arg16[%c0_67, %c0_68] : memref<8x4xf32, #tpu.memory_space<vmem>>, vector<8x4xf32>
      tpu.vector_store %arg16[%c0_67, %c0_68], %147 {strides = array<i32>} : memref<8x4xf32, #tpu.memory_space<vmem>>, vector<8x4xf32>,
      %cst_69 = arith.constant 0.000000e+00 : f32
      %149 = vector.broadcast %cst_69 : f32 to vector<8x32xf32>
      %c0_70 = arith.constant 0 : index
      %c0_71 = arith.constant 0 : index
      %150 = vector.load %arg17[%c0_70, %c0_71] : memref<8x32xf32, #tpu.memory_space<vmem>>, vector<8x32xf32>
      tpu.vector_store %arg17[%c0_70, %c0_71], %149 {strides = array<i32>} : memref<8x32xf32, #tpu.memory_space<vmem>>, vector<8x32xf32>,
    } else {
    }
    %c0 = arith.constant 0 : index
    %c0_1 = arith.constant 0 : index
    %c0_2 = arith.constant 0 : index
    %3 = vector.load %arg4[%c0, %c0_1, %c0_2] : memref<1x8x32xf32, #tpu.memory_space<vmem>>, vector<1x8x32xf32>
    %4 = vector.shape_cast %3 : vector<1x8x32xf32> to vector<8x32xf32>
    %5 = arith.truncf %4 : vector<8x32xf32> to vector<8x32xbf16>
    %c0_3 = arith.constant 0 : index
    %c0_4 = arith.constant 0 : index
    %6 = vector.load %arg7[%c0_3, %c0_4] : memref<32x32xbf16, #tpu.memory_space<vmem>>, vector<32x32xbf16>
    %cst = arith.constant dense<0.000000e+00> : vector<8x32xf32>
    %7 = tpu.matmul %5, %6, %cst {dimension_numbers = #tpu.dot_dimension_numbers<[1], [0], [0], [1], [0, 0, 1, 1], [], []>} : vector<8x32xbf16>, vector<32x32xbf16>, vector<8x32xf32> -> vector<8x32xf32>
    %c0_5 = arith.constant 0 : index
    %c0_6 = arith.constant 0 : index
    %c0_7 = arith.constant 0 : index
    %8 = vector.load %arg5[%c0_5, %c0_6, %c0_7] : memref<1x8x32xf32, #tpu.memory_space<vmem>>, vector<1x8x32xf32>
    %9 = vector.shape_cast %8 : vector<1x8x32xf32> to vector<8x32xf32>
    %10 = arith.truncf %9 : vector<8x32xf32> to vector<8x32xbf16>
    %c0_8 = arith.constant 0 : index
    %c0_9 = arith.constant 0 : index
    %11 = vector.load %arg8[%c0_8, %c0_9] : memref<32x32xbf16, #tpu.memory_space<vmem>>, vector<32x32xbf16>
    %cst_10 = arith.constant dense<0.000000e+00> : vector<8x32xf32>
    %12 = tpu.matmul %10, %11, %cst_10 {dimension_numbers = #tpu.dot_dimension_numbers<[1], [0], [0], [1], [0, 0, 1, 1], [], []>} : vector<8x32xbf16>, vector<32x32xbf16>, vector<8x32xf32> -> vector<8x32xf32>
    %c0_11 = arith.constant 0 : index
    %c0_12 = arith.constant 0 : index
    %13 = vector.load %arg14[%c0_11, %c0_12] : memref<8x32xf32, #tpu.memory_space<vmem>>, vector<8x32xf32>
    %c0_13 = arith.constant 0 : index
    %c0_14 = arith.constant 0 : index
    %14 = vector.load %arg15[%c0_13, %c0_14] : memref<8x4xf32, #tpu.memory_space<vmem>>, vector<8x4xf32>
    %c0_15 = arith.constant 0 : index
    %c0_16 = arith.constant 0 : index
    %15 = vector.load %arg16[%c0_15, %c0_16] : memref<8x4xf32, #tpu.memory_space<vmem>>, vector<8x4xf32>
    %c0_17 = arith.constant 0 : index
    %c0_18 = arith.constant 0 : index
    %16 = vector.load %arg17[%c0_17, %c0_18] : memref<8x32xf32, #tpu.memory_space<vmem>>, vector<8x32xf32>
    %17 = vector.extract_strided_slice %13 {offsets = [0, 0], sizes = [8, 8], strides = [1, 1]} : vector<8x32xf32> to vector<8x8xf32>
    %18 = arith.truncf %17 : vector<8x8xf32> to vector<8x8xbf16>
    %19 = vector.extract_strided_slice %7 {offsets = [0, 0], sizes = [8, 8], strides = [1, 1]} : vector<8x32xf32> to vector<8x8xf32>
    %20 = arith.truncf %19 : vector<8x8xf32> to vector<8x8xbf16>
    %21 = vector.extract_strided_slice %12 {offsets = [0, 0], sizes = [8, 8], strides = [1, 1]} : vector<8x32xf32> to vector<8x8xf32>
    %22 = arith.truncf %21 : vector<8x8xf32> to vector<8x8xbf16>
    %cst_19 = arith.constant dense<0.000000e+00> : vector<8x8xf32>
    %23 = tpu.matmul %18, %20, %cst_19 {dimension_numbers = #tpu.dot_dimension_numbers<[1], [1], [0], [0], [0, 0, 1, 0], [], []>} : vector<8x8xbf16>, vector<8x8xbf16>, vector<8x8xf32> -> vector<8x8xf32>
    %24 = vector.extract_strided_slice %14 {offsets = [0, 0], sizes = [8, 1], strides = [1, 1]} : vector<8x4xf32> to vector<8x1xf32>
    %cst_20 = arith.constant dense<0xFF800000> : vector<8xf32>
    %25 = vector.multi_reduction <maximumf>, %23, %cst_20 [1] : vector<8x8xf32> to vector<8xf32>
    %26 = vector.shape_cast %25 : vector<8xf32> to vector<8x1xf32>
    %27 = arith.maximumf %24, %26 : vector<8x1xf32>
    %28 = arith.subf %24, %27 : vector<8x1xf32>
    %29 = math.exp %28 : vector<8x1xf32>
    %30 = vector.broadcast %27 : vector<8x1xf32> to vector<8x8xf32>
    %31 = arith.subf %23, %30 : vector<8x8xf32>
    %32 = math.exp %31 : vector<8x8xf32>
    %33 = arith.truncf %32 : vector<8x8xf32> to vector<8x8xbf16>
    %cst_21 = arith.constant dense<0.000000e+00> : vector<8x8xf32>
    %34 = tpu.matmul %33, %22, %cst_21 {dimension_numbers = #tpu.dot_dimension_numbers<[1], [0], [0], [1], [0, 0, 1, 1], [], []>} : vector<8x8xbf16>, vector<8x8xbf16>, vector<8x8xf32> -> vector<8x8xf32>
    %c0_22 = arith.constant 0 : index
    %c0_23 = arith.constant 0 : index
    %35 = vector.load %arg15[%c0_22, %c0_23] : memref<8x4xf32, #tpu.memory_space<vmem>>, vector<8x1xf32>
    tpu.vector_store %arg15[%c0_22, %c0_23], %27 {strides = array<i32>} : memref<8x4xf32, #tpu.memory_space<vmem>>, vector<8x1xf32>,
    %36 = vector.extract_strided_slice %15 {offsets = [0, 0], sizes = [8, 1], strides = [1, 1]} : vector<8x4xf32> to vector<8x1xf32>
    %37 = arith.mulf %29, %36 : vector<8x1xf32>
    %cst_24 = arith.constant dense<0.000000e+00> : vector<8xf32>
    %38 = vector.multi_reduction <add>, %32, %cst_24 [1] : vector<8x8xf32> to vector<8xf32>
    %39 = vector.shape_cast %38 : vector<8xf32> to vector<8x1xf32>
    %40 = arith.addf %37, %39 : vector<8x1xf32>
    %c0_25 = arith.constant 0 : index
    %c0_26 = arith.constant 0 : index
    %41 = vector.load %arg16[%c0_25, %c0_26] : memref<8x4xf32, #tpu.memory_space<vmem>>, vector<8x1xf32>
    tpu.vector_store %arg16[%c0_25, %c0_26], %40 {strides = array<i32>} : memref<8x4xf32, #tpu.memory_space<vmem>>, vector<8x1xf32>,
    %42 = vector.extract_strided_slice %16 {offsets = [0, 0], sizes = [8, 8], strides = [1, 1]} : vector<8x32xf32> to vector<8x8xf32>
    %43 = vector.broadcast %29 : vector<8x1xf32> to vector<8x8xf32>
    %44 = arith.mulf %43, %42 : vector<8x8xf32>
    %45 = arith.addf %44, %34 : vector<8x8xf32>
    %c0_27 = arith.constant 0 : index
    %c0_28 = arith.constant 0 : index
    %46 = vector.load %arg17[%c0_27, %c0_28] : memref<8x32xf32, #tpu.memory_space<vmem>>, vector<8x8xf32>
    tpu.vector_store %arg17[%c0_27, %c0_28], %45 {strides = array<i32>} : memref<8x32xf32, #tpu.memory_space<vmem>>, vector<8x8xf32>,
    %47 = vector.extract_strided_slice %13 {offsets = [0, 8], sizes = [8, 8], strides = [1, 1]} : vector<8x32xf32> to vector<8x8xf32>
    %48 = arith.truncf %47 : vector<8x8xf32> to vector<8x8xbf16>
    %49 = vector.extract_strided_slice %7 {offsets = [0, 8], sizes = [8, 8], strides = [1, 1]} : vector<8x32xf32> to vector<8x8xf32>
    %50 = arith.truncf %49 : vector<8x8xf32> to vector<8x8xbf16>
    %51 = vector.extract_strided_slice %12 {offsets = [0, 8], sizes = [8, 8], strides = [1, 1]} : vector<8x32xf32> to vector<8x8xf32>
    %52 = arith.truncf %51 : vector<8x8xf32> to vector<8x8xbf16>
    %cst_29 = arith.constant dense<0.000000e+00> : vector<8x8xf32>
    %53 = tpu.matmul %48, %50, %cst_29 {dimension_numbers = #tpu.dot_dimension_numbers<[1], [1], [0], [0], [0, 0, 1, 0], [], []>} : vector<8x8xbf16>, vector<8x8xbf16>, vector<8x8xf32> -> vector<8x8xf32>
    %54 = vector.extract_strided_slice %14 {offsets = [0, 1], sizes = [8, 1], strides = [1, 1]} : vector<8x4xf32> to vector<8x1xf32>
    %cst_30 = arith.constant dense<0xFF800000> : vector<8xf32>
    %55 = vector.multi_reduction <maximumf>, %53, %cst_30 [1] : vector<8x8xf32> to vector<8xf32>
    %56 = vector.shape_cast %55 : vector<8xf32> to vector<8x1xf32>
    %57 = arith.maximumf %54, %56 : vector<8x1xf32>
    %58 = arith.subf %54, %57 : vector<8x1xf32>
    %59 = math.exp %58 : vector<8x1xf32>
    %60 = vector.broadcast %57 : vector<8x1xf32> to vector<8x8xf32>
    %61 = arith.subf %53, %60 : vector<8x8xf32>
    %62 = math.exp %61 : vector<8x8xf32>
    %63 = arith.truncf %62 : vector<8x8xf32> to vector<8x8xbf16>
    %cst_31 = arith.constant dense<0.000000e+00> : vector<8x8xf32>
    %64 = tpu.matmul %63, %52, %cst_31 {dimension_numbers = #tpu.dot_dimension_numbers<[1], [0], [0], [1], [0, 0, 1, 1], [], []>} : vector<8x8xbf16>, vector<8x8xbf16>, vector<8x8xf32> -> vector<8x8xf32>
    %c0_32 = arith.constant 0 : index
    %c1 = arith.constant 1 : index
    %65 = vector.load %arg15[%c0_32, %c1] : memref<8x4xf32, #tpu.memory_space<vmem>>, vector<8x1xf32>
    tpu.vector_store %arg15[%c0_32, %c1], %57 {strides = array<i32>} : memref<8x4xf32, #tpu.memory_space<vmem>>, vector<8x1xf32>,
    %66 = vector.extract_strided_slice %15 {offsets = [0, 1], sizes = [8, 1], strides = [1, 1]} : vector<8x4xf32> to vector<8x1xf32>
    %67 = arith.mulf %59, %66 : vector<8x1xf32>
    %cst_33 = arith.constant dense<0.000000e+00> : vector<8xf32>
    %68 = vector.multi_reduction <add>, %62, %cst_33 [1] : vector<8x8xf32> to vector<8xf32>
    %69 = vector.shape_cast %68 : vector<8xf32> to vector<8x1xf32>
    %70 = arith.addf %67, %69 : vector<8x1xf32>
    %c0_34 = arith.constant 0 : index
    %c1_35 = arith.constant 1 : index
    %71 = vector.load %arg16[%c0_34, %c1_35] : memref<8x4xf32, #tpu.memory_space<vmem>>, vector<8x1xf32>
    tpu.vector_store %arg16[%c0_34, %c1_35], %70 {strides = array<i32>} : memref<8x4xf32, #tpu.memory_space<vmem>>, vector<8x1xf32>,
    %72 = vector.extract_strided_slice %16 {offsets = [0, 8], sizes = [8, 8], strides = [1, 1]} : vector<8x32xf32> to vector<8x8xf32>
    %73 = vector.broadcast %59 : vector<8x1xf32> to vector<8x8xf32>
    %74 = arith.mulf %73, %72 : vector<8x8xf32>
    %75 = arith.addf %74, %64 : vector<8x8xf32>
    %c0_36 = arith.constant 0 : index
    %c8 = arith.constant 8 : index
    %76 = vector.load %arg17[%c0_36, %c8] : memref<8x32xf32, #tpu.memory_space<vmem>>, vector<8x8xf32>
    tpu.vector_store %arg17[%c0_36, %c8], %75 {strides = array<i32>} : memref<8x32xf32, #tpu.memory_space<vmem>>, vector<8x8xf32>,
    %77 = vector.extract_strided_slice %13 {offsets = [0, 16], sizes = [8, 8], strides = [1, 1]} : vector<8x32xf32> to vector<8x8xf32>
    %78 = arith.truncf %77 : vector<8x8xf32> to vector<8x8xbf16>
    %79 = vector.extract_strided_slice %7 {offsets = [0, 16], sizes = [8, 8], strides = [1, 1]} : vector<8x32xf32> to vector<8x8xf32>
    %80 = arith.truncf %79 : vector<8x8xf32> to vector<8x8xbf16>
    %81 = vector.extract_strided_slice %12 {offsets = [0, 16], sizes = [8, 8], strides = [1, 1]} : vector<8x32xf32> to vector<8x8xf32>
    %82 = arith.truncf %81 : vector<8x8xf32> to vector<8x8xbf16>
    %cst_37 = arith.constant dense<0.000000e+00> : vector<8x8xf32>
    %83 = tpu.matmul %78, %80, %cst_37 {dimension_numbers = #tpu.dot_dimension_numbers<[1], [1], [0], [0], [0, 0, 1, 0], [], []>} : vector<8x8xbf16>, vector<8x8xbf16>, vector<8x8xf32> -> vector<8x8xf32>
    %84 = vector.extract_strided_slice %14 {offsets = [0, 2], sizes = [8, 1], strides = [1, 1]} : vector<8x4xf32> to vector<8x1xf32>
    %cst_38 = arith.constant dense<0xFF800000> : vector<8xf32>
    %85 = vector.multi_reduction <maximumf>, %83, %cst_38 [1] : vector<8x8xf32> to vector<8xf32>
    %86 = vector.shape_cast %85 : vector<8xf32> to vector<8x1xf32>
    %87 = arith.maximumf %84, %86 : vector<8x1xf32>
    %88 = arith.subf %84, %87 : vector<8x1xf32>
    %89 = math.exp %88 : vector<8x1xf32>
    %90 = vector.broadcast %87 : vector<8x1xf32> to vector<8x8xf32>
    %91 = arith.subf %83, %90 : vector<8x8xf32>
    %92 = math.exp %91 : vector<8x8xf32>
    %93 = arith.truncf %92 : vector<8x8xf32> to vector<8x8xbf16>
    %cst_39 = arith.constant dense<0.000000e+00> : vector<8x8xf32>
    %94 = tpu.matmul %93, %82, %cst_39 {dimension_numbers = #tpu.dot_dimension_numbers<[1], [0], [0], [1], [0, 0, 1, 1], [], []>} : vector<8x8xbf16>, vector<8x8xbf16>, vector<8x8xf32> -> vector<8x8xf32>
    %c0_40 = arith.constant 0 : index
    %c2 = arith.constant 2 : index
    %95 = vector.load %arg15[%c0_40, %c2] : memref<8x4xf32, #tpu.memory_space<vmem>>, vector<8x1xf32>
    tpu.vector_store %arg15[%c0_40, %c2], %87 {strides = array<i32>} : memref<8x4xf32, #tpu.memory_space<vmem>>, vector<8x1xf32>,
    %96 = vector.extract_strided_slice %15 {offsets = [0, 2], sizes = [8, 1], strides = [1, 1]} : vector<8x4xf32> to vector<8x1xf32>
    %97 = arith.mulf %89, %96 : vector<8x1xf32>
    %cst_41 = arith.constant dense<0.000000e+00> : vector<8xf32>
    %98 = vector.multi_reduction <add>, %92, %cst_41 [1] : vector<8x8xf32> to vector<8xf32>
    %99 = vector.shape_cast %98 : vector<8xf32> to vector<8x1xf32>
    %100 = arith.addf %97, %99 : vector<8x1xf32>
    %c0_42 = arith.constant 0 : index
    %c2_43 = arith.constant 2 : index
    %101 = vector.load %arg16[%c0_42, %c2_43] : memref<8x4xf32, #tpu.memory_space<vmem>>, vector<8x1xf32>
    tpu.vector_store %arg16[%c0_42, %c2_43], %100 {strides = array<i32>} : memref<8x4xf32, #tpu.memory_space<vmem>>, vector<8x1xf32>,
    %102 = vector.extract_strided_slice %16 {offsets = [0, 16], sizes = [8, 8], strides = [1, 1]} : vector<8x32xf32> to vector<8x8xf32>
    %103 = vector.broadcast %89 : vector<8x1xf32> to vector<8x8xf32>
    %104 = arith.mulf %103, %102 : vector<8x8xf32>
    %105 = arith.addf %104, %94 : vector<8x8xf32>
    %c0_44 = arith.constant 0 : index
    %c16 = arith.constant 16 : index
    %106 = vector.load %arg17[%c0_44, %c16] : memref<8x32xf32, #tpu.memory_space<vmem>>, vector<8x8xf32>
    tpu.vector_store %arg17[%c0_44, %c16], %105 {strides = array<i32>} : memref<8x32xf32, #tpu.memory_space<vmem>>, vector<8x8xf32>,
    %107 = vector.extract_strided_slice %13 {offsets = [0, 24], sizes = [8, 8], strides = [1, 1]} : vector<8x32xf32> to vector<8x8xf32>
    %108 = arith.truncf %107 : vector<8x8xf32> to vector<8x8xbf16>
    %109 = vector.extract_strided_slice %7 {offsets = [0, 24], sizes = [8, 8], strides = [1, 1]} : vector<8x32xf32> to vector<8x8xf32>
    %110 = arith.truncf %109 : vector<8x8xf32> to vector<8x8xbf16>
    %111 = vector.extract_strided_slice %12 {offsets = [0, 24], sizes = [8, 8], strides = [1, 1]} : vector<8x32xf32> to vector<8x8xf32>
    %112 = arith.truncf %111 : vector<8x8xf32> to vector<8x8xbf16>
    %cst_45 = arith.constant dense<0.000000e+00> : vector<8x8xf32>
    %113 = tpu.matmul %108, %110, %cst_45 {dimension_numbers = #tpu.dot_dimension_numbers<[1], [1], [0], [0], [0, 0, 1, 0], [], []>} : vector<8x8xbf16>, vector<8x8xbf16>, vector<8x8xf32> -> vector<8x8xf32>
    %114 = vector.extract_strided_slice %14 {offsets = [0, 3], sizes = [8, 1], strides = [1, 1]} : vector<8x4xf32> to vector<8x1xf32>
    %cst_46 = arith.constant dense<0xFF800000> : vector<8xf32>
    %115 = vector.multi_reduction <maximumf>, %113, %cst_46 [1] : vector<8x8xf32> to vector<8xf32>
    %116 = vector.shape_cast %115 : vector<8xf32> to vector<8x1xf32>
    %117 = arith.maximumf %114, %116 : vector<8x1xf32>
    %118 = arith.subf %114, %117 : vector<8x1xf32>
    %119 = math.exp %118 : vector<8x1xf32>
    %120 = vector.broadcast %117 : vector<8x1xf32> to vector<8x8xf32>
    %121 = arith.subf %113, %120 : vector<8x8xf32>
    %122 = math.exp %121 : vector<8x8xf32>
    %123 = arith.truncf %122 : vector<8x8xf32> to vector<8x8xbf16>
    %cst_47 = arith.constant dense<0.000000e+00> : vector<8x8xf32>
    %124 = tpu.matmul %123, %112, %cst_47 {dimension_numbers = #tpu.dot_dimension_numbers<[1], [0], [0], [1], [0, 0, 1, 1], [], []>} : vector<8x8xbf16>, vector<8x8xbf16>, vector<8x8xf32> -> vector<8x8xf32>
    %c0_48 = arith.constant 0 : index
    %c3 = arith.constant 3 : index
    %125 = vector.load %arg15[%c0_48, %c3] : memref<8x4xf32, #tpu.memory_space<vmem>>, vector<8x1xf32>
    tpu.vector_store %arg15[%c0_48, %c3], %117 {strides = array<i32>} : memref<8x4xf32, #tpu.memory_space<vmem>>, vector<8x1xf32>,
    %126 = vector.extract_strided_slice %15 {offsets = [0, 3], sizes = [8, 1], strides = [1, 1]} : vector<8x4xf32> to vector<8x1xf32>
    %127 = arith.mulf %119, %126 : vector<8x1xf32>
    %cst_49 = arith.constant dense<0.000000e+00> : vector<8xf32>
    %128 = vector.multi_reduction <add>, %122, %cst_49 [1] : vector<8x8xf32> to vector<8xf32>
    %129 = vector.shape_cast %128 : vector<8xf32> to vector<8x1xf32>
    %130 = arith.addf %127, %129 : vector<8x1xf32>
    %c0_50 = arith.constant 0 : index
    %c3_51 = arith.constant 3 : index
    %131 = vector.load %arg16[%c0_50, %c3_51] : memref<8x4xf32, #tpu.memory_space<vmem>>, vector<8x1xf32>
    tpu.vector_store %arg16[%c0_50, %c3_51], %130 {strides = array<i32>} : memref<8x4xf32, #tpu.memory_space<vmem>>, vector<8x1xf32>,
    %132 = vector.extract_strided_slice %16 {offsets = [0, 24], sizes = [8, 8], strides = [1, 1]} : vector<8x32xf32> to vector<8x8xf32>
    %133 = vector.broadcast %119 : vector<8x1xf32> to vector<8x8xf32>
    %134 = arith.mulf %133, %132 : vector<8x8xf32>
    %135 = arith.addf %134, %124 : vector<8x8xf32>
    %c0_52 = arith.constant 0 : index
    %c24 = arith.constant 24 : index
    %136 = vector.load %arg17[%c0_52, %c24] : memref<8x32xf32, #tpu.memory_space<vmem>>, vector<8x8xf32>
    tpu.vector_store %arg17[%c0_52, %c24], %135 {strides = array<i32>} : memref<8x32xf32, #tpu.memory_space<vmem>>, vector<8x8xf32>,
    %c0_i32_53 = arith.constant 0 : i32
    %137 = arith.cmpi eq, %arg2, %c0_i32_53 : i32
    %138 = arith.extui %137 : i1 to i32
    %c0_i32_54 = arith.constant 0 : i32
    %139 = arith.cmpi ne, %138, %c0_i32_54 : i32
    scf.if %139 {
      %c0_55 = arith.constant 0 : index
      %c0_56 = arith.constant 0 : index
      %140 = vector.load %arg16[%c0_55, %c0_56] : memref<8x4xf32, #tpu.memory_space<vmem>>, vector<8x4xf32>
      %141 = tpu.reciprocal %140 {approx = true} : vector<8x4xf32> -> vector<8x4xf32>
      %c0_57 = arith.constant 0 : index
      %c0_58 = arith.constant 0 : index
      %142 = vector.load %arg17[%c0_57, %c0_58] : memref<8x32xf32, #tpu.memory_space<vmem>>, vector<8x8xf32>
      %143 = vector.extract_strided_slice %141 {offsets = [0, 0], sizes = [8, 1], strides = [1, 1]} : vector<8x4xf32> to vector<8x1xf32>
      %144 = vector.broadcast %143 : vector<8x1xf32> to vector<8x8xf32>
      %145 = arith.mulf %142, %144 : vector<8x8xf32>
      %c0_59 = arith.constant 0 : index
      %c0_60 = arith.constant 0 : index
      %146 = vector.load %arg17[%c0_59, %c0_60] : memref<8x32xf32, #tpu.memory_space<vmem>>, vector<8x8xf32>
      tpu.vector_store %arg17[%c0_59, %c0_60], %145 {strides = array<i32>} : memref<8x32xf32, #tpu.memory_space<vmem>>, vector<8x8xf32>,
      %c0_61 = arith.constant 0 : index
      %c8_62 = arith.constant 8 : index
      %147 = vector.load %arg17[%c0_61, %c8_62] : memref<8x32xf32, #tpu.memory_space<vmem>>, vector<8x8xf32>
      %148 = vector.extract_strided_slice %141 {offsets = [0, 1], sizes = [8, 1], strides = [1, 1]} : vector<8x4xf32> to vector<8x1xf32>
      %149 = vector.broadcast %148 : vector<8x1xf32> to vector<8x8xf32>
      %150 = arith.mulf %147, %149 : vector<8x8xf32>
      %c0_63 = arith.constant 0 : index
      %c8_64 = arith.constant 8 : index
      %151 = vector.load %arg17[%c0_63, %c8_64] : memref<8x32xf32, #tpu.memory_space<vmem>>, vector<8x8xf32>
      tpu.vector_store %arg17[%c0_63, %c8_64], %150 {strides = array<i32>} : memref<8x32xf32, #tpu.memory_space<vmem>>, vector<8x8xf32>,
      %c0_65 = arith.constant 0 : index
      %c16_66 = arith.constant 16 : index
      %152 = vector.load %arg17[%c0_65, %c16_66] : memref<8x32xf32, #tpu.memory_space<vmem>>, vector<8x8xf32>
      %153 = vector.extract_strided_slice %141 {offsets = [0, 2], sizes = [8, 1], strides = [1, 1]} : vector<8x4xf32> to vector<8x1xf32>
      %154 = vector.broadcast %153 : vector<8x1xf32> to vector<8x8xf32>
      %155 = arith.mulf %152, %154 : vector<8x8xf32>
      %c0_67 = arith.constant 0 : index
      %c16_68 = arith.constant 16 : index
      %156 = vector.load %arg17[%c0_67, %c16_68] : memref<8x32xf32, #tpu.memory_space<vmem>>, vector<8x8xf32>
      tpu.vector_store %arg17[%c0_67, %c16_68], %155 {strides = array<i32>} : memref<8x32xf32, #tpu.memory_space<vmem>>, vector<8x8xf32>,
      %c0_69 = arith.constant 0 : index
      %c24_70 = arith.constant 24 : index
      %157 = vector.load %arg17[%c0_69, %c24_70] : memref<8x32xf32, #tpu.memory_space<vmem>>, vector<8x8xf32>
      %158 = vector.extract_strided_slice %141 {offsets = [0, 3], sizes = [8, 1], strides = [1, 1]} : vector<8x4xf32> to vector<8x1xf32>
      %159 = vector.broadcast %158 : vector<8x1xf32> to vector<8x8xf32>
      %160 = arith.mulf %157, %159 : vector<8x8xf32>
      %c0_71 = arith.constant 0 : index
      %c24_72 = arith.constant 24 : index
      %161 = vector.load %arg17[%c0_71, %c24_72] : memref<8x32xf32, #tpu.memory_space<vmem>>, vector<8x8xf32>
      tpu.vector_store %arg17[%c0_71, %c24_72], %160 {strides = array<i32>} : memref<8x32xf32, #tpu.memory_space<vmem>>, vector<8x8xf32>,
      %c0_73 = arith.constant 0 : index
      %c0_74 = arith.constant 0 : index
      %162 = vector.load %arg17[%c0_73, %c0_74] : memref<8x32xf32, #tpu.memory_space<vmem>>, vector<8x32xf32>
      %163 = arith.truncf %162 : vector<8x32xf32> to vector<8x32xbf16>
      %c0_75 = arith.constant 0 : index
      %c0_76 = arith.constant 0 : index
      %164 = vector.load %arg9[%c0_75, %c0_76] : memref<32x32xbf16, #tpu.memory_space<vmem>>, vector<32x32xbf16>
      %cst_77 = arith.constant dense<0.000000e+00> : vector<8x32xf32>
      %165 = tpu.matmul %163, %164, %cst_77 {dimension_numbers = #tpu.dot_dimension_numbers<[1], [0], [0], [1], [0, 0, 1, 1], [], []>} : vector<8x32xbf16>, vector<32x32xbf16>, vector<8x32xf32> -> vector<8x32xf32>
      %c0_78 = arith.constant 0 : index
      %c0_79 = arith.constant 0 : index
      %166 = vector.load %arg10[%c0_78, %c0_79] : memref<1x32xf32, #tpu.memory_space<vmem>>, vector<1x32xf32>
      %167 = vector.broadcast %166 : vector<1x32xf32> to vector<8x32xf32>
      %168 = arith.addf %165, %167 : vector<8x32xf32>
      %c0_80 = arith.constant 0 : index
      %c0_81 = arith.constant 0 : index
      %c0_82 = arith.constant 0 : index
      %169 = vector.load %arg3[%c0_80, %c0_81, %c0_82] : memref<1x8x32xbf16, #tpu.memory_space<vmem>>, vector<1x8x32xbf16>
      %170 = vector.shape_cast %169 : vector<1x8x32xbf16> to vector<8x32xbf16>
      %171 = arith.extf %170 : vector<8x32xbf16> to vector<8x32xf32>
      %172 = arith.addf %168, %171 : vector<8x32xf32>
      %cst_83 = arith.constant dense<0.000000e+00> : vector<8xf32>
      %173 = vector.multi_reduction <add>, %172, %cst_83 [1] : vector<8x32xf32> to vector<8xf32>
      %174 = vector.shape_cast %173 : vector<8xf32> to vector<8x1xf32>
      %cst_84 = arith.constant 3.200000e+01 : f32
      %175 = vector.broadcast %cst_84 : f32 to vector<8x1xf32>
      %176 = arith.divf %174, %175 : vector<8x1xf32>
      %177 = vector.broadcast %176 : vector<8x1xf32> to vector<8x32xf32>
      %178 = arith.subf %172, %177 : vector<8x32xf32>
      %179 = vector.broadcast %176 : vector<8x1xf32> to vector<8x32xf32>
      %180 = arith.subf %172, %179 : vector<8x32xf32>
      %181 = arith.mulf %178, %180 : vector<8x32xf32>
      %cst_85 = arith.constant dense<0.000000e+00> : vector<8xf32>
      %182 = vector.multi_reduction <add>, %181, %cst_85 [1] : vector<8x32xf32> to vector<8xf32>
      %183 = vector.shape_cast %182 : vector<8xf32> to vector<8x1xf32>
      %cst_86 = arith.constant 3.200000e+01 : f32
      %184 = vector.broadcast %cst_86 : f32 to vector<8x1xf32>
      %185 = arith.divf %183, %184 : vector<8x1xf32>
      %186 = vector.broadcast %176 : vector<8x1xf32> to vector<8x32xf32>
      %187 = arith.subf %172, %186 : vector<8x32xf32>
      %cst_87 = arith.constant 9.99999974E-6 : f32
      %188 = vector.broadcast %cst_87 : f32 to vector<8x1xf32>
      %189 = arith.addf %185, %188 : vector<8x1xf32>
      %190 = math.rsqrt %189 : vector<8x1xf32>
      %191 = vector.broadcast %190 : vector<8x1xf32> to vector<8x32xf32>
      %192 = arith.mulf %187, %191 : vector<8x32xf32>
      %c0_88 = arith.constant 0 : index
      %c0_89 = arith.constant 0 : index
      %193 = vector.load %arg11[%c0_88, %c0_89] : memref<1x32xf32, #tpu.memory_space<vmem>>, vector<1x32xf32>
      %194 = vector.broadcast %193 : vector<1x32xf32> to vector<8x32xf32>
      %195 = arith.mulf %192, %194 : vector<8x32xf32>
      %c0_90 = arith.constant 0 : index
      %c0_91 = arith.constant 0 : index
      %196 = vector.load %arg12[%c0_90, %c0_91] : memref<1x32xf32, #tpu.memory_space<vmem>>, vector<1x32xf32>
      %197 = vector.broadcast %196 : vector<1x32xf32> to vector<8x32xf32>
      %198 = arith.addf %195, %197 : vector<8x32xf32>
      %199 = arith.truncf %198 : vector<8x32xf32> to vector<8x32xbf16>
      %c0_92 = arith.constant 0 : index
      %c0_93 = arith.constant 0 : index
      %c0_94 = arith.constant 0 : index
      %200 = vector.load %arg13[%c0_92, %c0_93, %c0_94] : memref<1x8x32xbf16, #tpu.memory_space<vmem>>, vector<1x8x32xbf16>
      %201 = vector.shape_cast %200 : vector<1x8x32xbf16> to vector<8x32xbf16>
      %202 = vector.shape_cast %199 : vector<8x32xbf16> to vector<1x8x32xbf16>
      tpu.vector_store %arg13[%c0_92, %c0_93, %c0_94], %202 {strides = array<i32>} : memref<1x8x32xbf16, #tpu.memory_space<vmem>>, vector<1x8x32xbf16>,
    } else {
    }
    return
  }
  func.func @transform_0(%arg0: i32, %arg1: i32, %arg2: i32) -> (i32, i32, i32) {
    %c0_i32 = arith.constant 0 : i32
    %c0_i32_0 = arith.constant 0 : i32
    return %arg0, %arg1, %c0_i32 : i32, i32, i32
  }
  func.func @transform_1(%arg0: i32, %arg1: i32, %arg2: i32) -> (i32, i32, i32) {
    %c0_i32 = arith.constant 0 : i32
    %c0_i32_0 = arith.constant 0 : i32
    return %arg0, %arg2, %c0_i32 : i32, i32, i32
  }
  func.func @transform_2(%arg0: i32, %arg1: i32, %arg2: i32) -> (i32, i32, i32) {
    %c0_i32 = arith.constant 0 : i32
    %c0_i32_0 = arith.constant 0 : i32
    return %arg0, %arg2, %c0_i32 : i32, i32, i32
  }
  func.func @transform_3(%arg0: i32, %arg1: i32, %arg2: i32) -> (i32, i32) {
    %c0_i32 = arith.constant 0 : i32
    %c0_i32_0 = arith.constant 0 : i32
    %c0_i32_1 = arith.constant 0 : i32
    return %c0_i32, %c0_i32_0 : i32, i32
  }
  func.func @transform_4(%arg0: i32, %arg1: i32, %arg2: i32) -> (i32, i32) {
    %c0_i32 = arith.constant 0 : i32
    %c0_i32_0 = arith.constant 0 : i32
    %c0_i32_1 = arith.constant 0 : i32
    return %c0_i32, %c0_i32_0 : i32, i32
  }
  func.func @transform_5(%arg0: i32, %arg1: i32, %arg2: i32) -> (i32, i32) {
    %c0_i32 = arith.constant 0 : i32
    %c0_i32_0 = arith.constant 0 : i32
    %c0_i32_1 = arith.constant 0 : i32
    return %c0_i32, %c0_i32_0 : i32, i32
  }
  func.func @transform_6(%arg0: i32, %arg1: i32, %arg2: i32) -> (i32, i32) {
    %c0_i32 = arith.constant 0 : i32
    %c0_i32_0 = arith.constant 0 : i32
    %c0_i32_1 = arith.constant 0 : i32
    return %c0_i32, %c0_i32_0 : i32, i32
  }
  func.func @transform_7(%arg0: i32, %arg1: i32, %arg2: i32) -> (i32, i32) {
    %c0_i32 = arith.constant 0 : i32
    %c0_i32_0 = arith.constant 0 : i32
    %c0_i32_1 = arith.constant 0 : i32
    return %c0_i32, %c0_i32_0 : i32, i32
  }
  func.func @transform_8(%arg0: i32, %arg1: i32, %arg2: i32) -> (i32, i32) {
    %c0_i32 = arith.constant 0 : i32
    %c0_i32_0 = arith.constant 0 : i32
    %c0_i32_1 = arith.constant 0 : i32
    return %c0_i32, %c0_i32_0 : i32, i32
  }
  func.func @transform_9(%arg0: i32, %arg1: i32, %arg2: i32) -> (i32, i32) {
    %c0_i32 = arith.constant 0 : i32
    %c0_i32_0 = arith.constant 0 : i32
    %c0_i32_1 = arith.constant 0 : i32
    return %c0_i32, %c0_i32_0 : i32, i32
  }
  func.func @transform_10(%arg0: i32, %arg1: i32, %arg2: i32) -> (i32, i32, i32) {
    %c0_i32 = arith.constant 0 : i32
    %c0_i32_0 = arith.constant 0 : i32
    return %arg0, %arg1, %c0_i32 : i32, i32, i32
  }
}

module attributes {stable_mosaic.version = 11 : i64} {
  func.func @_attn_flash_kernel(%arg0: i32, %arg1: i32, %arg2: i32, %arg3: memref<1x8x32xf32, #tpu.memory_space<vmem>>, %arg4: memref<1x8x32xf32, #tpu.memory_space<vmem>>, %arg5: memref<1x8x32xf32, #tpu.memory_space<vmem>>, %arg6: memref<32x32xbf16, #tpu.memory_space<vmem>>, %arg7: memref<32x32xbf16, #tpu.memory_space<vmem>>, %arg8: memref<32x32xbf16, #tpu.memory_space<vmem>>, %arg9: memref<32x32xbf16, #tpu.memory_space<vmem>>, %arg10: memref<1x32xf32, #tpu.memory_space<vmem>>, %arg11: memref<1x32xf32, #tpu.memory_space<vmem>>, %arg12: memref<1x32xf32, #tpu.memory_space<vmem>>, %arg13: memref<1x8x32xbf16, #tpu.memory_space<vmem>>, %arg14: memref<8x32xf32, #tpu.memory_space<vmem>>, %arg15: memref<8x4xf32, #tpu.memory_space<vmem>>, %arg16: memref<8x4xf32, #tpu.memory_space<vmem>>, %arg17: memref<8x32xf32, #tpu.memory_space<vmem>>) attributes {dimension_semantics = [#tpu.dimension_semantics<parallel>, #tpu.dimension_semantics<parallel>, #tpu.dimension_semantics<arbitrary>], iteration_bounds = array<i64: 2, 1, 1>, scalar_prefetch = 0 : i64, scratch_operands = 4 : i64, tpu.core_type = #tpu.core_type<tc>, window_params = [{transform_indices = @transform_0, window_bounds = array<i64: 1, 8, 32>}, {transform_indices = @transform_1, window_bounds = array<i64: 1, 8, 32>}, {transform_indices = @transform_2, window_bounds = array<i64: 1, 8, 32>}, {pipeline_mode = #tpu.pipeline_mode<synchronous>, transform_indices = @transform_3, window_bounds = array<i64: 32, 32>}, {pipeline_mode = #tpu.pipeline_mode<synchronous>, transform_indices = @transform_4, window_bounds = array<i64: 32, 32>}, {pipeline_mode = #tpu.pipeline_mode<synchronous>, transform_indices = @transform_5, window_bounds = array<i64: 32, 32>}, {pipeline_mode = #tpu.pipeline_mode<synchronous>, transform_indices = @transform_6, window_bounds = array<i64: 32, 32>}, {pipeline_mode = #tpu.pipeline_mode<synchronous>, transform_indices = @transform_7, window_bounds = array<i64: 1, 32>}, {pipeline_mode = #tpu.pipeline_mode<synchronous>, transform_indices = @transform_8, window_bounds = array<i64: 1, 32>}, {pipeline_mode = #tpu.pipeline_mode<synchronous>, transform_indices = @transform_9, window_bounds = array<i64: 1, 32>}, {transform_indices = @transform_10, window_bounds = array<i64: 1, 8, 32>}]} {
    %c0_i32 = arith.constant 0 : i32
    %0 = arith.cmpi eq, %arg2, %c0_i32 : i32
    %1 = arith.extui %0 : i1 to i32
    %c0_i32_0 = arith.constant 0 : i32
    %2 = arith.cmpi ne, %1, %c0_i32_0 : i32
    scf.if %2 {
      %c0_60 = arith.constant 0 : index
      %c0_61 = arith.constant 0 : index
      %c0_62 = arith.constant 0 : index
      %157 = vector.load %arg3[%c0_60, %c0_61, %c0_62] : memref<1x8x32xf32, #tpu.memory_space<vmem>>, vector<1x8x32xf32>
      %158 = vector.shape_cast %157 : vector<1x8x32xf32> to vector<8x32xf32>
      %159 = arith.truncf %158 : vector<8x32xf32> to vector<8x32xbf16>
      %c0_63 = arith.constant 0 : index
      %c0_64 = arith.constant 0 : index
      %160 = vector.load %arg6[%c0_63, %c0_64] : memref<32x32xbf16, #tpu.memory_space<vmem>>, vector<32x32xbf16>
      %cst_65 = arith.constant dense<0.000000e+00> : vector<8x32xf32>
      %161 = tpu.matmul %159, %160, %cst_65 {dimension_numbers = #tpu.dot_dimension_numbers<[1], [0], [0], [1], [0, 0, 1, 1], [], []>} : vector<8x32xbf16>, vector<32x32xbf16>, vector<8x32xf32> -> vector<8x32xf32>
      %c0_66 = arith.constant 0 : index
      %c0_67 = arith.constant 0 : index
      %162 = vector.load %arg14[%c0_66, %c0_67] : memref<8x32xf32, #tpu.memory_space<vmem>>, vector<8x32xf32>
      tpu.vector_store %arg14[%c0_66, %c0_67], %161 {strides = array<i32>} : memref<8x32xf32, #tpu.memory_space<vmem>>, vector<8x32xf32>,
      %cst_68 = arith.constant -1.000000e+30 : f32
      %163 = vector.broadcast %cst_68 : f32 to vector<8x4xf32>
      %c0_69 = arith.constant 0 : index
      %c0_70 = arith.constant 0 : index
      %164 = vector.load %arg15[%c0_69, %c0_70] : memref<8x4xf32, #tpu.memory_space<vmem>>, vector<8x4xf32>
      tpu.vector_store %arg15[%c0_69, %c0_70], %163 {strides = array<i32>} : memref<8x4xf32, #tpu.memory_space<vmem>>, vector<8x4xf32>,
      %cst_71 = arith.constant 0.000000e+00 : f32
      %165 = vector.broadcast %cst_71 : f32 to vector<8x4xf32>
      %c0_72 = arith.constant 0 : index
      %c0_73 = arith.constant 0 : index
      %166 = vector.load %arg16[%c0_72, %c0_73] : memref<8x4xf32, #tpu.memory_space<vmem>>, vector<8x4xf32>
      tpu.vector_store %arg16[%c0_72, %c0_73], %165 {strides = array<i32>} : memref<8x4xf32, #tpu.memory_space<vmem>>, vector<8x4xf32>,
      %cst_74 = arith.constant 0.000000e+00 : f32
      %167 = vector.broadcast %cst_74 : f32 to vector<8x32xf32>
      %c0_75 = arith.constant 0 : index
      %c0_76 = arith.constant 0 : index
      %168 = vector.load %arg17[%c0_75, %c0_76] : memref<8x32xf32, #tpu.memory_space<vmem>>, vector<8x32xf32>
      tpu.vector_store %arg17[%c0_75, %c0_76], %167 {strides = array<i32>} : memref<8x32xf32, #tpu.memory_space<vmem>>, vector<8x32xf32>,
    } else {
    }
    %c0 = arith.constant 0 : index
    %c0_1 = arith.constant 0 : index
    %c0_2 = arith.constant 0 : index
    %3 = vector.load %arg4[%c0, %c0_1, %c0_2] : memref<1x8x32xf32, #tpu.memory_space<vmem>>, vector<1x8x32xf32>
    %4 = vector.shape_cast %3 : vector<1x8x32xf32> to vector<8x32xf32>
    %5 = arith.truncf %4 : vector<8x32xf32> to vector<8x32xbf16>
    %c0_3 = arith.constant 0 : index
    %c0_4 = arith.constant 0 : index
    %6 = vector.load %arg7[%c0_3, %c0_4] : memref<32x32xbf16, #tpu.memory_space<vmem>>, vector<32x32xbf16>
    %cst = arith.constant dense<0.000000e+00> : vector<8x32xf32>
    %7 = tpu.matmul %5, %6, %cst {dimension_numbers = #tpu.dot_dimension_numbers<[1], [0], [0], [1], [0, 0, 1, 1], [], []>} : vector<8x32xbf16>, vector<32x32xbf16>, vector<8x32xf32> -> vector<8x32xf32>
    %c0_5 = arith.constant 0 : index
    %c0_6 = arith.constant 0 : index
    %c0_7 = arith.constant 0 : index
    %8 = vector.load %arg5[%c0_5, %c0_6, %c0_7] : memref<1x8x32xf32, #tpu.memory_space<vmem>>, vector<1x8x32xf32>
    %9 = vector.shape_cast %8 : vector<1x8x32xf32> to vector<8x32xf32>
    %10 = arith.truncf %9 : vector<8x32xf32> to vector<8x32xbf16>
    %c0_8 = arith.constant 0 : index
    %c0_9 = arith.constant 0 : index
    %11 = vector.load %arg8[%c0_8, %c0_9] : memref<32x32xbf16, #tpu.memory_space<vmem>>, vector<32x32xbf16>
    %cst_10 = arith.constant dense<0.000000e+00> : vector<8x32xf32>
    %12 = tpu.matmul %10, %11, %cst_10 {dimension_numbers = #tpu.dot_dimension_numbers<[1], [0], [0], [1], [0, 0, 1, 1], [], []>} : vector<8x32xbf16>, vector<32x32xbf16>, vector<8x32xf32> -> vector<8x32xf32>
    %c8_i32 = arith.constant 8 : i32
    %13 = arith.muli %arg1, %c8_i32 : i32
    %14 = tpu.iota {dimensions = array<i32: 0>} : vector<8x8xi32>
    %15 = vector.broadcast %13 : i32 to vector<8x8xi32>
    %16 = arith.addi %15, %14 : vector<8x8xi32>
    %c8_i32_11 = arith.constant 8 : i32
    %17 = arith.muli %arg2, %c8_i32_11 : i32
    %18 = tpu.iota {dimensions = array<i32: 1>} : vector<8x8xi32>
    %19 = vector.broadcast %17 : i32 to vector<8x8xi32>
    %20 = arith.addi %19, %18 : vector<8x8xi32>
    %21 = arith.cmpi sgt, %20, %16 : vector<8x8xi32>
    %c0_12 = arith.constant 0 : index
    %c0_13 = arith.constant 0 : index
    %22 = vector.load %arg14[%c0_12, %c0_13] : memref<8x32xf32, #tpu.memory_space<vmem>>, vector<8x32xf32>
    %c0_14 = arith.constant 0 : index
    %c0_15 = arith.constant 0 : index
    %23 = vector.load %arg15[%c0_14, %c0_15] : memref<8x4xf32, #tpu.memory_space<vmem>>, vector<8x4xf32>
    %c0_16 = arith.constant 0 : index
    %c0_17 = arith.constant 0 : index
    %24 = vector.load %arg16[%c0_16, %c0_17] : memref<8x4xf32, #tpu.memory_space<vmem>>, vector<8x4xf32>
    %c0_18 = arith.constant 0 : index
    %c0_19 = arith.constant 0 : index
    %25 = vector.load %arg17[%c0_18, %c0_19] : memref<8x32xf32, #tpu.memory_space<vmem>>, vector<8x32xf32>
    %26 = vector.extract_strided_slice %22 {offsets = [0, 0], sizes = [8, 8], strides = [1, 1]} : vector<8x32xf32> to vector<8x8xf32>
    %27 = arith.truncf %26 : vector<8x8xf32> to vector<8x8xbf16>
    %28 = vector.extract_strided_slice %7 {offsets = [0, 0], sizes = [8, 8], strides = [1, 1]} : vector<8x32xf32> to vector<8x8xf32>
    %29 = arith.truncf %28 : vector<8x8xf32> to vector<8x8xbf16>
    %30 = vector.extract_strided_slice %12 {offsets = [0, 0], sizes = [8, 8], strides = [1, 1]} : vector<8x32xf32> to vector<8x8xf32>
    %31 = arith.truncf %30 : vector<8x8xf32> to vector<8x8xbf16>
    %cst_20 = arith.constant dense<0.000000e+00> : vector<8x8xf32>
    %32 = tpu.matmul %27, %29, %cst_20 {dimension_numbers = #tpu.dot_dimension_numbers<[1], [1], [0], [0], [0, 0, 1, 0], [], []>} : vector<8x8xbf16>, vector<8x8xbf16>, vector<8x8xf32> -> vector<8x8xf32>
    %cst_21 = arith.constant -1.000000e+20 : f32
    %33 = vector.broadcast %cst_21 : f32 to vector<8x8xf32>
    %34 = arith.select %21, %33, %32 : vector<8x8xi1>, vector<8x8xf32>
    %35 = vector.extract_strided_slice %23 {offsets = [0, 0], sizes = [8, 1], strides = [1, 1]} : vector<8x4xf32> to vector<8x1xf32>
    %cst_22 = arith.constant dense<0xFF800000> : vector<8xf32>
    %36 = vector.multi_reduction <maximumf>, %34, %cst_22 [1] : vector<8x8xf32> to vector<8xf32>
    %37 = vector.shape_cast %36 : vector<8xf32> to vector<8x1xf32>
    %38 = arith.maximumf %35, %37 : vector<8x1xf32>
    %39 = arith.subf %35, %38 : vector<8x1xf32>
    %40 = math.exp %39 : vector<8x1xf32>
    %41 = vector.broadcast %38 : vector<8x1xf32> to vector<8x8xf32>
    %42 = arith.subf %34, %41 : vector<8x8xf32>
    %43 = math.exp %42 : vector<8x8xf32>
    %44 = arith.truncf %43 : vector<8x8xf32> to vector<8x8xbf16>
    %cst_23 = arith.constant dense<0.000000e+00> : vector<8x8xf32>
    %45 = tpu.matmul %44, %31, %cst_23 {dimension_numbers = #tpu.dot_dimension_numbers<[1], [0], [0], [1], [0, 0, 1, 1], [], []>} : vector<8x8xbf16>, vector<8x8xbf16>, vector<8x8xf32> -> vector<8x8xf32>
    %c0_24 = arith.constant 0 : index
    %c0_25 = arith.constant 0 : index
    %46 = vector.load %arg15[%c0_24, %c0_25] : memref<8x4xf32, #tpu.memory_space<vmem>>, vector<8x1xf32>
    tpu.vector_store %arg15[%c0_24, %c0_25], %38 {strides = array<i32>} : memref<8x4xf32, #tpu.memory_space<vmem>>, vector<8x1xf32>,
    %47 = vector.extract_strided_slice %24 {offsets = [0, 0], sizes = [8, 1], strides = [1, 1]} : vector<8x4xf32> to vector<8x1xf32>
    %48 = arith.mulf %40, %47 : vector<8x1xf32>
    %cst_26 = arith.constant dense<0.000000e+00> : vector<8xf32>
    %49 = vector.multi_reduction <add>, %43, %cst_26 [1] : vector<8x8xf32> to vector<8xf32>
    %50 = vector.shape_cast %49 : vector<8xf32> to vector<8x1xf32>
    %51 = arith.addf %48, %50 : vector<8x1xf32>
    %c0_27 = arith.constant 0 : index
    %c0_28 = arith.constant 0 : index
    %52 = vector.load %arg16[%c0_27, %c0_28] : memref<8x4xf32, #tpu.memory_space<vmem>>, vector<8x1xf32>
    tpu.vector_store %arg16[%c0_27, %c0_28], %51 {strides = array<i32>} : memref<8x4xf32, #tpu.memory_space<vmem>>, vector<8x1xf32>,
    %53 = vector.extract_strided_slice %25 {offsets = [0, 0], sizes = [8, 8], strides = [1, 1]} : vector<8x32xf32> to vector<8x8xf32>
    %54 = vector.broadcast %40 : vector<8x1xf32> to vector<8x8xf32>
    %55 = arith.mulf %54, %53 : vector<8x8xf32>
    %56 = arith.addf %55, %45 : vector<8x8xf32>
    %c0_29 = arith.constant 0 : index
    %c0_30 = arith.constant 0 : index
    %57 = vector.load %arg17[%c0_29, %c0_30] : memref<8x32xf32, #tpu.memory_space<vmem>>, vector<8x8xf32>
    tpu.vector_store %arg17[%c0_29, %c0_30], %56 {strides = array<i32>} : memref<8x32xf32, #tpu.memory_space<vmem>>, vector<8x8xf32>,
    %58 = vector.extract_strided_slice %22 {offsets = [0, 8], sizes = [8, 8], strides = [1, 1]} : vector<8x32xf32> to vector<8x8xf32>
    %59 = arith.truncf %58 : vector<8x8xf32> to vector<8x8xbf16>
    %60 = vector.extract_strided_slice %7 {offsets = [0, 8], sizes = [8, 8], strides = [1, 1]} : vector<8x32xf32> to vector<8x8xf32>
    %61 = arith.truncf %60 : vector<8x8xf32> to vector<8x8xbf16>
    %62 = vector.extract_strided_slice %12 {offsets = [0, 8], sizes = [8, 8], strides = [1, 1]} : vector<8x32xf32> to vector<8x8xf32>
    %63 = arith.truncf %62 : vector<8x8xf32> to vector<8x8xbf16>
    %cst_31 = arith.constant dense<0.000000e+00> : vector<8x8xf32>
    %64 = tpu.matmul %59, %61, %cst_31 {dimension_numbers = #tpu.dot_dimension_numbers<[1], [1], [0], [0], [0, 0, 1, 0], [], []>} : vector<8x8xbf16>, vector<8x8xbf16>, vector<8x8xf32> -> vector<8x8xf32>
    %cst_32 = arith.constant -1.000000e+20 : f32
    %65 = vector.broadcast %cst_32 : f32 to vector<8x8xf32>
    %66 = arith.select %21, %65, %64 : vector<8x8xi1>, vector<8x8xf32>
    %67 = vector.extract_strided_slice %23 {offsets = [0, 1], sizes = [8, 1], strides = [1, 1]} : vector<8x4xf32> to vector<8x1xf32>
    %cst_33 = arith.constant dense<0xFF800000> : vector<8xf32>
    %68 = vector.multi_reduction <maximumf>, %66, %cst_33 [1] : vector<8x8xf32> to vector<8xf32>
    %69 = vector.shape_cast %68 : vector<8xf32> to vector<8x1xf32>
    %70 = arith.maximumf %67, %69 : vector<8x1xf32>
    %71 = arith.subf %67, %70 : vector<8x1xf32>
    %72 = math.exp %71 : vector<8x1xf32>
    %73 = vector.broadcast %70 : vector<8x1xf32> to vector<8x8xf32>
    %74 = arith.subf %66, %73 : vector<8x8xf32>
    %75 = math.exp %74 : vector<8x8xf32>
    %76 = arith.truncf %75 : vector<8x8xf32> to vector<8x8xbf16>
    %cst_34 = arith.constant dense<0.000000e+00> : vector<8x8xf32>
    %77 = tpu.matmul %76, %63, %cst_34 {dimension_numbers = #tpu.dot_dimension_numbers<[1], [0], [0], [1], [0, 0, 1, 1], [], []>} : vector<8x8xbf16>, vector<8x8xbf16>, vector<8x8xf32> -> vector<8x8xf32>
    %c0_35 = arith.constant 0 : index
    %c1 = arith.constant 1 : index
    %78 = vector.load %arg15[%c0_35, %c1] : memref<8x4xf32, #tpu.memory_space<vmem>>, vector<8x1xf32>
    tpu.vector_store %arg15[%c0_35, %c1], %70 {strides = array<i32>} : memref<8x4xf32, #tpu.memory_space<vmem>>, vector<8x1xf32>,
    %79 = vector.extract_strided_slice %24 {offsets = [0, 1], sizes = [8, 1], strides = [1, 1]} : vector<8x4xf32> to vector<8x1xf32>
    %80 = arith.mulf %72, %79 : vector<8x1xf32>
    %cst_36 = arith.constant dense<0.000000e+00> : vector<8xf32>
    %81 = vector.multi_reduction <add>, %75, %cst_36 [1] : vector<8x8xf32> to vector<8xf32>
    %82 = vector.shape_cast %81 : vector<8xf32> to vector<8x1xf32>
    %83 = arith.addf %80, %82 : vector<8x1xf32>
    %c0_37 = arith.constant 0 : index
    %c1_38 = arith.constant 1 : index
    %84 = vector.load %arg16[%c0_37, %c1_38] : memref<8x4xf32, #tpu.memory_space<vmem>>, vector<8x1xf32>
    tpu.vector_store %arg16[%c0_37, %c1_38], %83 {strides = array<i32>} : memref<8x4xf32, #tpu.memory_space<vmem>>, vector<8x1xf32>,
    %85 = vector.extract_strided_slice %25 {offsets = [0, 8], sizes = [8, 8], strides = [1, 1]} : vector<8x32xf32> to vector<8x8xf32>
    %86 = vector.broadcast %72 : vector<8x1xf32> to vector<8x8xf32>
    %87 = arith.mulf %86, %85 : vector<8x8xf32>
    %88 = arith.addf %87, %77 : vector<8x8xf32>
    %c0_39 = arith.constant 0 : index
    %c8 = arith.constant 8 : index
    %89 = vector.load %arg17[%c0_39, %c8] : memref<8x32xf32, #tpu.memory_space<vmem>>, vector<8x8xf32>
    tpu.vector_store %arg17[%c0_39, %c8], %88 {strides = array<i32>} : memref<8x32xf32, #tpu.memory_space<vmem>>, vector<8x8xf32>,
    %90 = vector.extract_strided_slice %22 {offsets = [0, 16], sizes = [8, 8], strides = [1, 1]} : vector<8x32xf32> to vector<8x8xf32>
    %91 = arith.truncf %90 : vector<8x8xf32> to vector<8x8xbf16>
    %92 = vector.extract_strided_slice %7 {offsets = [0, 16], sizes = [8, 8], strides = [1, 1]} : vector<8x32xf32> to vector<8x8xf32>
    %93 = arith.truncf %92 : vector<8x8xf32> to vector<8x8xbf16>
    %94 = vector.extract_strided_slice %12 {offsets = [0, 16], sizes = [8, 8], strides = [1, 1]} : vector<8x32xf32> to vector<8x8xf32>
    %95 = arith.truncf %94 : vector<8x8xf32> to vector<8x8xbf16>
    %cst_40 = arith.constant dense<0.000000e+00> : vector<8x8xf32>
    %96 = tpu.matmul %91, %93, %cst_40 {dimension_numbers = #tpu.dot_dimension_numbers<[1], [1], [0], [0], [0, 0, 1, 0], [], []>} : vector<8x8xbf16>, vector<8x8xbf16>, vector<8x8xf32> -> vector<8x8xf32>
    %cst_41 = arith.constant -1.000000e+20 : f32
    %97 = vector.broadcast %cst_41 : f32 to vector<8x8xf32>
    %98 = arith.select %21, %97, %96 : vector<8x8xi1>, vector<8x8xf32>
    %99 = vector.extract_strided_slice %23 {offsets = [0, 2], sizes = [8, 1], strides = [1, 1]} : vector<8x4xf32> to vector<8x1xf32>
    %cst_42 = arith.constant dense<0xFF800000> : vector<8xf32>
    %100 = vector.multi_reduction <maximumf>, %98, %cst_42 [1] : vector<8x8xf32> to vector<8xf32>
    %101 = vector.shape_cast %100 : vector<8xf32> to vector<8x1xf32>
    %102 = arith.maximumf %99, %101 : vector<8x1xf32>
    %103 = arith.subf %99, %102 : vector<8x1xf32>
    %104 = math.exp %103 : vector<8x1xf32>
    %105 = vector.broadcast %102 : vector<8x1xf32> to vector<8x8xf32>
    %106 = arith.subf %98, %105 : vector<8x8xf32>
    %107 = math.exp %106 : vector<8x8xf32>
    %108 = arith.truncf %107 : vector<8x8xf32> to vector<8x8xbf16>
    %cst_43 = arith.constant dense<0.000000e+00> : vector<8x8xf32>
    %109 = tpu.matmul %108, %95, %cst_43 {dimension_numbers = #tpu.dot_dimension_numbers<[1], [0], [0], [1], [0, 0, 1, 1], [], []>} : vector<8x8xbf16>, vector<8x8xbf16>, vector<8x8xf32> -> vector<8x8xf32>
    %c0_44 = arith.constant 0 : index
    %c2 = arith.constant 2 : index
    %110 = vector.load %arg15[%c0_44, %c2] : memref<8x4xf32, #tpu.memory_space<vmem>>, vector<8x1xf32>
    tpu.vector_store %arg15[%c0_44, %c2], %102 {strides = array<i32>} : memref<8x4xf32, #tpu.memory_space<vmem>>, vector<8x1xf32>,
    %111 = vector.extract_strided_slice %24 {offsets = [0, 2], sizes = [8, 1], strides = [1, 1]} : vector<8x4xf32> to vector<8x1xf32>
    %112 = arith.mulf %104, %111 : vector<8x1xf32>
    %cst_45 = arith.constant dense<0.000000e+00> : vector<8xf32>
    %113 = vector.multi_reduction <add>, %107, %cst_45 [1] : vector<8x8xf32> to vector<8xf32>
    %114 = vector.shape_cast %113 : vector<8xf32> to vector<8x1xf32>
    %115 = arith.addf %112, %114 : vector<8x1xf32>
    %c0_46 = arith.constant 0 : index
    %c2_47 = arith.constant 2 : index
    %116 = vector.load %arg16[%c0_46, %c2_47] : memref<8x4xf32, #tpu.memory_space<vmem>>, vector<8x1xf32>
    tpu.vector_store %arg16[%c0_46, %c2_47], %115 {strides = array<i32>} : memref<8x4xf32, #tpu.memory_space<vmem>>, vector<8x1xf32>,
    %117 = vector.extract_strided_slice %25 {offsets = [0, 16], sizes = [8, 8], strides = [1, 1]} : vector<8x32xf32> to vector<8x8xf32>
    %118 = vector.broadcast %104 : vector<8x1xf32> to vector<8x8xf32>
    %119 = arith.mulf %118, %117 : vector<8x8xf32>
    %120 = arith.addf %119, %109 : vector<8x8xf32>
    %c0_48 = arith.constant 0 : index
    %c16 = arith.constant 16 : index
    %121 = vector.load %arg17[%c0_48, %c16] : memref<8x32xf32, #tpu.memory_space<vmem>>, vector<8x8xf32>
    tpu.vector_store %arg17[%c0_48, %c16], %120 {strides = array<i32>} : memref<8x32xf32, #tpu.memory_space<vmem>>, vector<8x8xf32>,
    %122 = vector.extract_strided_slice %22 {offsets = [0, 24], sizes = [8, 8], strides = [1, 1]} : vector<8x32xf32> to vector<8x8xf32>
    %123 = arith.truncf %122 : vector<8x8xf32> to vector<8x8xbf16>
    %124 = vector.extract_strided_slice %7 {offsets = [0, 24], sizes = [8, 8], strides = [1, 1]} : vector<8x32xf32> to vector<8x8xf32>
    %125 = arith.truncf %124 : vector<8x8xf32> to vector<8x8xbf16>
    %126 = vector.extract_strided_slice %12 {offsets = [0, 24], sizes = [8, 8], strides = [1, 1]} : vector<8x32xf32> to vector<8x8xf32>
    %127 = arith.truncf %126 : vector<8x8xf32> to vector<8x8xbf16>
    %cst_49 = arith.constant dense<0.000000e+00> : vector<8x8xf32>
    %128 = tpu.matmul %123, %125, %cst_49 {dimension_numbers = #tpu.dot_dimension_numbers<[1], [1], [0], [0], [0, 0, 1, 0], [], []>} : vector<8x8xbf16>, vector<8x8xbf16>, vector<8x8xf32> -> vector<8x8xf32>
    %cst_50 = arith.constant -1.000000e+20 : f32
    %129 = vector.broadcast %cst_50 : f32 to vector<8x8xf32>
    %130 = arith.select %21, %129, %128 : vector<8x8xi1>, vector<8x8xf32>
    %131 = vector.extract_strided_slice %23 {offsets = [0, 3], sizes = [8, 1], strides = [1, 1]} : vector<8x4xf32> to vector<8x1xf32>
    %cst_51 = arith.constant dense<0xFF800000> : vector<8xf32>
    %132 = vector.multi_reduction <maximumf>, %130, %cst_51 [1] : vector<8x8xf32> to vector<8xf32>
    %133 = vector.shape_cast %132 : vector<8xf32> to vector<8x1xf32>
    %134 = arith.maximumf %131, %133 : vector<8x1xf32>
    %135 = arith.subf %131, %134 : vector<8x1xf32>
    %136 = math.exp %135 : vector<8x1xf32>
    %137 = vector.broadcast %134 : vector<8x1xf32> to vector<8x8xf32>
    %138 = arith.subf %130, %137 : vector<8x8xf32>
    %139 = math.exp %138 : vector<8x8xf32>
    %140 = arith.truncf %139 : vector<8x8xf32> to vector<8x8xbf16>
    %cst_52 = arith.constant dense<0.000000e+00> : vector<8x8xf32>
    %141 = tpu.matmul %140, %127, %cst_52 {dimension_numbers = #tpu.dot_dimension_numbers<[1], [0], [0], [1], [0, 0, 1, 1], [], []>} : vector<8x8xbf16>, vector<8x8xbf16>, vector<8x8xf32> -> vector<8x8xf32>
    %c0_53 = arith.constant 0 : index
    %c3 = arith.constant 3 : index
    %142 = vector.load %arg15[%c0_53, %c3] : memref<8x4xf32, #tpu.memory_space<vmem>>, vector<8x1xf32>
    tpu.vector_store %arg15[%c0_53, %c3], %134 {strides = array<i32>} : memref<8x4xf32, #tpu.memory_space<vmem>>, vector<8x1xf32>,
    %143 = vector.extract_strided_slice %24 {offsets = [0, 3], sizes = [8, 1], strides = [1, 1]} : vector<8x4xf32> to vector<8x1xf32>
    %144 = arith.mulf %136, %143 : vector<8x1xf32>
    %cst_54 = arith.constant dense<0.000000e+00> : vector<8xf32>
    %145 = vector.multi_reduction <add>, %139, %cst_54 [1] : vector<8x8xf32> to vector<8xf32>
    %146 = vector.shape_cast %145 : vector<8xf32> to vector<8x1xf32>
    %147 = arith.addf %144, %146 : vector<8x1xf32>
    %c0_55 = arith.constant 0 : index
    %c3_56 = arith.constant 3 : index
    %148 = vector.load %arg16[%c0_55, %c3_56] : memref<8x4xf32, #tpu.memory_space<vmem>>, vector<8x1xf32>
    tpu.vector_store %arg16[%c0_55, %c3_56], %147 {strides = array<i32>} : memref<8x4xf32, #tpu.memory_space<vmem>>, vector<8x1xf32>,
    %149 = vector.extract_strided_slice %25 {offsets = [0, 24], sizes = [8, 8], strides = [1, 1]} : vector<8x32xf32> to vector<8x8xf32>
    %150 = vector.broadcast %136 : vector<8x1xf32> to vector<8x8xf32>
    %151 = arith.mulf %150, %149 : vector<8x8xf32>
    %152 = arith.addf %151, %141 : vector<8x8xf32>
    %c0_57 = arith.constant 0 : index
    %c24 = arith.constant 24 : index
    %153 = vector.load %arg17[%c0_57, %c24] : memref<8x32xf32, #tpu.memory_space<vmem>>, vector<8x8xf32>
    tpu.vector_store %arg17[%c0_57, %c24], %152 {strides = array<i32>} : memref<8x32xf32, #tpu.memory_space<vmem>>, vector<8x8xf32>,
    %c0_i32_58 = arith.constant 0 : i32
    %154 = arith.cmpi eq, %arg2, %c0_i32_58 : i32
    %155 = arith.extui %154 : i1 to i32
    %c0_i32_59 = arith.constant 0 : i32
    %156 = arith.cmpi ne, %155, %c0_i32_59 : i32
    scf.if %156 {
      %c0_60 = arith.constant 0 : index
      %c0_61 = arith.constant 0 : index
      %157 = vector.load %arg16[%c0_60, %c0_61] : memref<8x4xf32, #tpu.memory_space<vmem>>, vector<8x4xf32>
      %158 = tpu.reciprocal %157 {approx = true} : vector<8x4xf32> -> vector<8x4xf32>
      %c0_62 = arith.constant 0 : index
      %c0_63 = arith.constant 0 : index
      %159 = vector.load %arg17[%c0_62, %c0_63] : memref<8x32xf32, #tpu.memory_space<vmem>>, vector<8x8xf32>
      %160 = vector.extract_strided_slice %158 {offsets = [0, 0], sizes = [8, 1], strides = [1, 1]} : vector<8x4xf32> to vector<8x1xf32>
      %161 = vector.broadcast %160 : vector<8x1xf32> to vector<8x8xf32>
      %162 = arith.mulf %159, %161 : vector<8x8xf32>
      %c0_64 = arith.constant 0 : index
      %c0_65 = arith.constant 0 : index
      %163 = vector.load %arg17[%c0_64, %c0_65] : memref<8x32xf32, #tpu.memory_space<vmem>>, vector<8x8xf32>
      tpu.vector_store %arg17[%c0_64, %c0_65], %162 {strides = array<i32>} : memref<8x32xf32, #tpu.memory_space<vmem>>, vector<8x8xf32>,
      %c0_66 = arith.constant 0 : index
      %c8_67 = arith.constant 8 : index
      %164 = vector.load %arg17[%c0_66, %c8_67] : memref<8x32xf32, #tpu.memory_space<vmem>>, vector<8x8xf32>
      %165 = vector.extract_strided_slice %158 {offsets = [0, 1], sizes = [8, 1], strides = [1, 1]} : vector<8x4xf32> to vector<8x1xf32>
      %166 = vector.broadcast %165 : vector<8x1xf32> to vector<8x8xf32>
      %167 = arith.mulf %164, %166 : vector<8x8xf32>
      %c0_68 = arith.constant 0 : index
      %c8_69 = arith.constant 8 : index
      %168 = vector.load %arg17[%c0_68, %c8_69] : memref<8x32xf32, #tpu.memory_space<vmem>>, vector<8x8xf32>
      tpu.vector_store %arg17[%c0_68, %c8_69], %167 {strides = array<i32>} : memref<8x32xf32, #tpu.memory_space<vmem>>, vector<8x8xf32>,
      %c0_70 = arith.constant 0 : index
      %c16_71 = arith.constant 16 : index
      %169 = vector.load %arg17[%c0_70, %c16_71] : memref<8x32xf32, #tpu.memory_space<vmem>>, vector<8x8xf32>
      %170 = vector.extract_strided_slice %158 {offsets = [0, 2], sizes = [8, 1], strides = [1, 1]} : vector<8x4xf32> to vector<8x1xf32>
      %171 = vector.broadcast %170 : vector<8x1xf32> to vector<8x8xf32>
      %172 = arith.mulf %169, %171 : vector<8x8xf32>
      %c0_72 = arith.constant 0 : index
      %c16_73 = arith.constant 16 : index
      %173 = vector.load %arg17[%c0_72, %c16_73] : memref<8x32xf32, #tpu.memory_space<vmem>>, vector<8x8xf32>
      tpu.vector_store %arg17[%c0_72, %c16_73], %172 {strides = array<i32>} : memref<8x32xf32, #tpu.memory_space<vmem>>, vector<8x8xf32>,
      %c0_74 = arith.constant 0 : index
      %c24_75 = arith.constant 24 : index
      %174 = vector.load %arg17[%c0_74, %c24_75] : memref<8x32xf32, #tpu.memory_space<vmem>>, vector<8x8xf32>
      %175 = vector.extract_strided_slice %158 {offsets = [0, 3], sizes = [8, 1], strides = [1, 1]} : vector<8x4xf32> to vector<8x1xf32>
      %176 = vector.broadcast %175 : vector<8x1xf32> to vector<8x8xf32>
      %177 = arith.mulf %174, %176 : vector<8x8xf32>
      %c0_76 = arith.constant 0 : index
      %c24_77 = arith.constant 24 : index
      %178 = vector.load %arg17[%c0_76, %c24_77] : memref<8x32xf32, #tpu.memory_space<vmem>>, vector<8x8xf32>
      tpu.vector_store %arg17[%c0_76, %c24_77], %177 {strides = array<i32>} : memref<8x32xf32, #tpu.memory_space<vmem>>, vector<8x8xf32>,
      %c0_78 = arith.constant 0 : index
      %c0_79 = arith.constant 0 : index
      %179 = vector.load %arg17[%c0_78, %c0_79] : memref<8x32xf32, #tpu.memory_space<vmem>>, vector<8x32xf32>
      %180 = arith.truncf %179 : vector<8x32xf32> to vector<8x32xbf16>
      %c0_80 = arith.constant 0 : index
      %c0_81 = arith.constant 0 : index
      %181 = vector.load %arg9[%c0_80, %c0_81] : memref<32x32xbf16, #tpu.memory_space<vmem>>, vector<32x32xbf16>
      %cst_82 = arith.constant dense<0.000000e+00> : vector<8x32xf32>
      %182 = tpu.matmul %180, %181, %cst_82 {dimension_numbers = #tpu.dot_dimension_numbers<[1], [0], [0], [1], [0, 0, 1, 1], [], []>} : vector<8x32xbf16>, vector<32x32xbf16>, vector<8x32xf32> -> vector<8x32xf32>
      %c0_83 = arith.constant 0 : index
      %c0_84 = arith.constant 0 : index
      %183 = vector.load %arg10[%c0_83, %c0_84] : memref<1x32xf32, #tpu.memory_space<vmem>>, vector<1x32xf32>
      %184 = vector.broadcast %183 : vector<1x32xf32> to vector<8x32xf32>
      %185 = arith.addf %182, %184 : vector<8x32xf32>
      %c0_85 = arith.constant 0 : index
      %c0_86 = arith.constant 0 : index
      %c0_87 = arith.constant 0 : index
      %186 = vector.load %arg3[%c0_85, %c0_86, %c0_87] : memref<1x8x32xf32, #tpu.memory_space<vmem>>, vector<1x8x32xf32>
      %187 = vector.shape_cast %186 : vector<1x8x32xf32> to vector<8x32xf32>
      %188 = arith.addf %185, %187 : vector<8x32xf32>
      %cst_88 = arith.constant dense<0.000000e+00> : vector<8xf32>
      %189 = vector.multi_reduction <add>, %188, %cst_88 [1] : vector<8x32xf32> to vector<8xf32>
      %190 = vector.shape_cast %189 : vector<8xf32> to vector<8x1xf32>
      %cst_89 = arith.constant 3.200000e+01 : f32
      %191 = vector.broadcast %cst_89 : f32 to vector<8x1xf32>
      %192 = arith.divf %190, %191 : vector<8x1xf32>
      %193 = vector.broadcast %192 : vector<8x1xf32> to vector<8x32xf32>
      %194 = arith.subf %188, %193 : vector<8x32xf32>
      %195 = vector.broadcast %192 : vector<8x1xf32> to vector<8x32xf32>
      %196 = arith.subf %188, %195 : vector<8x32xf32>
      %197 = arith.mulf %194, %196 : vector<8x32xf32>
      %cst_90 = arith.constant dense<0.000000e+00> : vector<8xf32>
      %198 = vector.multi_reduction <add>, %197, %cst_90 [1] : vector<8x32xf32> to vector<8xf32>
      %199 = vector.shape_cast %198 : vector<8xf32> to vector<8x1xf32>
      %cst_91 = arith.constant 3.200000e+01 : f32
      %200 = vector.broadcast %cst_91 : f32 to vector<8x1xf32>
      %201 = arith.divf %199, %200 : vector<8x1xf32>
      %202 = vector.broadcast %192 : vector<8x1xf32> to vector<8x32xf32>
      %203 = arith.subf %188, %202 : vector<8x32xf32>
      %cst_92 = arith.constant 9.99999974E-6 : f32
      %204 = vector.broadcast %cst_92 : f32 to vector<8x1xf32>
      %205 = arith.addf %201, %204 : vector<8x1xf32>
      %206 = math.rsqrt %205 : vector<8x1xf32>
      %207 = vector.broadcast %206 : vector<8x1xf32> to vector<8x32xf32>
      %208 = arith.mulf %203, %207 : vector<8x32xf32>
      %c0_93 = arith.constant 0 : index
      %c0_94 = arith.constant 0 : index
      %209 = vector.load %arg11[%c0_93, %c0_94] : memref<1x32xf32, #tpu.memory_space<vmem>>, vector<1x32xf32>
      %210 = vector.broadcast %209 : vector<1x32xf32> to vector<8x32xf32>
      %211 = arith.mulf %208, %210 : vector<8x32xf32>
      %c0_95 = arith.constant 0 : index
      %c0_96 = arith.constant 0 : index
      %212 = vector.load %arg12[%c0_95, %c0_96] : memref<1x32xf32, #tpu.memory_space<vmem>>, vector<1x32xf32>
      %213 = vector.broadcast %212 : vector<1x32xf32> to vector<8x32xf32>
      %214 = arith.addf %211, %213 : vector<8x32xf32>
      %215 = arith.truncf %214 : vector<8x32xf32> to vector<8x32xbf16>
      %c0_97 = arith.constant 0 : index
      %c0_98 = arith.constant 0 : index
      %c0_99 = arith.constant 0 : index
      %216 = vector.load %arg13[%c0_97, %c0_98, %c0_99] : memref<1x8x32xbf16, #tpu.memory_space<vmem>>, vector<1x8x32xbf16>
      %217 = vector.shape_cast %216 : vector<1x8x32xbf16> to vector<8x32xbf16>
      %218 = vector.shape_cast %215 : vector<8x32xbf16> to vector<1x8x32xbf16>
      tpu.vector_store %arg13[%c0_97, %c0_98, %c0_99], %218 {strides = array<i32>} : memref<1x8x32xbf16, #tpu.memory_space<vmem>>, vector<1x8x32xbf16>,
    } else {
    }
    return
  }
  func.func @transform_0(%arg0: i32, %arg1: i32, %arg2: i32) -> (i32, i32, i32) {
    %c0_i32 = arith.constant 0 : i32
    %c0_i32_0 = arith.constant 0 : i32
    return %arg0, %arg1, %c0_i32 : i32, i32, i32
  }
  func.func @transform_1(%arg0: i32, %arg1: i32, %arg2: i32) -> (i32, i32, i32) {
    %c0_i32 = arith.constant 0 : i32
    %c0_i32_0 = arith.constant 0 : i32
    return %arg0, %arg2, %c0_i32 : i32, i32, i32
  }
  func.func @transform_2(%arg0: i32, %arg1: i32, %arg2: i32) -> (i32, i32, i32) {
    %c0_i32 = arith.constant 0 : i32
    %c0_i32_0 = arith.constant 0 : i32
    return %arg0, %arg2, %c0_i32 : i32, i32, i32
  }
  func.func @transform_3(%arg0: i32, %arg1: i32, %arg2: i32) -> (i32, i32) {
    %c0_i32 = arith.constant 0 : i32
    %c0_i32_0 = arith.constant 0 : i32
    %c0_i32_1 = arith.constant 0 : i32
    return %c0_i32, %c0_i32_0 : i32, i32
  }
  func.func @transform_4(%arg0: i32, %arg1: i32, %arg2: i32) -> (i32, i32) {
    %c0_i32 = arith.constant 0 : i32
    %c0_i32_0 = arith.constant 0 : i32
    %c0_i32_1 = arith.constant 0 : i32
    return %c0_i32, %c0_i32_0 : i32, i32
  }
  func.func @transform_5(%arg0: i32, %arg1: i32, %arg2: i32) -> (i32, i32) {
    %c0_i32 = arith.constant 0 : i32
    %c0_i32_0 = arith.constant 0 : i32
    %c0_i32_1 = arith.constant 0 : i32
    return %c0_i32, %c0_i32_0 : i32, i32
  }
  func.func @transform_6(%arg0: i32, %arg1: i32, %arg2: i32) -> (i32, i32) {
    %c0_i32 = arith.constant 0 : i32
    %c0_i32_0 = arith.constant 0 : i32
    %c0_i32_1 = arith.constant 0 : i32
    return %c0_i32, %c0_i32_0 : i32, i32
  }
  func.func @transform_7(%arg0: i32, %arg1: i32, %arg2: i32) -> (i32, i32) {
    %c0_i32 = arith.constant 0 : i32
    %c0_i32_0 = arith.constant 0 : i32
    %c0_i32_1 = arith.constant 0 : i32
    return %c0_i32, %c0_i32_0 : i32, i32
  }
  func.func @transform_8(%arg0: i32, %arg1: i32, %arg2: i32) -> (i32, i32) {
    %c0_i32 = arith.constant 0 : i32
    %c0_i32_0 = arith.constant 0 : i32
    %c0_i32_1 = arith.constant 0 : i32
    return %c0_i32, %c0_i32_0 : i32, i32
  }
  func.func @transform_9(%arg0: i32, %arg1: i32, %arg2: i32) -> (i32, i32) {
    %c0_i32 = arith.constant 0 : i32
    %c0_i32_0 = arith.constant 0 : i32
    %c0_i32_1 = arith.constant 0 : i32
    return %c0_i32, %c0_i32_0 : i32, i32
  }
  func.func @transform_10(%arg0: i32, %arg1: i32, %arg2: i32) -> (i32, i32, i32) {
    %c0_i32 = arith.constant 0 : i32
    %c0_i32_0 = arith.constant 0 : i32
    return %arg0, %arg1, %c0_i32 : i32, i32, i32
  }
}

</mosaic_0001>

<bundles_post_ra>
// kernel: decoder_block_forward.5
= control target key start
LH: loop header
LB: loop body
LE: loop exit
PB: predicated region body
PF: predicated region fallthrough
CT: control target
= control target key end

     0   :  { %12 = vsyncpa [#allocation3], 0  ;;  %s858_s0 = inlined_call_operand.hbm [shape: bf16[16,32], index: 0, kind: input, shape index: {}]   ;;  %s859_s1 = inlined_call_operand.hbm [shape: bf16[32,128], index: 1, kind: input, shape index: {}]   ;;  %s860_s2 = inlined_call_operand.hbm [shape: f32[1,128], index: 2, kind: input, shape index: {}]   ;;  %s861_s3 = inlined_call_operand.hbm [shape: bf16[128,32], index: 3, kind: input, shape index: {}]   ;;  %s862_s4 = inlined_call_operand.hbm [shape: f32[1,32], index: 4, kind: input, shape index: {}]   ;;  %s863_s5 = inlined_call_operand.hbm [shape: f32[1,32], index: 5, kind: input, shape index: {}]   ;;  %s864_s6 = inlined_call_operand.hbm [shape: f32[1,32], index: 6, kind: input, shape index: {}]   ;;  %s865_s7 = inlined_call_operand.hbm [shape: f32[16,32], index: 7, kind: output, shape index: {}]  }
   0x1   :  { %13 = vsyncpa [#allocation6], 0 }
   0x2   :  { %14 = vsyncpa [#allocation9], 0 }
   0x3   :  { %15 = vsyncpa [#allocation12], 0 }
   0x4   :  { %16 = vsyncpa [#allocation4], 0  ;;  %s676_s24 = smov [#allocation5]   ;;  %s677_s26 = smov [#allocation8]  }
   0x5   :  { %s34_s25 = sshll.u32 %s676_s24, 4  ;;  %s56_s27 = sshll.u32 %s677_s26, 4  ;;  %s35_s25 = int_to_ptr.vmem [resolvable:$true] %s34_s25  ;;  %s730_s27 = int_to_ptr.vmem [resolvable:$true] %s56_s27 }
   0x6   :  { %s490_s30 = scalar_lea.hbm %s859_s1, 256 }
   0x7   :  { %p491_p0 = scmp.ne.s32.totalorder %s859_s1, %s490_s30  ;;  %p494_p1 = scmp.lt.u32.totalorder %s490_s30, %s859_s1 }
   0x9   :  { %p496_p2 = pnand %p494_p1, %p491_p0 }
   0xb   :  { %499 = shalt.err (!%p496_p2)
}
   0xc   :  { %s500_s12 = scalar_lea.vmem %s35_s25, 256  ;;  %p505_p4 = scmp.lt.s32.totalorder %s35_s25, %s35_s25 }
   0xd   :  { %p501_p3 = scmp.ne.s32.totalorder %s35_s25, %s500_s12  ;;  %p506_p5 = scmp.lt.s32.totalorder %s500_s12, %s500_s12 }
   0xf   :  { %p507_p6 = por %p506_p5, %p505_p4 }
  0x11   :  { %p508_p7 = pnand %p507_p6, %p501_p3 }
  0x13   :  { %511 = shalt.err (!%p508_p7)
}
  0x14   :  { %s678_s13 = smov 64   ;;  %s679_s14 = smov 4  }
  0x15   :  { %40 = dma.hbm_to_vmem [thread:$0]  %s859_s1, 256, %s35_s25, [#allocation6], %s678_s13, %s678_s13, %s679_s14  }
  0x16   :  { %s512_s19 = scalar_lea.hbm %s861_s3, 1024 }
  0x17   :  { %p513_p8 = scmp.ne.s32.totalorder %s861_s3, %s512_s19  ;;  %p516_p9 = scmp.lt.u32.totalorder %s512_s19, %s861_s3 }
  0x19   :  { %p518_p10 = pnand %p516_p9, %p513_p8 }
  0x1b   :  { %521 = shalt.err (!%p518_p10)
}
  0x1c   :  { %s522_s24 = scalar_lea.vmem %s730_s27, 1024  ;;  %p527_p12 = scmp.lt.s32.totalorder %s730_s27, %s730_s27 }
  0x1d   :  { %p523_p11 = scmp.ne.s32.totalorder %s730_s27, %s522_s24  ;;  %p528_p13 = scmp.lt.s32.totalorder %s522_s24, %s522_s24 }
  0x1f   :  { %p529_p0 = por %p528_p13, %p527_p12 }
  0x21   :  { %p530_p1 = pnand %p529_p0, %p523_p11 }
  0x23   :  { %533 = shalt.err (!%p530_p1)
}
  0x24   :  { %62 = dma.hbm_to_vmem [thread:$0]  %s861_s3, 1024, %s730_s27, [#allocation9], %s678_s13, %s678_s13, %s679_s14  }
  0x25   :  { %s680_s26 = smov [#allocation11]   ;;  %s681_s29 = smov [#allocation2]  }
  0x26   :  { %s79_s28 = sshll.u32 %s680_s26, 4  ;;  %s22_s30 = sshll.u32 %s681_s29, 4  ;;  %s80_s28 = int_to_ptr.vmem [resolvable:$true] %s79_s28  ;;  %s767_s30 = int_to_ptr.vmem [resolvable:$true] %s22_s30 }
  0x27   :  { %s534_s10 = scalar_lea.hbm %s863_s5, 16 }
  0x28   :  { %p535_p2 = scmp.ne.s32.totalorder %s863_s5, %s534_s10  ;;  %p538_p3 = scmp.lt.u32.totalorder %s534_s10, %s863_s5 }
  0x2a   :  { %p540_p4 = pnand %p538_p3, %p535_p2 }
  0x2c   :  { %543 = shalt.err (!%p540_p4)
}
  0x2d   :  { %s544_s3 = scalar_lea.vmem %s80_s28, 16  ;;  %s548_s27 = scalar_lea.vmem %s80_s28, 32 }
  0x2e   :  { %p545_p5 = scmp.ne.s32.totalorder %s80_s28, %s544_s3  ;;  %p549_p6 = scmp.lt.s32.totalorder %s80_s28, %s80_s28 }
  0x2f   :  { %p550_p7 = scmp.lt.s32.totalorder %s548_s27, %s544_s3 }
  0x31   :  { %p551_p8 = por %p550_p7, %p549_p6 }
  0x33   :  { %p552_p9 = pnand %p551_p8, %p545_p5 }
  0x35   :  { %555 = shalt.err (!%p552_p9)
}
  0x36   :  { %82 = dma.hbm_to_vmem [thread:$0]  %s863_s5, 16, %s80_s28, [#allocation12]  }
  0x37   :  { %s556_s21 = scalar_lea.hbm %s858_s0, 128 }
  0x38   :  { %p557_p10 = scmp.ne.s32.totalorder %s858_s0, %s556_s21  ;;  %p560_p11 = scmp.lt.u32.totalorder %s556_s21, %s858_s0 }
  0x3a   :  { %p562_p12 = pnand %p560_p11, %p557_p10 }
  0x3c   :  { %565 = shalt.err (!%p562_p12)
}
  0x3d   :  { %s566_s25 = scalar_lea.vmem %s767_s30, 128  ;;  %p571_p0 = scmp.lt.s32.totalorder %s767_s30, %s767_s30 }
  0x3e   :  { %p567_p13 = scmp.ne.s32.totalorder %s767_s30, %s566_s25  ;;  %p572_p1 = scmp.lt.s32.totalorder %s566_s25, %s566_s25 }
  0x40   :  { %p573_p2 = por %p572_p1, %p571_p0 }
  0x42   :  { %p574_p3 = pnand %p573_p2, %p567_p13 }
  0x44   :  { %577 = shalt.err (!%p574_p3)
}
  0x45   :  { %28 = dma.hbm_to_vmem [thread:$0]  %s858_s0, 128, %s767_s30, [#allocation3], %s678_s13, %s678_s13, %s679_s14  }
  0x46   :  { %s682_s28 = smov [#allocation7]   ;;  %s683_s8 = smov [#allocation10]  }
  0x47   :  { %s47_s29 = sshll.u32 %s682_s28, 4  ;;  %s69_s9 = sshll.u32 %s683_s8, 4  ;;  %s48_s29 = int_to_ptr.vmem [resolvable:$true] %s47_s29  ;;  %s70_s9 = int_to_ptr.vmem [resolvable:$true] %s69_s9 }
  0x48   :  { %s578_s12 = scalar_lea.hbm %s860_s2, 16 }
  0x49   :  { %p579_p4 = scmp.ne.s32.totalorder %s860_s2, %s578_s12  ;;  %p582_p5 = scmp.lt.u32.totalorder %s578_s12, %s860_s2 }
  0x4b   :  { %p584_p6 = pnand %p582_p5, %p579_p4 }
  0x4d   :  { %587 = shalt.err (!%p584_p6)
}
  0x4e   :  { %s588_s0 = scalar_lea.vmem %s48_s29, 16  ;;  %s592_s13 = scalar_lea.vmem %s48_s29, 32 }
  0x4f   :  { %p589_p7 = scmp.ne.s32.totalorder %s48_s29, %s588_s0  ;;  %p593_p8 = scmp.lt.s32.totalorder %s48_s29, %s48_s29 }
  0x50   :  { %p594_p9 = scmp.lt.s32.totalorder %s592_s13, %s588_s0 }
  0x52   :  { %p595_p10 = por %p594_p9, %p593_p8 }
  0x54   :  { %p596_p11 = pnand %p595_p10, %p589_p7 }
  0x56   :  { %599 = shalt.err (!%p596_p11)
}
  0x57   :  { %50 = dma.hbm_to_vmem [thread:$0]  %s860_s2, 16, %s48_s29, [#allocation6]  }
  0x58   :  { %s600_s19 = scalar_lea.hbm %s862_s4, 16 }
  0x59   :  { %p601_p12 = scmp.ne.s32.totalorder %s862_s4, %s600_s19  ;;  %p604_p13 = scmp.lt.u32.totalorder %s600_s19, %s862_s4 }
  0x5b   :  { %p606_p0 = pnand %p604_p13, %p601_p12 }
  0x5d   :  { %609 = shalt.err (!%p606_p0)
}
  0x5e   :  { %s610_s24 = scalar_lea.vmem %s70_s9, 16  ;;  %s614_s1 = scalar_lea.vmem %s70_s9, 32 }
  0x5f   :  { %p611_p1 = scmp.ne.s32.totalorder %s70_s9, %s610_s24  ;;  %p615_p2 = scmp.lt.s32.totalorder %s70_s9, %s70_s9 }
  0x60   :  { %p616_p3 = scmp.lt.s32.totalorder %s614_s1, %s610_s24 }
  0x62   :  { %p617_p4 = por %p616_p3, %p615_p2 }
  0x64   :  { %p618_p5 = pnand %p617_p4, %p611_p1 }
  0x66   :  { %621 = shalt.err (!%p618_p5)
}
  0x67   :  { %72 = dma.hbm_to_vmem [thread:$0]  %s862_s4, 16, %s70_s9, [#allocation9]  }
  0x68   :  { %s684_s5 = smov [#allocation13]   ;;  %s622_s8 = scalar_lea.hbm %s864_s6, 16 }
  0x69   :  { %s89_s26 = sshll.u32 %s684_s5, 4  ;;  %p623_p6 = scmp.ne.s32.totalorder %s864_s6, %s622_s8  ;;  %s90_s26 = int_to_ptr.vmem [resolvable:$true] %s89_s26 }
  0x6a   :  { %p626_p7 = scmp.lt.u32.totalorder %s622_s8, %s864_s6 }
  0x6c   :  { %p628_p8 = pnand %p626_p7, %p623_p6 }
  0x6e   :  { %631 = shalt.err (!%p628_p8)
}
  0x6f   :  { %s632_s16 = scalar_lea.vmem %s90_s26, 16  ;;  %s636_s4 = scalar_lea.vmem %s90_s26, 32 }
  0x70   :  { %p633_p9 = scmp.ne.s32.totalorder %s90_s26, %s632_s16  ;;  %p637_p10 = scmp.lt.s32.totalorder %s90_s26, %s90_s26 }
  0x71   :  { %p638_p11 = scmp.lt.s32.totalorder %s636_s4, %s632_s16 }
  0x73   :  { %p639_p12 = por %p638_p11, %p637_p10 }
  0x75   :  { %p640_p13 = pnand %p639_p12, %p633_p9 }
  0x77   :  { %643 = shalt.err (!%p640_p13)
}
  0x78   :  { %92 = dma.hbm_to_vmem [thread:$0]  %s864_s6, 16, %s90_s26, [#allocation12]  }
  0x79   :  { %666 = dma.done.wait [#allocation3], 128  }
  0x7a   :  { %667 = vsyncadd [#allocation3], 4294967168 }
  0x7b   :  { %668 = dma.done.wait [#allocation6], 272  }
  0x7c   :  { %669 = vsyncadd [#allocation6], 4294967024 }
  0x7d   :  { %670 = dma.done.wait [#allocation9], 1040  }
  0x7e   :  { %671 = vsyncadd [#allocation9], 4294966256 }
  0x7f   :  { %672 = dma.done.wait [#allocation12], 32  }
  0x80   :  { %673 = vsyncadd [#allocation12], 4294967264  ;;  %v685_v0 = vmov 0.0   ;;  %vm686_vm0 = vmmov 0   ;;  %v475_v1 = vld [vmem:[#allocation5] sm:$0xff]   ;;  %v476_v2 = vld [vmem:[#allocation5 + $0x8] sm:$0xff]  }
  0x81   :  { %433 = vmatprep.subr.bf16.mxu0 %v685_v0  ;;  %437 = vmatprep.mubr.msk.bf16.mxu0 %vm686_vm0, %v685_v0  ;;  %v478_v3 = vld [vmem:[#allocation8] sm:$0xff]   ;;  %v479_v5 = vld [vmem:[#allocation8 + $0x8] sm:$0xff]   ;;  %vm145_vm1 = vcmask 261120   ;;  %v480_v6 = vld [vmem:[#allocation8 + $0x10] sm:$0xff]   ;;  %s687_s6 = smov [#allocation14]  }
  0x82   :  { %441 = vmatprep.subr.bf16.mxu1 %v685_v0  ;;  %457 = vmatprep.mubr.msk.bf16.mxu1 %vm686_vm0, %v685_v0  ;;  %v477_v4 = vld [vmem:[#allocation2] sm:$0xff]   ;;  %v481_v7 = vld [vmem:[#allocation8 + $0x18] sm:$0xff]   ;;  %v484_v10 = vld [vmem:[#allocation8 + $0x30] sm:$0xff]   ;;  %s386_s27 = sshll.u32 %s687_s6, 4  ;;  %s387_s27 = int_to_ptr.vmem [resolvable:$true] %s386_s27 }
  0x83   :  { %434 = vmatpush3.bf16.msra.mxu0 %v475_v1  ;;  %442 = vmatpush3.bf16.msra.mxu1 %v478_v3  ;;  %v482_v8 = vld [vmem:[#allocation8 + $0x20] sm:$0xff]   ;;  %v483_v9 = vld [vmem:[#allocation8 + $0x28] sm:$0xff]   ;;  %v485_v11 = vld [vmem:[#allocation8 + $0x38] sm:$0xff]   ;;  %s644_s0 = scalar_lea.vmem %s387_s27, 256  ;;  %p649_p1 = scmp.lt.s32.totalorder %s387_s27, %s387_s27 }
  0x84   :  { %435 = vmatprep.subr.bf16.mxu0 %v685_v0  ;;  %443 = vmatprep.subr.bf16.mxu1 %v685_v0  ;;  %v401_v12 = vld [vmem:[#allocation7] ss:$0 sm:$0xff]  ;;  %v418_v26 = vld [vmem:[#allocation2] sm:$0xff]   ;;  %v414_v27 = vld [vmem:[#allocation10] ss:$0 sm:$0xff]  ;;  %p645_p0 = scmp.ne.s32.totalorder %s387_s27, %s644_s0  ;;  %p650_p2 = scmp.lt.s32.totalorder %s644_s0, %s644_s0 }
  0x85   :  { %v419_v28 = vunpack.c.l.bf16 %v418_v26  ;;  %v420_v31 = vunpack.c.h.bf16 %v418_v26  ;;  %v415_v55 = vld [vmem:[#allocation11] ss:$0 sm:$0xff]  ;;  %v416_v57 = vld [vmem:[#allocation13] ss:$0 sm:$0xff] }
  0x86   :  { %p651_p3 = por %p650_p2, %p649_p1 }
  0x87   :  { %436 = vmatpush3.bf16.msra.mxu0 %v476_v2  ;;  %444 = vmatpush3.bf16.msra.mxu1 %v479_v5 }
  0x88   :  { %445 = vmatprep.subr.bf16.mxu1 %v685_v0  ;;  %p652_p4 = pnand %p651_p3, %p645_p0 }
  0x8a   :  { %438 = vmatmul.mubr.msk.bf16.vlgmr.msra.gmra.mrb[0].mxu0 %vm145_vm1, %v477_v4 }
  0x8b   :  { %446 = vmatpush3.bf16.msra.mxu1 %v480_v6 }
  0x8c   :  { %447 = vmatprep.subr.bf16.mxu1 %v685_v0 }
  0x8f   :  { %448 = vmatpush3.bf16.msra.mxu1 %v481_v7 }
  0x90   :  { %449 = vmatprep.subr.bf16.mxu1 %v685_v0 }
  0x93   :  { %450 = vmatpush3.bf16.msra.mxu1 %v482_v8 }
  0x94   :  { %451 = vmatprep.subr.bf16.mxu1 %v685_v0 }
  0x97   :  { %452 = vmatpush3.bf16.msra.mxu1 %v483_v9 }
  0x98   :  { %453 = vmatprep.subr.bf16.mxu1 %v685_v0 }
  0x9b   :  { %454 = vmatpush3.bf16.msra.mxu1 %v484_v10 }
  0x9c   :  { %455 = vmatprep.subr.bf16.mxu1 %v685_v0 }
  0x9f   :  { %456 = vmatpush3.bf16.msra.mxu1 %v485_v11 }
 0x15d   :  { %v183_v13 = vpop.f32.mrb[0].mxu0 }
 0x15e   :  { %v184_v14 = vadd.f32 %v401_v12, %v183_v13  ;;  %v439_v15 = vpop.f32.mrb[1].mxu0 }
 0x15f   :  { %v186_v16 = vpop.f32.mrb[2].mxu0 }
 0x160   :  { %v187_v17 = vadd.f32 %v401_v12, %v186_v16  ;;  %v440_v18 = vpop.f32.mrb[3].mxu0  ;;  %v190_v19 = vmax.f32 %v184_v14, 0.0 }
 0x162   :  { %v191_v20 = vmax.f32 %v187_v17, 0.0 }
 0x164   :  { %v192_v21 = vpack.c.bf16 %v191_v20, %v190_v19 }
 0x166   :  { %458 = vmatmul.mubr.bf16.vlgmr.msra.gmra.mrb[0].mxu1 %v192_v21 }
 0x239   :  { %v291_v22 = vpop.f32.mrb[0].mxu1 }
 0x23a   :  { %302 = vst.msk [vmem:[#allocation14] sm:$0xff] %vm145_vm1, %v291_v22  ;;  %v459_v23 = vpop.f32.mrb[1].mxu1 }
 0x23b   :  { %v294_v24 = vpop.f32.mrb[2].mxu1 }
 0x23c   :  { %303 = vst.msk [vmem:[#allocation14 + $0x8] sm:$0xff] %vm145_vm1, %v294_v24  ;;  %v460_v25 = vpop.f32.mrb[3].mxu1 }
 0x241   :  { %v317_v29 = vld [vmem:[#allocation14] sm:$0xff] }
 0x242   :  { %v326_v30 = vadd.f32 %v414_v27, %v317_v29 }
 0x243   :  { %v318_v32 = vld [vmem:[#allocation14 + $0x8] sm:$0xff] }
 0x244   :  { %v332_v33 = vadd.f32 %v419_v28, %v326_v30  ;;  %v327_v34 = vadd.f32 %v414_v27, %v318_v32 }
 0x246   :  { %v334_v35 = vsel %vm145_vm1, %v332_v33, 0.0  ;;  %v333_v36 = vadd.f32 %v420_v31, %v327_v34 }
 0x247   :  { %335 = vadd.xlane.f32.xlu0 %v334_v35 }
 0x248   :  { %v337_v37 = vsel %vm145_vm1, %v333_v36, 0.0 }
 0x24b   :  { %338 = vadd.xlane.f32.xlu0 %v337_v37 }
 0x2d4   :  { %v336_v38 = vpop.xlane.xlu0 %335 }
 0x2d5   :  { %v341_v39 = vmul.f32 0.03125, %v336_v38 }
 0x2d7   :  { %v343_v40 = vsub.f32 %v332_v33, %v341_v39 }
 0x2d8   :  { %v339_v41 = vpop.xlane.xlu0 %338 }
 0x2d9   :  { %v342_v42 = vmul.f32 0.03125, %v339_v41  ;;  %v345_v43 = vmul.f32 %v343_v40, %v343_v40 }
 0x2db   :  { %v344_v44 = vsub.f32 %v333_v36, %v342_v42  ;;  %v347_v45 = vsel %vm145_vm1, %v345_v43, 0.0 }
 0x2dc   :  { %348 = vadd.xlane.f32.xlu1 %v347_v45 }
 0x2dd   :  { %v346_v46 = vmul.f32 %v344_v44, %v344_v44 }
 0x2df   :  { %v350_v47 = vsel %vm145_vm1, %v346_v46, 0.0 }
 0x2e0   :  { %351 = vadd.xlane.f32.xlu1 %v350_v47 }
 0x369   :  { %v349_v48 = vpop.xlane.xlu1 %348 }
 0x36a   :  { %v353_v49 = vmul.f32 0.03125, %v349_v48 }
 0x36c   :  { %v355_v50 = vadd.f32 1e-05, %v353_v49 }
 0x36d   :  { %v352_v51 = vpop.xlane.xlu1 %351 }
 0x36e   :  { %486 = vrsqrt.f32 %v355_v50  ;;  %v354_v52 = vmul.f32 0.03125, %v352_v51 }
 0x370   :  { %v356_v53 = vadd.f32 1e-05, %v354_v52 }
 0x372   :  { %488 = vrsqrt.f32 %v356_v53 }
 0x378   :  { %v487_v54 = vpop.eup %486 }
 0x379   :  { %v359_v56 = vmul.f32 %v487_v54, %v343_v40 }
 0x37b   :  { %v368_v58 = vmul.f32 %v415_v55, %v359_v56 }
 0x37c   :  { %v489_v59 = vpop.eup %488 }
 0x37d   :  { %v377_v60 = vadd.f32 %v416_v57, %v368_v58  ;;  %v360_v61 = vmul.f32 %v489_v59, %v344_v44 }
 0x37f   :  { %379 = vst.msk [vmem:[#allocation14] sm:$0xff] %vm145_vm1, %v377_v60  ;;  %v369_v62 = vmul.f32 %v415_v55, %v360_v61 }
 0x381   :  { %v378_v63 = vadd.f32 %v416_v57, %v369_v62 }
 0x383   :  { %380 = vst.msk [vmem:[#allocation14 + $0x8] sm:$0xff] %vm145_vm1, %v378_v63 }
 0x384   :  { %655 = shalt.err (!%p652_p4)
}
 0x385   :  { %s656_s30 = scalar_lea.hbm %s865_s7, 256 }
 0x386   :  { %p657_p5 = scmp.ne.s32.totalorder %s865_s7, %s656_s30  ;;  %p660_p6 = scmp.lt.u32.totalorder %s656_s30, %s865_s7 }
 0x388   :  { %p662_p7 = pnand %p660_p6, %p657_p5 }
 0x38a   :  { %665 = shalt.err (!%p662_p7)
}
 0x38b   :  { %s688_s21 = smov 128   ;;  %s689_s22 = smov 8  }
 0x38c   :  { %392 = dma.vmem_to_hbm [thread:$0]  %s387_s27, 256, %s865_s7, [#allocation4], %s688_s21, %s688_s21, %s689_s22  }
 0x38d   :  { %674 = dma.done.wait [#allocation4], 256  }
 0x38e   :  { %675 = vsyncadd [#allocation4], 4294967040 }
 0x38f   :  { %396 = vsyncpa [#allocation3], 1 }
 0x390   :  { %397 = vsyncpa [#allocation6], 1 }
 0x391   :  { %398 = vsyncpa [#allocation9], 1 }
 0x392   :  { %399 = vsyncpa [#allocation12], 1 }
 0x393   :  { %400 = vsyncpa [#allocation4], 1 }

// kernel: decoder_block_forward.4
= control target key start
LH: loop header
LB: loop body
LE: loop exit
PB: predicated region body
PF: predicated region fallthrough
CT: control target
= control target key end

     0   :  { %s3114_s0 = inlined_call_operand.hbm [shape: bf16[2,8,32], index: 0, kind: input, shape index: {}]   ;;  %s3115_s1 = inlined_call_operand.hbm [shape: f32[2,8,32], index: 1, kind: input, shape index: {}]   ;;  %s3116_s2 = inlined_call_operand.hbm [shape: f32[2,8,32], index: 2, kind: input, shape index: {}]   ;;  %s3117_s3 = inlined_call_operand.hbm [shape: bf16[32,32], index: 3, kind: input, shape index: {}]   ;;  %s3118_s4 = inlined_call_operand.hbm [shape: bf16[32,32], index: 4, kind: input, shape index: {}]   ;;  %s3119_s5 = inlined_call_operand.hbm [shape: bf16[32,32], index: 5, kind: input, shape index: {}]   ;;  %s3120_s6 = inlined_call_operand.hbm [shape: bf16[32,32], index: 6, kind: input, shape index: {}]   ;;  %s3121_s7 = inlined_call_operand.hbm [shape: f32[1,32], index: 7, kind: input, shape index: {}]   ;;  %s3122_s8 = inlined_call_operand.hbm [shape: f32[1,32], index: 8, kind: input, shape index: {}]   ;;  %s3123_s9 = inlined_call_operand.hbm [shape: f32[1,32], index: 9, kind: input, shape index: {}]   ;;  %s3124_s10 = inlined_call_operand.hbm [shape: bf16[2,8,32], index: 10, kind: output, shape index: {}]  }
   0x1   :  { %3152 = sst [smem:[#allocation39_spill]] %s3114_s0 }
   0x2   :  { %3153 = sst [smem:[#allocation40_spill]] %s3115_s1 }
   0x3   :  { %3154 = sst [smem:[#allocation41_spill]] %s3117_s3 }
   0x4   :  { %3155 = sst [smem:[#allocation42_spill]] %s3119_s5 }
   0x5   :  { %3156 = sst [smem:[#allocation43_spill]] %s3121_s7 }
   0x6   :  { %3157 = sst [smem:[#allocation44_spill]] %s3124_s10 }
   0x7   :  { %15 = vsyncpa [#allocation7], 0 }
   0x8   :  { %17 = vsyncpa [#allocation7 + $0x1], 0 }
   0x9   :  { %18 = vsyncpa [#allocation10], 0 }
   0xa   :  { %20 = vsyncpa [#allocation10 + $0x1], 0 }
   0xb   :  { %21 = vsyncpa [#allocation13], 0 }
   0xc   :  { %22 = vsyncpa [#allocation16], 0 }
   0xd   :  { %23 = vsyncpa [#allocation19], 0 }
   0xe   :  { %24 = vsyncpa [#allocation22], 0 }
   0xf   :  { %25 = vsyncpa [#allocation8], 0 }
  0x10   :  { %27 = vsyncpa [#allocation8 + $0x1], 0  ;;  %s2489_s13 = smov 0   ;;  %s2491_s14 = smov 0  }
  0x11   :  { %s2493_s15 = smov 0   ;;  %s2495_s16 = smov 0  }
  0x12   :  { %s2497_s17 = smov 0   ;;  %s2499_s18 = smov 0  }
  0x13 LB: > { %3158 = sst [smem:[#allocation31_spill]] %s2386_s13  ;;  %s2520_s19 = sadd.s32 4294967295, %s2406_s18   ;;  %s2406_s18 = sphi %s2499_s18, %s33_s18   ;;  %s2402_s17 = sphi %s2497_s17, %s3214_s17   ;;  %s2398_s16 = sphi %s2495_s16, %s3213_s16   ;;  %s2394_s15 = sphi %s2493_s15, %s3209_s15   ;;  %s2390_s14 = sphi %s2491_s14, %s3212_s14   ;;  %s2386_s13 = sphi %s2489_s13, %s3211_s13  }
  0x14   : > { %3159 = sst [smem:[#allocation32_spill]] %s2394_s15  ;;  %p1657_p0 = scmp.ge.s32.totalorder %s2406_s18, 1 }
  0x15   : > { %3160 = sst [smem:[#allocation33_spill]] %s2398_s16  ;;  %p3128_p1 = scmp.eq.s32.totalorder %s2520_s19, 0 }
  0x16   : > { %3161 = sst [smem:[#allocation34_spill]] %s2406_s18  ;;  %p316_p2 = scmp.lt.s32.totalorder %s2406_s18, 3 }
  0x17   : > { %s2408_s21 = smov [#allocation12]   ;;  %s2409_s24 = smov [#allocation15]  }
  0x18   : > { %p2525_p3 = pnand %p1657_p0, %p316_p2  ;;  %s328_s22 = sshll.u32 %s2408_s21, 4  ;;  %s2529_s22 = int_to_ptr.vmem [resolvable:$true] %s328_s22 }
  0x19   : > { %s354_s25 = sshll.u32 %s2409_s24, 4  ;;  %s2410_s26 = smov [#allocation18]   ;;  %s2540_s25 = int_to_ptr.vmem [resolvable:$true] %s354_s25 }
  0x1a   : > { %s3162_s20 = scalar_select %p2525_p3, 1, 0 }
  0x1b   : > { %p1855_p4 = pneg %p2525_p3  ;;  %s2542_s27 = sshll.u32 %s2410_s26, 4  ;;  %s382_s27 = int_to_ptr.vmem [resolvable:$true] %s2542_s27 }
  0x1c   : > { %3163 = sst [smem:[#allocation35_spill]] %s3162_s20  ;;  %s3165_s3 = sld [smem:[#allocation41_spill]] }
  0x1d   : > { %p2536_p6 = pnand %p1855_p4, %p3128_p1 }
  0x1f   : > { %s3164_s23 = scalar_select %p2536_p6, 1, 0 }
  0x20   : > { %p2552_p8 = pneg %p2536_p6 }
  0x22   : > { %s2018_s30 = scalar_lea.hbm %s3165_s3, 256 }
  0x23   : > { %p2019_p7 = scmp.ne.s32.totalorder %s3165_s3, %s2018_s30  ;;  %p2025_p11 = scmp.lt.u32.totalorder %s2018_s30, %s3165_s3 }
  0x24   : > { %s3166_s21 = scalar_select %p2552_p8, 1, 0 }
  0x25   : > { %p2021_p9 = pnand %p2552_p8, %p2019_p7 }
  0x27   : > { %p2022_p10 = pneg %p2021_p9 }
  0x29   : > { %p2027_p12 = pnand %p2025_p11, %p2022_p10 }
  0x2b   : > { %2030 = shalt.err (!%p2027_p12)
}
  0x2c   : > { %s2031_s28 = scalar_lea.vmem %s2529_s22, 256  ;;  %p2039_p4 = scmp.lt.s32.totalorder %s2529_s22, %s2529_s22 }
  0x2d   : > { %p2032_p13 = scmp.ne.s32.totalorder %s2529_s22, %s2031_s28  ;;  %p2040_p5 = scmp.lt.s32.totalorder %s2031_s28, %s2031_s28 }
  0x2f   : > { %p2034_p0 = pnand %p2032_p13, %p2552_p8  ;;  %p2041_p7 = por %p2040_p5, %p2039_p4 }
  0x31   : > { %p2035_p2 = pneg %p2034_p0 }
  0x33   : > { %p2042_p9 = pnand %p2041_p7, %p2035_p2 }
  0x35   : > { %2045 = shalt.err (!%p2042_p9)
}
  0x36   : > { %s3130_s29 = smov 64   ;;  %s3132_s30 = smov 4  }
  0x37   : > { %1858 = dma.hbm_to_vmem [thread:$0]  (!%p2536_p6), %s3165_s3, 256, %s2529_s22, [#allocation13], %s3130_s29, %s3130_s29, %s3132_s30  }
  0x38   : > { %s3167_s5 = sld [smem:[#allocation42_spill]] }
  0x3e   : > { %s2046_s28 = scalar_lea.hbm %s3167_s5, 256 }
  0x3f   : > { %p2047_p5 = scmp.ne.s32.totalorder %s3167_s5, %s2046_s28  ;;  %p2053_p12 = scmp.lt.u32.totalorder %s2046_s28, %s3167_s5 }
  0x41   : > { %p2049_p10 = pnand %p2047_p5, %p2552_p8 }
  0x43   : > { %p2050_p11 = pneg %p2049_p10 }
  0x45   : > { %p2055_p13 = pnand %p2053_p12, %p2050_p11 }
  0x47   : > { %2058 = shalt.err (!%p2055_p13)
}
  0x48   : > { %s2059_s22 = scalar_lea.vmem %s2540_s25, 256  ;;  %p2067_p7 = scmp.lt.s32.totalorder %s2540_s25, %s2540_s25 }
  0x49   : > { %p2060_p0 = scmp.ne.s32.totalorder %s2540_s25, %s2059_s22  ;;  %p2068_p9 = scmp.lt.s32.totalorder %s2059_s22, %s2059_s22 }
  0x4b   : > { %p2062_p2 = pnand %p2060_p0, %p2552_p8  ;;  %p2069_p5 = por %p2068_p9, %p2067_p7 }
  0x4d   : > { %p2063_p4 = pneg %p2062_p2 }
  0x4f   : > { %p2070_p10 = pnand %p2069_p5, %p2063_p4 }
  0x51   : > { %2073 = shalt.err (!%p2070_p10)
}
  0x52   : > { %1864 = dma.hbm_to_vmem [thread:$0]  (!%p2536_p6), %s3167_s5, 256, %s2540_s25, [#allocation16], %s3130_s29, %s3130_s29, %s3132_s30  }
  0x53   : > { %s3168_s7 = sld [smem:[#allocation43_spill]] }
  0x59   : > { %s2074_s11 = scalar_lea.hbm %s3168_s7, 16 }
  0x5a   : > { %p2075_p11 = scmp.ne.s32.totalorder %s3168_s7, %s2074_s11  ;;  %p2081_p0 = scmp.lt.u32.totalorder %s2074_s11, %s3168_s7 }
  0x5c   : > { %p2077_p12 = pnand %p2075_p11, %p2552_p8 }
  0x5e   : > { %p2078_p13 = pneg %p2077_p12 }
  0x60   : > { %p2083_p2 = pnand %p2081_p0, %p2078_p13 }
  0x62   : > { %2086 = shalt.err (!%p2083_p2)
}
  0x63   : > { %s2087_s22 = scalar_lea.vmem %s382_s27, 16  ;;  %s2094_s25 = scalar_lea.vmem %s382_s27, 32 }
  0x64   : > { %p2088_p4 = scmp.ne.s32.totalorder %s382_s27, %s2087_s22  ;;  %p2095_p5 = scmp.lt.s32.totalorder %s382_s27, %s382_s27 }
  0x65   : > { %p2096_p10 = scmp.lt.s32.totalorder %s2094_s25, %s2087_s22 }
  0x66   : > { %p2090_p7 = pnand %p2088_p4, %p2552_p8 }
  0x67   : > { %p2097_p1 = por %p2096_p10, %p2095_p5 }
  0x68   : > { %p2091_p9 = pneg %p2090_p7 }
  0x6a   : > { %p2098_p3 = pnand %p2097_p1, %p2091_p9 }
  0x6c   : > { %2101 = shalt.err (!%p2098_p3)
}
  0x6d   : > { %1870 = dma.hbm_to_vmem [thread:$0]  (!%p2536_p6), %s3168_s7, 16, %s382_s27, [#allocation19]  }
  0x6e   : > { %s1656_s16 = sadd.s32 4294967294, %s2406_s18   ;;  %s52_s20 = sadd.s32 1, %s2402_s17 }
  0x6f   : > { %s61_s11 = sadd.s32 1, %s2394_s15  ;;  %p54_p1 = scmp.ge.s32.totalorder %s52_s20, 2 }
  0x70   : > { %p68_p3 = scmp.ne.s32.totalorder %s2394_s15, %s2390_s14  ;;  %p69_p11 = scmp.eq.s32.totalorder %s2406_s18, 0 }
  0x71   : > { %p74_p12 = scmp.ne.s32.totalorder %s2390_s14, %s2386_s13  ;;  %s3216_s20 = smov (%p54_p1, %s52_s20), 0 }
  0x72   : > { %3169 = sst [smem:[#allocation36_spill]] %s3216_s20  ;;  %p70_p13 = por %p69_p11, %p68_p3 }
  0x73   : > { %p3170_p0 = scmp.eq.s32.totalorder %s2520_s19, 0  ;;  %s56_s27 = ssub.s32 %s2402_s17, %s3216_s20 }
  0x74   : > { %p303_p4 = scmp.eq.s32.totalorder %s2520_s19, 1  ;;  %p59_p7 = scmp.eq.s32.totalorder %s56_s27, 0 }
  0x75   : > { %p2633_p2 = por %p3170_p0, %p74_p12  ;;  %p309_p9 = scmp.eq.s32.totalorder %s1656_s16, 1 }
  0x76   : > { %p2640_p5 = por %p303_p4, %p68_p3  ;;  %p1898_p10 = scmp.lt.s32.totalorder %s2406_s18, 2 }
  0x77   : > { %s3171_s12 = scalar_select %p2633_p2, 1, 0 }
  0x78   : > { %s3172_s24 = scalar_select %p2640_p5, 1, 0 }
  0x79   : > { %s2646_s26 = scalar_select %p59_p7, %s2394_s15, %s61_s11  }
  0x7a   : > { %p2648_p1 = por %p309_p9, %p74_p12  ;;  %s2653_s22 = sand.u32 1, %s2394_s15  }
  0x7b   : > { %3173 = sst [smem:[#allocation37_spill]] %s2646_s26  ;;  %p2655_p11 = pnand %p1898_p10, %p70_p13 }
  0x7c   : > { %s3174_s28 = scalar_select %p2648_p1, 1, 0 }
  0x7d   : > { %s3176_s25 = scalar_select %p2655_p11, 1, 0 }
  0x7e   : > { %3175 = sst [smem:[#allocation38_spill]] %s3174_s28  ;;  %s433_s0 = sand.u32 1, %s2406_s18  }
  0x7f   : > { %s3134_s10 = sshll.u32 %s2653_s22, 3  ;;  %s3135_s16 = sshll.u32 %s2402_s17, 7 }
  0x80   : > { %s437_s27 = scalar_lea.vmem [#allocation9], %s3134_s10  ;;  %s3177_s1 = sld [smem:[#allocation40_spill]] }
  0x81   : > { %s445_s11 = sshll.u32 %s437_s27, 4  ;;  %s2673_s5 = scalar_lea.sflag [#allocation10], %s433_s0  ;;  %s2671_s11 = int_to_ptr.vmem [resolvable:$true] %s445_s11 }
  0x82   : > { %p2679_p12 = pneg %p2655_p11 }
  0x84   : > { %s3178_s10 = scalar_select %p2679_p12, 1, 0 }
  0x86   : > { %s2669_s3 = scalar_lea.hbm %s3177_s1, %s3135_s16  ;;  %s2107_s27 = scalar_lea.hbm %s3177_s1, 256 }
  0x87   : > { %s2102_s7 = scalar_lea.hbm %s2669_s3, 128  ;;  %p2108_p4 = scmp.lt.u32.totalorder %s2669_s3, %s3177_s1 }
  0x88   : > { %p2103_p3 = scmp.ne.s32.totalorder %s2669_s3, %s2102_s7  ;;  %p2109_p7 = scmp.lt.u32.totalorder %s2107_s27, %s2102_s7 }
  0x89   : > { %p2111_p10 = scmp.lt.u32.totalorder %s2102_s7, %s2669_s3 }
  0x8a   : > { %p2105_p13 = pnand %p2679_p12, %p2103_p3  ;;  %p2110_p9 = por %p2109_p7, %p2108_p4 }
  0x8c   : > { %p2106_p0 = pneg %p2105_p13  ;;  %p2112_p1 = por %p2111_p10, %p2110_p9 }
  0x8e   : > { %p2113_p5 = pnand %p2112_p1, %p2106_p0 }
  0x90   : > { %2116 = shalt.err (!%p2113_p5)
}
  0x91   : > { %s2117_s0 = scalar_lea.vmem %s2671_s11, 128  ;;  %s2413_s29 = smov [#allocation9]  }
  0x92   : > { %p2118_p3 = scmp.ne.s32.totalorder %s2671_s11, %s2117_s0  ;;  %s2122_s30 = sshll.u32 %s2413_s29, 4  ;;  %s2123_s30 = int_to_ptr.vmem [resolvable:$false] %s2122_s30 }
  0x93   : > { %s2124_s20 = scalar_lea.vmem %s2123_s30, 256  ;;  %p2125_p6 = scmp.lt.s32.totalorder %s2671_s11, %s2123_s30 }
  0x94   : > { %p2120_p13 = pnand %p2118_p3, %p2679_p12  ;;  %p2126_p8 = scmp.lt.s32.totalorder %s2124_s20, %s2117_s0 }
  0x96   : > { %p2121_p2 = pneg %p2120_p13  ;;  %p2127_p4 = por %p2126_p8, %p2125_p6 }
  0x98   : > { %p2128_p7 = pnand %p2127_p4, %p2121_p2 }
  0x9a   : > { %2131 = shalt.err (!%p2128_p7)
}
  0x9b   : > { %1883 = dma.hbm_to_vmem [thread:$0]  (!%p2655_p11), %s2669_s3, 128, %s2671_s11, %s2673_s5  }
  0x9c   : > { %s3179_s7 = sshll.u32 %s2402_s17, 7  ;;  %s2414_s1 = smov [#allocation14]  }
  0x9d   : > { %s2708_s29 = scalar_lea.hbm %s3116_s2, %s3179_s7  ;;  %s341_s30 = sshll.u32 %s2414_s1, 4  ;;  %s342_s30 = int_to_ptr.vmem [resolvable:$true] %s341_s30 }
  0x9e   : > { %s2415_s0 = smov [#allocation17]   ;;  %s2132_s18 = scalar_lea.hbm %s3118_s4, 256 }
  0x9f   : > { %s367_s20 = sshll.u32 %s2415_s0, 4  ;;  %p2133_p6 = scmp.ne.s32.totalorder %s3118_s4, %s2132_s18  ;;  %s2710_s20 = int_to_ptr.vmem [resolvable:$true] %s367_s20 }
  0xa0   : > { %p3180_p8 = scmp.ne.s32.totalorder %s3166_s21, 0  ;;  %p2139_p1 = scmp.lt.u32.totalorder %s2132_s18, %s3118_s4 }
  0xa2   : > { %p2135_p2 = pnand %p2133_p6, %p3180_p8 }
  0xa4   : > { %p2136_p5 = pneg %p2135_p2 }
  0xa6   : > { %p2141_p0 = pnand %p2139_p1, %p2136_p5 }
  0xa8   : > { %2144 = shalt.err (!%p2141_p0)
}
  0xa9   : > { %s2145_s1 = scalar_lea.vmem %s342_s30, 256  ;;  %p2153_p13 = scmp.lt.s32.totalorder %s342_s30, %s342_s30 }
  0xaa   : > { %p2146_p9 = scmp.ne.s32.totalorder %s342_s30, %s2145_s1  ;;  %p2154_p4 = scmp.lt.s32.totalorder %s2145_s1, %s2145_s1 }
  0xac   : > { %p2148_p10 = pnand %p2146_p9, %p3180_p8  ;;  %p2155_p7 = por %p2154_p4, %p2153_p13 }
  0xae   : > { %p2149_p3 = pneg %p2148_p10 }
  0xb0   : > { %p2156_p11 = pnand %p2155_p7, %p2149_p3 }
  0xb2   : > { %2159 = shalt.err (!%p2156_p11)
}
  0xb3   : > { %p3181_p6 = scmp.ne.s32.totalorder %s3164_s23, 0  ;;  %s3182_s13 = smov 4  }
  0xb4   : > { %s3183_s15 = smov 64   ;;  %s2160_s16 = scalar_lea.hbm %s3120_s6, 256 }
  0xb5   : > { %1861 = dma.hbm_to_vmem [thread:$0]  (!%p3181_p6), %s3118_s4, 256, %s342_s30, [#allocation13], %s3183_s15, %s3183_s15, %s3182_s13  }
  0xb6   : > { %p2161_p2 = scmp.ne.s32.totalorder %s3120_s6, %s2160_s16  ;;  %p2167_p1 = scmp.lt.u32.totalorder %s2160_s16, %s3120_s6 }
  0xb8   : > { %p2163_p11 = pnand %p2161_p2, %p3180_p8 }
  0xba   : > { %p2164_p5 = pneg %p2163_p11 }
  0xbc   : > { %p2169_p0 = pnand %p2167_p1, %p2164_p5 }
  0xbe   : > { %2172 = shalt.err (!%p2169_p0)
}
  0xbf   : > { %s2173_s30 = scalar_lea.vmem %s2710_s20, 256  ;;  %p2181_p13 = scmp.lt.s32.totalorder %s2710_s20, %s2710_s20 }
  0xc0   : > { %p2174_p9 = scmp.ne.s32.totalorder %s2710_s20, %s2173_s30  ;;  %p2182_p4 = scmp.lt.s32.totalorder %s2173_s30, %s2173_s30 }
  0xc2   : > { %p2176_p10 = pnand %p2174_p9, %p3180_p8  ;;  %p2183_p7 = por %p2182_p4, %p2181_p13 }
  0xc4   : > { %p2177_p3 = pneg %p2176_p10 }
  0xc6   : > { %p2184_p2 = pnand %p2183_p7, %p2177_p3 }
  0xc8   : > { %2187 = shalt.err (!%p2184_p2)
}
  0xc9   : > { %1867 = dma.hbm_to_vmem [thread:$0]  (!%p3181_p6), %s3120_s6, 256, %s2710_s20, [#allocation16], %s3183_s15, %s3183_s15, %s3182_s13  }
  0xca   : > { %s2416_s18 = smov [#allocation20]   ;;  %s2417_s7 = smov [#allocation21]  }
  0xcb   : > { %s392_s28 = sshll.u32 %s2416_s18, 4  ;;  %s403_s16 = sshll.u32 %s2417_s7, 4  ;;  %s393_s28 = int_to_ptr.vmem [resolvable:$true] %s392_s28  ;;  %s2759_s16 = int_to_ptr.vmem [resolvable:$true] %s403_s16 }
  0xcc   : > { %s2188_s3 = scalar_lea.hbm %s3122_s8, 16 }
  0xcd   : > { %p2189_p11 = scmp.ne.s32.totalorder %s3122_s8, %s2188_s3  ;;  %p2195_p0 = scmp.lt.u32.totalorder %s2188_s3, %s3122_s8 }
  0xcf   : > { %p2191_p5 = pnand %p2189_p11, %p3180_p8 }
  0xd1   : > { %p2192_p1 = pneg %p2191_p5 }
  0xd3   : > { %p2197_p9 = pnand %p2195_p0, %p2192_p1 }
  0xd5   : > { %2200 = shalt.err (!%p2197_p9)
}
  0xd6   : > { %s2201_s13 = scalar_lea.vmem %s393_s28, 16  ;;  %s2208_s15 = scalar_lea.vmem %s393_s28, 32 }
  0xd7   : > { %p2202_p10 = scmp.ne.s32.totalorder %s393_s28, %s2201_s13  ;;  %p2209_p4 = scmp.lt.s32.totalorder %s393_s28, %s393_s28 }
  0xd8   : > { %p2210_p7 = scmp.lt.s32.totalorder %s2208_s15, %s2201_s13 }
  0xd9   : > { %p2204_p3 = pnand %p2202_p10, %p3180_p8 }
  0xda   : > { %p2211_p2 = por %p2210_p7, %p2209_p4 }
  0xdb   : > { %p2205_p13 = pneg %p2204_p3 }
  0xdd   : > { %p2212_p12 = pnand %p2211_p2, %p2205_p13 }
  0xdf   : > { %2215 = shalt.err (!%p2212_p12)
}
  0xe0   : > { %1873 = dma.hbm_to_vmem [thread:$0]  (!%p3181_p6), %s3122_s8, 16, %s393_s28, [#allocation19]  }
  0xe1   : > { %s2216_s0 = scalar_lea.hbm %s3123_s9, 16 }
  0xe2   : > { %p2217_p11 = scmp.ne.s32.totalorder %s3123_s9, %s2216_s0  ;;  %p2223_p12 = scmp.lt.u32.totalorder %s2216_s0, %s3123_s9 }
  0xe4   : > { %p2219_p5 = pnand %p2217_p11, %p3180_p8 }
  0xe6   : > { %p2220_p1 = pneg %p2219_p5 }
  0xe8   : > { %p2225_p0 = pnand %p2223_p12, %p2220_p1 }
  0xea   : > { %2228 = shalt.err (!%p2225_p0)
}
  0xeb   : > { %s2229_s28 = scalar_lea.vmem %s2759_s16, 16  ;;  %s2236_s20 = scalar_lea.vmem %s2759_s16, 32 }
  0xec   : > { %p2230_p9 = scmp.ne.s32.totalorder %s2759_s16, %s2229_s28  ;;  %p2237_p13 = scmp.lt.s32.totalorder %s2759_s16, %s2759_s16 }
  0xed   : > { %p2238_p4 = scmp.lt.s32.totalorder %s2236_s20, %s2229_s28 }
  0xee   : > { %p2232_p10 = pnand %p2230_p9, %p3180_p8 }
  0xef   : > { %p2239_p7 = por %p2238_p4, %p2237_p13 }
  0xf0   : > { %p2233_p3 = pneg %p2232_p10 }
  0xf2   : > { %p2240_p2 = pnand %p2239_p7, %p2233_p3 }
  0xf4   : > { %2243 = shalt.err (!%p2240_p2)
}
  0xf5   : > { %1876 = dma.hbm_to_vmem [thread:$0]  (!%p3181_p6), %s3123_s9, 16, %s2759_s16, [#allocation22]  }
  0xf6   : > { %s1666_s21 = sshll.u32 %s2653_s22, 2  ;;  %s1667_s26 = sshll.u32 %s2402_s17, 6 }
  0xf7   : > { %s3184_s27 = sld [smem:[#allocation39_spill]]  ;;  %s418_s23 = scalar_lea.vmem [#allocation6], %s1666_s21 }
  0xf8   : > { %s426_s3 = sshll.u32 %s418_s23, 4  ;;  %s3185_s11 = sshll.u32 %s2653_s22, 3  ;;  %s2810_s3 = int_to_ptr.vmem [resolvable:$true] %s426_s3 }
  0xf9   : > { %s2814_s30 = scalar_lea.vmem [#allocation11], %s3185_s11  ;;  %s415_s1 = scalar_lea.sflag [#allocation7], %s2653_s22 }
  0xfa   : > { %s464_s16 = sshll.u32 %s2814_s30, 4  ;;  %p3186_p6 = scmp.ne.s32.totalorder %s3178_s10, 0  ;;  %s465_s16 = int_to_ptr.vmem [resolvable:$true] %s464_s16 }
  0xfd   : > { %s2808_s0 = scalar_lea.hbm %s3184_s27, %s1667_s26  ;;  %s2249_s15 = scalar_lea.hbm %s3184_s27, 128 }
  0xfe   : > { %s2244_s28 = scalar_lea.hbm %s2808_s0, 64  ;;  %p2250_p1 = scmp.lt.u32.totalorder %s2808_s0, %s3184_s27 }
  0xff   : > { %p2245_p8 = scmp.ne.s32.totalorder %s2808_s0, %s2244_s28  ;;  %p2251_p12 = scmp.lt.u32.totalorder %s2249_s15, %s2244_s28 }
 0x100   : > { %p2253_p9 = scmp.lt.u32.totalorder %s2244_s28, %s2808_s0 }
 0x101   : > { %p2247_p11 = pnand %p2245_p8, %p3186_p6  ;;  %p2252_p0 = por %p2251_p12, %p2250_p1 }
 0x103   : > { %p2248_p5 = pneg %p2247_p11  ;;  %p2254_p10 = por %p2253_p9, %p2252_p0 }
 0x105   : > { %p2255_p3 = pnand %p2254_p10, %p2248_p5 }
 0x107   : > { %2258 = shalt.err (!%p2255_p3)
}
 0x108   : > { %s2259_s22 = scalar_lea.vmem %s2810_s3, 64  ;;  %s2418_s18 = smov [#allocation6]  }
 0x109   : > { %p2260_p13 = scmp.ne.s32.totalorder %s2810_s3, %s2259_s22  ;;  %s2264_s7 = sshll.u32 %s2418_s18, 4  ;;  %s2265_s7 = int_to_ptr.vmem [resolvable:$false] %s2264_s7 }
 0x10a   : > { %s2266_s23 = scalar_lea.vmem %s2265_s7, 128  ;;  %p2267_p2 = scmp.lt.s32.totalorder %s2810_s3, %s2265_s7 }
 0x10b   : > { %p2262_p4 = pnand %p2260_p13, %p3186_p6  ;;  %p2268_p8 = scmp.lt.s32.totalorder %s2266_s23, %s2259_s22 }
 0x10d   : > { %p2263_p7 = pneg %p2262_p4  ;;  %p2269_p11 = por %p2268_p8, %p2267_p2 }
 0x10f   : > { %p2270_p1 = pnand %p2269_p11, %p2263_p7 }
 0x111   : > { %2273 = shalt.err (!%p2270_p1)
}
 0x112   : > { %p3187_p5 = scmp.ne.s32.totalorder %s3176_s25, 0  ;;  %s2274_s11 = scalar_lea.hbm %s2708_s29, 128 }
 0x113   : > { %p2275_p12 = scmp.ne.s32.totalorder %s2708_s29, %s2274_s11  ;;  %s2279_s13 = scalar_lea.hbm %s3116_s2, 256 }
 0x114   : > { %1880 = dma.hbm_to_vmem [thread:$0]  (!%p3187_p5), %s2808_s0, 64, %s2810_s3, %s415_s1  }
 0x115   : > { %p2277_p0 = pnand %p2275_p12, %p3186_p6  ;;  %p2280_p10 = scmp.lt.u32.totalorder %s2708_s29, %s3116_s2 }
 0x116   : > { %p2281_p3 = scmp.lt.u32.totalorder %s2279_s13, %s2274_s11  ;;  %p2283_p4 = scmp.lt.u32.totalorder %s2274_s11, %s2708_s29 }
 0x117   : > { %p2278_p9 = pneg %p2277_p0 }
 0x118   : > { %p2282_p13 = por %p2281_p3, %p2280_p10 }
 0x11a   : > { %p2284_p7 = por %p2283_p4, %p2282_p13 }
 0x11c   : > { %p2285_p2 = pnand %p2284_p7, %p2278_p9 }
 0x11e   : > { %2288 = shalt.err (!%p2285_p2)
}
 0x11f   : > { %s2289_s0 = scalar_lea.vmem %s465_s16, 128  ;;  %s2419_s3 = smov [#allocation11]  }
 0x120   : > { %p2290_p8 = scmp.ne.s32.totalorder %s465_s16, %s2289_s0  ;;  %s2294_s30 = sshll.u32 %s2419_s3, 4  ;;  %s2295_s30 = int_to_ptr.vmem [resolvable:$false] %s2294_s30 }
 0x121   : > { %s2296_s1 = scalar_lea.vmem %s2295_s30, 256  ;;  %p2297_p12 = scmp.lt.s32.totalorder %s465_s16, %s2295_s30 }
 0x122   : > { %p2292_p11 = pnand %p2290_p8, %p3186_p6  ;;  %p2298_p0 = scmp.lt.s32.totalorder %s2296_s1, %s2289_s0 }
 0x124   : > { %p2293_p1 = pneg %p2292_p11  ;;  %p2299_p5 = por %p2298_p0, %p2297_p12 }
 0x126   : > { %p2300_p3 = pnand %p2299_p5, %p2293_p1 }
 0x128   : > { %2303 = shalt.err (!%p2300_p3)
}
 0x129   : > { %p3188_p10 = scmp.ne.s32.totalorder %s3176_s25, 0  ;;  %s3189_s21 = sld [smem:[#allocation35_spill]] }
 0x12b   : > { %1886 = dma.hbm_to_vmem [thread:$0]  (!%p3188_p10), %s2708_s29, 128, %s465_s16, %s2673_s5  }
 0x12f   : > { %p3190_p9 = scmp.ne.s32.totalorder %s3189_s21, 0 }
 0x130   : > { %s2862_s10 = sand.u32 (!%p3190_p9), 1, %s2390_s14   ;;  %p3191_p6 = scmp.ne.s32.totalorder (!%p3190_p9), %s3171_s12, 0 }
 0x131   : > { %473 = sbr.rel (%p3190_p9) target bundleno = 2131 (0x853), region = 60  ;;  %s1673_s22 = sshll.u32 (!%p3190_p9), %s2862_s10, 2 }
 0x132   : > { %s476_s18 = scalar_lea.sflag (!%p3190_p9), [#allocation7], %s2862_s10  ;;  %s2868_s7 = scalar_lea.vmem (!%p3190_p9), [#allocation6], %s1673_s22 }
 0x138   : > { %2357 = dma.done.wait (%p3191_p6), %s476_s18, 64  }
 0x139   : > { %2359 = vsyncadd (%p3191_p6), %s476_s18, 4294967232  ;;  %s484_s5 = sand.u32 1, %s2520_s19   ;;  %s1674_s25 = sshll.u32 %s2862_s10, 3 }
 0x13a   : > { %s485_s29 = scalar_lea.sflag [#allocation10], %s484_s5  ;;  %s488_s16 = scalar_lea.vmem [#allocation9], %s1674_s25 }
 0x13b   : > { %2361 = dma.done.wait (%p3191_p6), %s485_s29, 256  }
 0x13c   : > { %2363 = vsyncadd (%p3191_p6), %s485_s29, 4294967040  ;;  %s2880_s23 = scalar_lea.vmem [#allocation11], %s1674_s25  ;;  %p3192_p5 = scmp.eq.s32.totalorder %s2520_s19, 0 }
 0x13e   : > { %2365 = dma.done.wait (%p3192_p5), [#allocation13], 512   ;;  %p3193_p13 = pmov %p3192_p5 }
 0x13f   : > { %p3194_p4 = pmov %p3192_p5 }
 0x140   : > { %2367 = vsyncadd (%p3193_p13), [#allocation13], 4294966784 }
 0x141   : > { %2369 = dma.done.wait (%p3194_p4), [#allocation16], 512   ;;  %p3195_p7 = pmov %p3194_p4 }
 0x142   : > { %p3196_p2 = pmov %p3194_p4 }
 0x143   : > { %2371 = vsyncadd (%p3195_p7), [#allocation16], 4294966784 }
 0x144   : > { %2373 = dma.done.wait (%p3196_p2), [#allocation19], 32   ;;  %p3197_p8 = pmov %p3196_p2 }
 0x145   : > { %p3198_p11 = pmov %p3196_p2 }
 0x146   : > { %2375 = vsyncadd (%p3197_p8), [#allocation19], 4294967264 }
 0x147   : > { %2377 = dma.done.wait (%p3198_p11), [#allocation22], 16   ;;  %p3199_p1 = pmov %p3196_p2 }
 0x148   : > { %vm594_vm0 = vcmask 261120   ;;  %v2420_v0 = vmov 0.0   ;;  %vm2421_vm1 = vmmov 0   ;;  %v1990_v1 = vld [vmem:[#allocation12] sm:$0xff]   ;;  %v1991_v2 = vld [vmem:[#allocation14] sm:$0xff]   ;;  %v1992_v3 = vld [vmem:[#allocation12 + $0x8] sm:$0xff]  }
 0x149   : > { %2379 = vsyncadd (%p3199_p1), [#allocation22], 4294967280  ;;  %1739 = vmatprep.subr.bf16.mxu0 %v2420_v0  ;;  %1747 = vmatprep.subr.bf16.mxu1 %v2420_v0  ;;  %642 = vst.msk [vmem:[#allocation5] sm:$0xff] %vm594_vm0, %v2420_v0  ;;  %v1993_v4 = vld [vmem:[#allocation14 + $0x8] sm:$0xff]   ;;  %v643_v6 = vld [vmem:[%s488_s16] sm:$0xff]  ;;  %vm773_vm2 = vcmask 64512  }
 0x14a   : > { %1743 = vmatprep.mubr.msk.bf16.mxu0 %vm2421_vm1, %v2420_v0  ;;  %1751 = vmatprep.mubr.msk.bf16.mxu1 %vm2421_vm1, %v2420_v0  ;;  %v577_v5 = vld [vmem:[%s2868_s7] sm:$0xf]  ;;  %v644_v7 = vpack.c.bf16 %v643_v6, %v643_v6  ;;  %s2422_s19 = smov 112   ;;  %s2423_s12 = smov 120   ;;  %v1994_v20 = vld [vmem:[#allocation15] sm:$0xff]   ;;  %v1995_v21 = vld [vmem:[#allocation15 + $0x8] sm:$0xff]  }
 0x14b   : > { %1740 = vmatpush3.bf16.msra.mxu0 %v1990_v1  ;;  %1748 = vmatpush3.bf16.msra.mxu1 %v1991_v2  ;;  %s2424_s11 = smov 104   ;;  %v705_v22 = vld [vmem:[%s2880_s23] sm:$0xff]  ;;  %vm639_vm3 = vcmask 31744   ;;  %v2425_v38 = vmov -1e+30   ;;  %v2426_v39 = vmov 0  }
 0x14c   : > { %1741 = vmatprep.subr.bf16.mxu0 %v2420_v0  ;;  %1749 = vmatprep.subr.bf16.mxu1 %v2420_v0  ;;  %v706_v23 = vpack.c.bf16 %v705_v22, %v705_v22  ;;  %640 = vst.msk [vmem:[#allocation3] sm:$0xff] %vm639_vm3, %v2425_v38  ;;  %641 = vst.msk [vmem:[#allocation4] sm:$0xff] %vm639_vm3, %v2420_v0  ;;  %v2427_v53 = vmov 1   ;;  %vm883_vm4 = vcmask 7168   ;;  %v2428_v59 = vmov 2   ;;  %s2430_s28 = smov 8  }
 0x14d   : > { %1977 = vset.pattern.permute.xlu1 %v2426_v39  ;;  %1978 = vset.pattern.permute.xlu0 %v2427_v53  ;;  %vm839_vm5 = vcmask 1043456   ;;  %vm1016_vm6 = vcmask 15368   ;;  %vm1151_vm7 = vcmask 23568   ;;  %vm1286_vm8 = vcmask 31768   ;;  %s2431_s20 = smov 16   ;;  %s2432_s13 = smov 24  }
 0x14e   : > { %vm1035_vm9 = vcmask 130112   ;;  %vm1170_vm10 = vcmask 195712   ;;  %vm1305_vm11 = vcmask 261312   ;;  %s3200_s15 = sld [smem:[#allocation33_spill]]  ;;  %s571_s0 = scalar_lea.vmem [#allocation23], %s1673_s22  ;;  %vm1443_vm12 = vcmask 257024  }
 0x14f   : > { %1742 = vmatpush3.bf16.msra.mxu0 %v1992_v3  ;;  %1750 = vmatpush3.bf16.msra.mxu1 %v1993_v4  ;;  %s1460_s3 = sshll.u32 %s571_s0, 4  ;;  %s3201_s21 = sld [smem:[#allocation44_spill]]  ;;  %s3067_s3 = int_to_ptr.vmem [resolvable:$true] %s1460_s3 }
 0x150   : > { %1755 = vmatprep.subr.bf16.mxu0 %v2420_v0  ;;  %1763 = vmatprep.subr.bf16.mxu1 %v2420_v0  ;;  %s2304_s5 = scalar_lea.vmem %s3067_s3, 64  ;;  %p3202_p0 = scmp.ne.s32.totalorder %s3172_s24, 0 }
 0x151   : > { %p2305_p12 = scmp.ne.s32.totalorder %s3067_s3, %s2304_s5  ;;  %s2433_s22 = smov [#allocation23]  }
 0x152   : > { %1744 = vmatmul.mubr.msk.bf16.vlgmr.msra.gmra.mrb[0].mxu0 %vm594_vm0, %v577_v5  ;;  %1752 = vmatmul.mubr.msk.bf16.vlgmr.msra.gmra.mrb[0].mxu1 %vm594_vm0, %v644_v7  ;;  %s2308_s25 = sshll.u32 %s2433_s22, 4  ;;  %s2309_s25 = int_to_ptr.vmem [resolvable:$false] %s2308_s25 }
 0x153   : > { %1759 = vmatprep.mubr.msk.bf16.mxu0 %vm2421_vm1, %v2420_v0  ;;  %1765 = vmatprep.mubr.msk.bf16.mxu1 %vm2421_vm1, %v2420_v0  ;;  %v2969_v56 = vld [vmem:[#allocation3] sm:$0xff]  ;;  %p2306_p3 = pnand %p2305_p12, %p3202_p0  ;;  %s2310_s29 = scalar_lea.vmem %s2309_s25, 128 }
 0x154   : > { %1756 = vmatpush3.bf16.msra.mxu0 %v1994_v20  ;;  %s1708_s26 = sshll.u32 %s3200_s15, 6  ;;  %p2311_p9 = scmp.lt.s32.totalorder %s3067_s3, %s2309_s25 }
 0x155   : > { %1757 = vmatprep.subr.bf16.mxu0 %v2420_v0  ;;  %s3065_s18 = scalar_lea.hbm %s3201_s21, %s1708_s26  ;;  %p2307_p10 = pneg %p2306_p3 }
 0x156   : > { %p2312_p6 = scmp.lt.s32.totalorder %s2310_s29, %s2304_s5 }
 0x158   : > { %1758 = vmatpush3.bf16.msra.mxu0 %v1995_v21  ;;  %p2313_p5 = por %p2312_p6, %p2311_p9 }
 0x159   : > { %1769 = vmatprep.subr.bf16.mxu0 %v2420_v0 }
 0x15a   : > { %p2314_p13 = pnand %p2313_p5, %p2307_p10 }
 0x15b   : > { %1760 = vmatmul.mubr.msk.bf16.vlgmr.msra.gmra.mrb[4].mxu0 %vm594_vm0, %v706_v23 }
 0x15c   : > { %1771 = vmatprep.mubr.msk.bf16.mxu0 %vm2421_vm1, %v2420_v0 }
 0x225   : > { %v632_v8 = vpop.f32.mrb[0].mxu0  ;;  %v699_v9 = vpop.f32.mrb[0].mxu1 }
 0x226   : > { %638 = vst.msk [vmem:[#allocation2] sm:$0xff] %vm594_vm0, %v632_v8  ;;  %v1745_v10 = vpop.f32.mrb[1].mxu0  ;;  %v771_v11 = vpack.c.bf16 %v699_v9, %v699_v9  ;;  %v1753_v12 = vpop.f32.mrb[1].mxu1  ;;  %v2429_v8 = vmov 3  }
 0x227   : > { %v635_v13 = vpop.f32.mrb[2].mxu0  ;;  %v702_v14 = vpop.f32.mrb[2].mxu1 }
 0x228   : > { %v1746_v15 = vpop.f32.mrb[3].mxu0  ;;  %1039 = vrot.lane.b32.xlu1 %v771_v11, %s2422_s19  ;;  %903 = vrot.lane.b32.xlu0 %v771_v11, %s2423_s12  ;;  %v1754_v16 = vpop.f32.mrb[3].mxu1  ;;  %v778_v17 = vsel %vm773_vm2, %v771_v11, 0 }
 0x229   : > { %1764 = vmatpush3.bf16.xpose.msra.mxu1 %v778_v17 }
 0x22a   : > { %1775 = vmatprep.subr.bf16.mxu1 %v2420_v0 }
 0x22d   : > { %v766_v18 = vld [vmem:[#allocation2] sm:$0xff] }
 0x22e   : > { %v770_v19 = vpack.c.bf16 %v766_v18, %v766_v18  ;;  %v760_v60 = vpop.f32.mrb[4].mxu0 }
 0x22f   : > { %v1761_v61 = vpop.f32.mrb[5].mxu0  ;;  %v772_v1 = vpack.c.bf16 %v760_v60, %v760_v60 }
 0x230   : > { %1037 = vrot.lane.b32.xlu1 %v770_v19, %s2422_s19  ;;  %900 = vrot.lane.b32.xlu0 %v770_v19, %s2423_s12  ;;  %v763_v62 = vpop.f32.mrb[6].mxu0 }
 0x231   : > { %1766 = vmatmul.mubr.msk.bf16.vlgmr.msra.gmra.mrb[4].mxu1 %vm773_vm2, %v770_v19  ;;  %v1762_v63 = vpop.f32.mrb[7].mxu0  ;;  %v841_v2 = vsel %vm839_vm5, %v772_v1, 0 }
 0x232   : > { %1777 = vmatprep.mubr.msk.bf16.mxu1 %vm2421_vm1, %v2420_v0  ;;  %1770 = vmatpush3.bf16.msra.mxu0 %v841_v2  ;;  %v769_v2 = vld [vmem:[#allocation5] sm:$0xff] }
 0x233   : > { %1781 = vmatprep.subr.bf16.mxu0 %v2420_v0 }
 0x234   : > { %1172 = vrot.lane.b32.xlu1 %v770_v19, %s2424_s11  ;;  %1174 = vrot.lane.b32.xlu0 %v771_v11, %s2424_s11 }
 0x29a   : > { %v904_v24 = vpop.permute.xlu0 %903  ;;  %v1040_v26 = vpop.permute.xlu1 %1039 }
 0x29b   : > { %v909_v25 = vsel %vm773_vm2, %v904_v24, 0  ;;  %v1045_v28 = vsel %vm773_vm2, %v1040_v26, 0 }
 0x29c   : > { %1776 = vmatpush3.bf16.xpose.msra.mxu1 %v909_v25 }
 0x29d   : > { %1787 = vmatprep.subr.bf16.mxu1 %v2420_v0 }
 0x2a2   : > { %v901_v27 = vpop.permute.xlu0 %900  ;;  %v1038_v30 = vpop.permute.xlu1 %1037 }
 0x2a3   : > { %1778 = vmatmul.mubr.msk.bf16.vlgmr.msra.gmra.mrb[8].mxu1 %vm773_vm2, %v901_v27 }
 0x2a4   : > { %1788 = vmatpush3.bf16.xpose.msra.mxu1 %v1045_v28  ;;  %1789 = vmatprep.mubr.msk.bf16.mxu1 %vm2421_vm1, %v2420_v0 }
 0x2a5   : > { %1799 = vmatprep.subr.bf16.mxu1 %v2420_v0 }
 0x2a6   : > { %v1175_v29 = vpop.permute.xlu0 %1174  ;;  %v1173_v32 = vpop.permute.xlu1 %1172 }
 0x2a7   : > { %v1180_v31 = vsel %vm773_vm2, %v1175_v29, 0 }
 0x2ab   : > { %1790 = vmatmul.mubr.msk.bf16.vlgmr.msra.gmra.mrb[12].mxu1 %vm773_vm2, %v1038_v30 }
 0x2ac   : > { %1800 = vmatpush3.bf16.xpose.msra.mxu1 %v1180_v31  ;;  %1801 = vmatprep.mubr.msk.bf16.mxu1 %vm2421_vm1, %v2420_v0 }
 0x2ad   : > { %1811 = vmatprep.subr.bf16.mxu1 %v2420_v0 }
 0x2b3   : > { %1802 = vmatmul.mubr.msk.bf16.vlgmr.msra.gmra.mrb[16].mxu1 %vm773_vm2, %v1173_v32 }
 0x2b4   : > { %1815 = vmatprep.mubr.msk.bf16.mxu1 %vm2421_vm1, %v2420_v0 }
 0x304   : > { %v2950_v33 = vpop.f32.mrb[4].mxu1 }
 0x305   : > { %v1767_v34 = vpop.f32.mrb[5].mxu1  ;;  %v820_v35 = vsel %vm773_vm2, %v2950_v33, -inf }
 0x306   : > { %821 = vmax.xlane.f32.xlu0 %v820_v35  ;;  %v817_v36 = vpop.f32.mrb[6].mxu1 }
 0x307   : > { %v1768_v37 = vpop.f32.mrb[7].mxu1 }
 0x376   : > { %v2956_v40 = vpop.f32.mrb[8].mxu1 }
 0x377   : > { %v1779_v41 = vpop.f32.mrb[9].mxu1  ;;  %v951_v42 = vsel %vm773_vm2, %v2956_v40, -inf }
 0x378   : > { %952 = vmax.xlane.f32.xlu1 %v951_v42  ;;  %v948_v43 = vpop.f32.mrb[10].mxu1 }
 0x379   : > { %v1780_v44 = vpop.f32.mrb[11].mxu1 }
 0x37e   : > { %v2960_v45 = vpop.f32.mrb[12].mxu1 }
 0x37f   : > { %v1791_v46 = vpop.f32.mrb[13].mxu1  ;;  %v1087_v47 = vsel %vm773_vm2, %v2960_v45, -inf }
 0x380   : > { %1088 = vmax.xlane.f32.xlu0 %v1087_v47  ;;  %v1084_v48 = vpop.f32.mrb[14].mxu1 }
 0x381   : > { %v1792_v49 = vpop.f32.mrb[15].mxu1 }
 0x386   : > { %v2964_v50 = vpop.f32.mrb[16].mxu1 }
 0x387   : > { %v1803_v51 = vpop.f32.mrb[17].mxu1  ;;  %v1222_v52 = vsel %vm773_vm2, %v2964_v50, -inf }
 0x388   : > { %1223 = vmax.xlane.f32.xlu0 %v1222_v52  ;;  %v1219_v54 = vpop.f32.mrb[18].mxu1 }
 0x389   : > { %v1804_v55 = vpop.f32.mrb[19].mxu1  ;;  %v768_v54 = vld [vmem:[#allocation4] sm:$0xff] }
 0x393   : > { %v822_v57 = vpop.xlane.xlu0 %821 }
 0x394   : > { %v2972_v58 = vmax.f32 %v2969_v56, %v822_v57 }
 0x396   : > { %829 = vperm.xlu1 %1977, %v2972_v58   ;;  %884 = vst.msk [vmem:[#allocation3] sm:$0xff] %vm883_vm4, %v2972_v58  ;;  %v824_v27 = vsub.f32 %v2969_v56, %v2972_v58 }
 0x398   : > { %v825_v32 = vmul.f32 1.442695, %v824_v27  ;;  %v1997_v27 = vld [vmem:[#allocation17 + $0x8] sm:$0xff]  }
 0x39a   : > { %1979 = vset.pattern.permute.xlu1 %v2428_v59 }
 0x405   : > { %v953_v3 = vpop.xlane.xlu1 %952 }
 0x406   : > { %v2981_v4 = vmax.f32 %v2969_v56, %v953_v3 }
 0x408   : > { %1017 = vst.msk [vmem:[#allocation3] sm:$0xff] %vm1016_vm6, %v2981_v4  ;;  %960 = vperm.xlu0 %1978, %v2981_v4   ;;  %v955_v38 = vsub.f32 %v2969_v56, %v2981_v4 }
 0x40a   : > { %v956_v43 = vmul.f32 1.442695, %v955_v38 }
 0x40c   : > { %1981 = vset.pattern.permute.xlu0 %v2426_v39 }
 0x40d   : > { %v1089_v5 = vpop.xlane.xlu0 %1088 }
 0x40e   : > { %v2988_v6 = vmax.f32 %v2969_v56, %v1089_v5 }
 0x410   : > { %1152 = vst.msk [vmem:[#allocation3] sm:$0xff] %vm1151_vm7, %v2988_v6  ;;  %1096 = vperm.xlu1 %1979, %v2988_v6   ;;  %v1091_v44 = vsub.f32 %v2969_v56, %v2988_v6 }
 0x412   : > { %v1092_v47 = vmul.f32 1.442695, %v1091_v44 }
 0x414   : > { %1980 = vset.pattern.permute.xlu1 %v2429_v8 }
 0x415   : > { %v830_v7 = vpop.permute.xlu1 %829  ;;  %v1224_v10 = vpop.xlane.xlu0 %1223 }
 0x416   : > { %v832_v9 = vsub.f32 %v2950_v33, %v830_v7  ;;  %v2996_v11 = vmax.f32 %v2969_v56, %v1224_v10 }
 0x418   : > { %v833_v12 = vmul.f32 1.442695, %v832_v9  ;;  %1287 = vst.msk [vmem:[#allocation3] sm:$0xff] %vm1286_vm8, %v2996_v11  ;;  %1231 = vperm.xlu1 %1980, %v2996_v11   ;;  %v1226_v48 = vsub.f32 %v2969_v56, %v2996_v11 }
 0x41a   : > { %1998 = vpow2.f32 %v833_v12  ;;  %v1227_v49 = vmul.f32 1.442695, %v1226_v48 }
 0x41c   : > { %968 = vrot.lane.b32.xlu1 %v772_v1, %s2423_s12 }
 0x41d   : > { %1982 = vset.pattern.permute.xlu1 %v2427_v53 }
 0x420   : > { %1103 = vrot.lane.b32.xlu1 %v772_v1, %s2422_s19 }
 0x424   : > { %v1999_v13 = vpop.eup %1998  ;;  %1238 = vrot.lane.b32.xlu1 %v772_v1, %s2424_s11 }
 0x425   : > { %v835_v14 = vpack.c.bf16 %v1999_v13, %v1999_v13  ;;  %v886_v15 = vsel %vm773_vm2, %v1999_v13, 0.0 }
 0x427   : > { %1772 = vmatmul.mubr.msk.bf16.vlgmr.msra.gmra.mrb[8].mxu0 %vm773_vm2, %v835_v14 }
 0x428   : > { %1783 = vmatprep.mubr.msk.bf16.mxu0 %vm2421_vm1, %v2420_v0 }
 0x448   : > { %887 = vadd.xlane.f32.xlu1 %v886_v15 }
 0x487   : > { %v961_v16 = vpop.permute.xlu0 %960 }
 0x488   : > { %v963_v17 = vsub.f32 %v2956_v40, %v961_v16 }
 0x48a   : > { %v964_v18 = vmul.f32 1.442695, %v963_v17 }
 0x48c   : > { %2000 = vpow2.f32 %v964_v18 }
 0x48f   : > { %v1097_v19 = vpop.permute.xlu1 %1096 }
 0x490   : > { %v1099_v20 = vsub.f32 %v2960_v45, %v1097_v19 }
 0x492   : > { %v1100_v21 = vmul.f32 1.442695, %v1099_v20 }
 0x494   : > { %2002 = vpow2.f32 %v1100_v21 }
 0x496   : > { %v2001_v22 = vpop.eup %2000 }
 0x497   : > { %v1232_v23 = vpop.permute.xlu1 %1231  ;;  %v1019_v24 = vsel %vm773_vm2, %v2001_v22, 0.0  ;;  %v966_v31 = vpack.c.bf16 %v2001_v22, %v2001_v22 }
 0x498   : > { %v1234_v25 = vsub.f32 %v2964_v50, %v1232_v23  ;;  %1020 = vadd.xlane.f32.xlu0 %v1019_v24 }
 0x49a   : > { %v1235_v26 = vmul.f32 1.442695, %v1234_v25 }
 0x49b   : > { %v969_v28 = vpop.permute.xlu1 %968 }
 0x49c   : > { %2004 = vpow2.f32 %v1235_v26  ;;  %v974_v29 = vsel %vm839_vm5, %v969_v28, 0  ;;  %v1996_v26 = vld [vmem:[#allocation17] sm:$0xff]  }
 0x49d   : > { %1782 = vmatpush3.bf16.msra.mxu0 %v974_v29  ;;  %2006 = vpow2.f32 %v825_v32  ;;  %1812 = vmatpush3.bf16.msra.mxu1 %v1996_v26 }
 0x49e   : > { %v2003_v30 = vpop.eup %2002  ;;  %1793 = vmatprep.subr.bf16.mxu0 %v2420_v0  ;;  %2008 = vpow2.f32 %v956_v43  ;;  %1813 = vmatprep.subr.bf16.mxu1 %v2420_v0 }
 0x49f   : > { %v1104_v33 = vpop.permute.xlu1 %1103  ;;  %v1154_v34 = vsel %vm773_vm2, %v2003_v30, 0.0  ;;  %v1102_v40 = vpack.c.bf16 %v2003_v30, %v2003_v30  ;;  %2010 = vpow2.f32 %v1092_v47 }
 0x4a0   : > { %v1109_v35 = vsel %vm839_vm5, %v1104_v33, 0  ;;  %1155 = vadd.xlane.f32.xlu1 %v1154_v34  ;;  %1784 = vmatmul.mubr.msk.bf16.vlgmr.msra.gmra.mrb[12].mxu0 %vm773_vm2, %v966_v31  ;;  %2012 = vpow2.f32 %v1227_v49 }
 0x4a1   : > { %1794 = vmatpush3.bf16.msra.mxu0 %v1109_v35  ;;  %1795 = vmatprep.mubr.msk.bf16.mxu0 %vm2421_vm1, %v2420_v0 }
 0x4a2   : > { %1805 = vmatprep.subr.bf16.mxu0 %v2420_v0  ;;  %1814 = vmatpush3.bf16.msra.mxu1 %v1997_v27 }
 0x4a3   : > { %v1239_v36 = vpop.permute.xlu1 %1238 }
 0x4a4   : > { %v1244_v42 = vsel %vm839_vm5, %v1239_v36, 0 }
 0x4a6   : > { %v2005_v37 = vpop.eup %2004 }
 0x4a7   : > { %v1289_v41 = vsel %vm773_vm2, %v2005_v37, 0.0  ;;  %v2007_v45 = vpop.eup %2006  ;;  %v1237_v46 = vpack.c.bf16 %v2005_v37, %v2005_v37 }
 0x4a8   : > { %1290 = vadd.xlane.f32.xlu1 %v1289_v41  ;;  %1796 = vmatmul.mubr.msk.bf16.vlgmr.msra.gmra.mrb[16].mxu0 %vm773_vm2, %v1102_v40  ;;  %v2009_v50 = vpop.eup %2008  ;;  %v885_v55 = vmul.f32 %v2007_v45, %v768_v54 }
 0x4a9   : > { %1806 = vmatpush3.bf16.msra.mxu0 %v1244_v42  ;;  %1807 = vmatprep.mubr.msk.bf16.mxu0 %vm2421_vm1, %v2420_v0  ;;  %v2011_v51 = vpop.eup %2010  ;;  %v1018_v62 = vmul.f32 %v2009_v50, %v768_v54 }
 0x4aa   : > { %v2013_v52 = vpop.eup %2012  ;;  %v1153_v3 = vmul.f32 %v2011_v51, %v768_v54 }
 0x4ab   : > { %v1288_v9 = vmul.f32 %v2013_v52, %v768_v54  ;;  %v1701_v54 = vld [vmem:[#allocation18] ss:$0 sm:$0xff] }
 0x4ae   : > { %893 = vperm.xlu0 %1981, %v2007_v45  }
 0x4b0   : > { %1808 = vmatmul.mubr.msk.bf16.vlgmr.msra.gmra.mrb[20].mxu0 %vm773_vm2, %v1237_v46 }
 0x4b2   : > { %1986 = vset.pattern.permute.xlu0 %v2427_v53 }
 0x4b9   : > { %1026 = vperm.xlu1 %1982, %v2009_v50  }
 0x4bd   : > { %1983 = vset.pattern.permute.xlu1 %v2428_v59 }
 0x4be   : > { %1161 = vperm.xlu1 %1983, %v2011_v51  }
 0x4c2   : > { %1984 = vset.pattern.permute.xlu1 %v2429_v8 }
 0x4c3   : > { %1296 = vperm.xlu1 %1984, %v2013_v52   ;;  %v1409_v52 = vld [vmem:[%s2868_s7] sm:$0xf]  ;;  %s1446_s7 = scalar_lea.sflag [#allocation8], %s2862_s10 }
 0x4c7   : > { %1985 = vset.pattern.permute.xlu1 %v2426_v39 }
 0x4d5   : > { %v888_v56 = vpop.xlane.xlu1 %887 }
 0x4d6   : > { %v889_v57 = vadd.f32 %v888_v56, %v885_v55  ;;  %v1410_v55 = vunpack.c.l.bf16 %v1409_v52 }
 0x4d8   : > { %890 = vst.msk [vmem:[#allocation4] sm:$0xff] %vm883_vm4, %v889_v57 }
 0x4fa   : > { %v877_v53 = vpop.f32.mrb[8].mxu0 }
 0x4fb   : > { %v1773_v58 = vpop.f32.mrb[9].mxu0 }
 0x4fc   : > { %v880_v60 = vpop.f32.mrb[10].mxu0 }
 0x4fd   : > { %v1774_v61 = vpop.f32.mrb[11].mxu0 }
 0x525   : > { %v1021_v63 = vpop.xlane.xlu0 %1020 }
 0x526   : > { %v1022_v1 = vadd.f32 %v1021_v63, %v1018_v62 }
 0x528   : > { %1023 = vst.msk [vmem:[#allocation4] sm:$0xff] %vm1016_vm6, %v1022_v1 }
 0x52d   : > { %v894_v4 = vpop.permute.xlu0 %893  ;;  %v1156_v5 = vpop.xlane.xlu1 %1155 }
 0x52e   : > { %v896_v39 = vmul.f32 %v894_v4, %v769_v2  ;;  %v1157_v6 = vadd.f32 %v1156_v5, %v1153_v3 }
 0x530   : > { %v897_v7 = vadd.f32 %v896_v39, %v877_v53  ;;  %1158 = vst.msk [vmem:[#allocation4] sm:$0xff] %vm1151_vm7, %v1157_v6 }
 0x532   : > { %898 = vst.msk [vmem:[#allocation5] sm:$0xff] %vm773_vm2, %v897_v7 }
 0x535   : > { %v1291_v10 = vpop.xlane.xlu1 %1290 }
 0x536   : > { %v1292_v11 = vadd.f32 %v1291_v10, %v1288_v9  ;;  %v1705_v9 = vld [vmem:[#allocation20] ss:$0 sm:$0xff] }
 0x538   : > { %1293 = vst.msk [vmem:[#allocation4] sm:$0xff] %vm1286_vm8, %v1292_v11  ;;  %v1706_v11 = vld [vmem:[#allocation21] ss:$0 sm:$0xff] }
 0x539   : > { %v1027_v28 = vpop.permute.xlu1 %1026 }
 0x53a   : > { %v1029_v31 = vmul.f32 %v1027_v28, %v769_v2 }
 0x53d   : > { %v1162_v29 = vpop.permute.xlu1 %1161 }
 0x53f   : > { %v1310_v12 = vld [vmem:[#allocation4] sm:$0xff] }
 0x540   : > { %2014 = vrcp.f32 %v1310_v12 }
 0x542   : > { %v1297_v30 = vpop.permute.xlu1 %1296 }
 0x543   : > { %v1299_v35 = vmul.f32 %v1297_v30, %v769_v2 }
 0x54a   : > { %v2015_v13 = vpop.eup %2014 }
 0x54b   : > { %1322 = vperm.xlu0 %1986, %v2015_v13  }
 0x54f   : > { %1989 = vset.pattern.permute.xlu0 %v2429_v8 }
 0x573   : > { %v1010_v14 = vpop.f32.mrb[12].mxu0 }
 0x574   : > { %1031 = vrot.lane.b32.xlu1 %v1010_v14, %s2430_s28  ;;  %v1785_v15 = vpop.f32.mrb[13].mxu0 }
 0x575   : > { %v1013_v16 = vpop.f32.mrb[14].mxu0 }
 0x576   : > { %v1786_v17 = vpop.f32.mrb[15].mxu0 }
 0x57b   : > { %v1145_v18 = vpop.f32.mrb[16].mxu0 }
 0x57c   : > { %1166 = vrot.lane.b32.xlu1 %v1145_v18, %s2431_s20  ;;  %v1797_v19 = vpop.f32.mrb[17].mxu0 }
 0x57d   : > { %v1148_v20 = vpop.f32.mrb[18].mxu0 }
 0x57e   : > { %v1798_v21 = vpop.f32.mrb[19].mxu0 }
 0x583   : > { %v1280_v22 = vpop.f32.mrb[20].mxu0 }
 0x584   : > { %1301 = vrot.lane.b32.xlu1 %v1280_v22, %s2432_s13  ;;  %v1809_v23 = vpop.f32.mrb[21].mxu0 }
 0x585   : > { %v1283_v24 = vpop.f32.mrb[22].mxu0 }
 0x586   : > { %v1810_v25 = vpop.f32.mrb[23].mxu0 }
 0x588   : > { %1315 = vperm.xlu1 %1985, %v2015_v13  }
 0x58c   : > { %1987 = vset.pattern.permute.xlu1 %v2428_v59  ;;  %v1164_v59 = vmul.f32 %v1162_v29, %v769_v2 }
 0x58d   : > { %1329 = vperm.xlu1 %1987, %v2015_v13  }
 0x591   : > { %1988 = vset.pattern.permute.xlu1 %v2429_v8 }
 0x592   : > { %1336 = vperm.xlu1 %1988, %v2015_v13  }
 0x5ca   : > { %v1323_v41 = vpop.permute.xlu0 %1322 }
 0x5e6   : > { %v1032_v32 = vpop.permute.xlu1 %1031 }
 0x5e7   : > { %v1034_v33 = vadd.f32 %v1032_v32, %v1029_v31 }
 0x5e9   : > { %1036 = vst.msk [vmem:[#allocation5] sm:$0xff] %vm1035_vm9, %v1034_v33 }
 0x5ee   : > { %v1167_v34 = vpop.permute.xlu1 %1166 }
 0x5ef   : > { %v1169_v8 = vadd.f32 %v1167_v34, %v1164_v59 }
 0x5f1   : > { %1171 = vst.msk [vmem:[#allocation5] sm:$0xff] %vm1170_vm10, %v1169_v8 }
 0x5f6   : > { %v1302_v36 = vpop.permute.xlu1 %1301 }
 0x5f7   : > { %v1304_v0 = vadd.f32 %v1302_v36, %v1299_v35 }
 0x5f9   : > { %1306 = vst.msk [vmem:[#allocation5] sm:$0xff] %vm1305_vm11, %v1304_v0 }
 0x600   : > { %v1312_v37 = vld [vmem:[#allocation5] sm:$0xff] }
 0x607   : > { %v1316_v38 = vpop.permute.xlu1 %1315 }
 0x608   : > { %v1318_v40 = vmul.f32 %v1316_v38, %v1312_v37 }
 0x60a   : > { %1319 = vst.msk [vmem:[#allocation5] sm:$0xff] %vm773_vm2, %v1318_v40 }
 0x60c   : > { %v1330_v45 = vpop.permute.xlu1 %1329 }
 0x611   : > { %v1320_v42 = vld [vmem:[#allocation5] sm:$0xff]  ;;  %v1337_v48 = vpop.permute.xlu1 %1336 }
 0x612   : > { %v1325_v43 = vmul.f32 %v1323_v41, %v1320_v42 }
 0x614   : > { %1326 = vst.msk [vmem:[#allocation5] sm:$0xff] %vm1035_vm9, %v1325_v43 }
 0x61b   : > { %v1327_v44 = vld [vmem:[#allocation5] sm:$0xff] }
 0x61c   : > { %v1332_v46 = vmul.f32 %v1330_v45, %v1327_v44 }
 0x61e   : > { %1333 = vst.msk [vmem:[#allocation5] sm:$0xff] %vm1170_vm10, %v1332_v46 }
 0x625   : > { %v1334_v47 = vld [vmem:[#allocation5] sm:$0xff] }
 0x626   : > { %v1339_v49 = vmul.f32 %v1337_v48, %v1334_v47 }
 0x628   : > { %1340 = vst.msk [vmem:[#allocation5] sm:$0xff] %vm1305_vm11, %v1339_v49 }
 0x62f   : > { %v1341_v50 = vld [vmem:[#allocation5] sm:$0xff] }
 0x630   : > { %v1342_v51 = vpack.c.bf16 %v1341_v50, %v1341_v50 }
 0x632   : > { %1816 = vmatmul.mubr.msk.bf16.vlgmr.msra.gmra.mrb[20].mxu1 %vm594_vm0, %v1342_v51 }
 0x705   : > { %v1403_v56 = vpop.f32.mrb[20].mxu1 }
 0x706   : > { %v1404_v57 = vadd.f32 %v1701_v54, %v1403_v56  ;;  %v1817_v53 = vpop.f32.mrb[21].mxu1 }
 0x707   : > { %v1406_v58 = vpop.f32.mrb[22].mxu1 }
 0x708   : > { %v1818_v60 = vpop.f32.mrb[23].mxu1  ;;  %v1411_v61 = vadd.f32 %v1410_v55, %v1404_v57 }
 0x70a   : > { %v1412_v62 = vsel %vm594_vm0, %v1411_v61, 0.0 }
 0x70b   : > { %1413 = vadd.xlane.f32.xlu0 %v1412_v62 }
 0x798   : > { %v1414_v63 = vpop.xlane.xlu0 %1413 }
 0x799   : > { %v1416_v1 = vmul.f32 0.03125, %v1414_v63 }
 0x79b   : > { %v1417_v2 = vsub.f32 %v1411_v61, %v1416_v1 }
 0x79d   : > { %v1418_v3 = vmul.f32 %v1417_v2, %v1417_v2 }
 0x79f   : > { %v1419_v4 = vsel %vm594_vm0, %v1418_v3, 0.0 }
 0x7a0   : > { %1420 = vadd.xlane.f32.xlu1 %v1419_v4 }
 0x82d   : > { %v1421_v5 = vpop.xlane.xlu1 %1420 }
 0x82e   : > { %v1422_v39 = vmul.f32 0.03125, %v1421_v5 }
 0x830   : > { %v1423_v6 = vadd.f32 1e-05, %v1422_v39 }
 0x832   : > { %2016 = vrsqrt.f32 %v1423_v6 }
 0x83c   : > { %v2017_v7 = vpop.eup %2016 }
 0x83d   : > { %v1425_v10 = vmul.f32 %v2017_v7, %v1417_v2 }
 0x83f   : > { %v1433_v12 = vmul.f32 %v1705_v9, %v1425_v10 }
 0x841   : > { %v1441_v13 = vadd.f32 %v1706_v11, %v1433_v12 }
 0x843   : > { %v1442_v14 = vpack.c.bf16 %v1441_v13, %v1441_v13 }
 0x845   : > { %1444 = vst.msk [vmem:[%s571_s0] sm:$0xf] %vm1443_vm12, %v1442_v14 }
 0x846   : > { %2317 = shalt.err (!%p2314_p13)
}
 0x847   : > { %s2318_s10 = scalar_lea.hbm %s3065_s18, 64  ;;  %s2322_s19 = scalar_lea.hbm %s3201_s21, 128 }
 0x848   : > { %p2319_p4 = scmp.ne.s32.totalorder %s3065_s18, %s2318_s10  ;;  %p2323_p8 = scmp.lt.u32.totalorder %s3065_s18, %s3201_s21 }
 0x849   : > { %p2324_p11 = scmp.lt.u32.totalorder %s2322_s19, %s2318_s10  ;;  %p2326_p12 = scmp.lt.u32.totalorder %s2318_s10, %s3065_s18 }
 0x84a   : > { %p2320_p7 = pnand %p2319_p4, %p3202_p0 }
 0x84b   : > { %p2325_p1 = por %p2324_p11, %p2323_p8 }
 0x84c   : > { %p2321_p2 = pneg %p2320_p7 }
 0x84d   : > { %p2327_p3 = por %p2326_p12, %p2325_p1 }
 0x84f   : > { %p2328_p10 = pnand %p2327_p3, %p2321_p2 }
 0x851   : > { %2331 = shalt.err (!%p2328_p10)
}
 0x852   : > { %1853 = dma.vmem_to_hbm [thread:$0]  (%p3202_p0), %s3067_s3, 64, %s3065_s18, %s1446_s7  }
 0x853 PF: > { %s3203_s28 = sld [smem:[#allocation31_spill]]  ;;  %s3204_s20 = sld [smem:[#allocation38_spill]] }
 0x854   : > { %s3205_s13 = sld [smem:[#allocation34_spill]] }
 0x859   : > { %s1472_s15 = sand.u32 1, %s3203_s28   ;;  %p3206_p9 = scmp.ne.s32.totalorder %s3204_s20, 0 }
 0x85a   : > { %p3207_p6 = scmp.ge.s32.totalorder %s3205_s13, 2  ;;  %s1473_s26 = scalar_lea.sflag [#allocation8], %s1472_s15 }
 0x85c   : > { %p1888_p5 = pnand %p3207_p6, %p3206_p9 }
 0x85e   : > { %2381 = dma.done.wait (!%p1888_p5), %s1473_s26, 64  }
 0x85f   : > { %2383 = vsyncadd (!%p1888_p5), %s1473_s26, 4294967232  ;;  %s33_s18 = sadd.s32 1, %s3205_s13   ;;  %s3208_s0 = sld [smem:[#allocation32_spill]] }
 0x860   : > { %p30_p13 = scmp.ge.s32.totalorder %s33_s18, 4   ;;  %s3209_s15 = sld [smem:[#allocation37_spill]] }
 0x861   : > { %s3210_s24 = sld [smem:[#allocation36_spill]]  ;;  %s3211_s13 = smov %s2390_s14 }
 0x862   : > { %s3213_s16 = smov %s2402_s17  ;;  %32 = sbr.rel (!%p30_p13) target bundleno = 19 (0x13), region = 165 }
 0x865   : > { %s3212_s14 = smov %s3208_s0 }
 0x867   : > { %s3214_s17 = smov %s3210_s24 }
 0x869   :  { %1478 = vsyncpa [#allocation7], 1 }
 0x86a   :  { %1480 = vsyncpa [#allocation7 + $0x1], 1 }
 0x86b   :  { %1481 = vsyncpa [#allocation10], 1 }
 0x86c   :  { %1483 = vsyncpa [#allocation10 + $0x1], 1 }
 0x86d   :  { %1484 = vsyncpa [#allocation13], 1 }
 0x86e   :  { %1485 = vsyncpa [#allocation16], 1 }
 0x86f   :  { %1486 = vsyncpa [#allocation19], 1 }
 0x870   :  { %1487 = vsyncpa [#allocation22], 1 }
 0x871   :  { %1488 = vsyncpa [#allocation8], 1 }
 0x872   :  { %1490 = vsyncpa [#allocation8 + $0x1], 1 }

// kernel: decoder_block_forward.3
= control target key start
LH: loop header
LB: loop body
LE: loop exit
PB: predicated region body
PF: predicated region fallthrough
CT: control target
= control target key end

     0   :  { %s3119_s0 = inlined_call_operand.hbm [shape: f32[2,8,32], index: 0, kind: input, shape index: {}, may-alias: {0,1,2}]   ;;  %s3120_s1 = inlined_call_operand.hbm [shape: f32[2,8,32], index: 1, kind: input, shape index: {}, may-alias: {0,1,2}]   ;;  %s3121_s2 = inlined_call_operand.hbm [shape: f32[2,8,32], index: 2, kind: input, shape index: {}, may-alias: {0,1,2}]   ;;  %s3122_s3 = inlined_call_operand.hbm [shape: bf16[32,32], index: 3, kind: input, shape index: {}]   ;;  %s3123_s4 = inlined_call_operand.hbm [shape: bf16[32,32], index: 4, kind: input, shape index: {}]   ;;  %s3124_s5 = inlined_call_operand.hbm [shape: bf16[32,32], index: 5, kind: input, shape index: {}]   ;;  %s3125_s6 = inlined_call_operand.hbm [shape: bf16[32,32], index: 6, kind: input, shape index: {}]   ;;  %s3126_s7 = inlined_call_operand.hbm [shape: f32[1,32], index: 7, kind: input, shape index: {}]   ;;  %s3127_s8 = inlined_call_operand.hbm [shape: f32[1,32], index: 8, kind: input, shape index: {}]   ;;  %s3128_s9 = inlined_call_operand.hbm [shape: f32[1,32], index: 9, kind: input, shape index: {}]   ;;  %s3129_s10 = inlined_call_operand.hbm [shape: bf16[2,8,32], index: 10, kind: output, shape index: {}]  }
   0x1   :  { %3158 = sst [smem:[#allocation40_spill]] %s3120_s1 }
   0x2   :  { %3159 = sst [smem:[#allocation41_spill]] %s3121_s2 }
   0x3   :  { %3160 = sst [smem:[#allocation42_spill]] %s3122_s3 }
   0x4   :  { %3161 = sst [smem:[#allocation43_spill]] %s3124_s5 }
   0x5   :  { %3162 = sst [smem:[#allocation44_spill]] %s3126_s7 }
   0x6   :  { %3163 = sst [smem:[#allocation45_spill]] %s3129_s10 }
   0x7   :  { %15 = vsyncpa [#allocation7], 0 }
   0x8   :  { %17 = vsyncpa [#allocation7 + $0x1], 0 }
   0x9   :  { %18 = vsyncpa [#allocation10], 0 }
   0xa   :  { %20 = vsyncpa [#allocation10 + $0x1], 0 }
   0xb   :  { %21 = vsyncpa [#allocation13], 0 }
   0xc   :  { %22 = vsyncpa [#allocation16], 0 }
   0xd   :  { %23 = vsyncpa [#allocation19], 0 }
   0xe   :  { %24 = vsyncpa [#allocation22], 0 }
   0xf   :  { %25 = vsyncpa [#allocation8], 0 }
  0x10   :  { %27 = vsyncpa [#allocation8 + $0x1], 0  ;;  %s2504_s13 = smov 0   ;;  %s2506_s14 = smov 0  }
  0x11   :  { %s2508_s15 = smov 0   ;;  %s2510_s16 = smov 0  }
  0x12   :  { %s2512_s17 = smov 0   ;;  %s2514_s18 = smov 0  }
  0x13 LB: > { %3164 = sst [smem:[#allocation31_spill]] %s2401_s13  ;;  %s2535_s19 = sadd.s32 4294967295, %s2421_s18   ;;  %s2421_s18 = sphi %s2514_s18, %s33_s18   ;;  %s2417_s17 = sphi %s2512_s17, %s3218_s17   ;;  %s2413_s16 = sphi %s2510_s16, %s3217_s16   ;;  %s2409_s15 = sphi %s2508_s15, %s3221_s15   ;;  %s2405_s14 = sphi %s2506_s14, %s3220_s14   ;;  %s2401_s13 = sphi %s2504_s13, %s3219_s13  }
  0x14   : > { %3165 = sst [smem:[#allocation32_spill]] %s2413_s16  ;;  %p1672_p0 = scmp.ge.s32.totalorder %s2421_s18, 1 }
  0x15   : > { %3166 = sst [smem:[#allocation33_spill]] %s2417_s17  ;;  %p3133_p1 = scmp.eq.s32.totalorder %s2535_s19, 0 }
  0x16   : > { %3167 = sst [smem:[#allocation34_spill]] %s2421_s18  ;;  %p316_p2 = scmp.lt.s32.totalorder %s2421_s18, 3 }
  0x17   : > { %s2423_s21 = smov [#allocation12]   ;;  %s2424_s24 = smov [#allocation15]  }
  0x18   : > { %p2540_p3 = pnand %p1672_p0, %p316_p2  ;;  %s328_s22 = sshll.u32 %s2423_s21, 4  ;;  %s2544_s22 = int_to_ptr.vmem [resolvable:$true] %s328_s22 }
  0x19   : > { %s354_s25 = sshll.u32 %s2424_s24, 4  ;;  %s2425_s26 = smov [#allocation18]   ;;  %s2555_s25 = int_to_ptr.vmem [resolvable:$true] %s354_s25 }
  0x1a   : > { %s3168_s20 = scalar_select %p2540_p3, 1, 0 }
  0x1b   : > { %p1870_p4 = pneg %p2540_p3  ;;  %s2557_s27 = sshll.u32 %s2425_s26, 4  ;;  %s382_s27 = int_to_ptr.vmem [resolvable:$true] %s2557_s27 }
  0x1c   : > { %3169 = sst [smem:[#allocation35_spill]] %s3168_s20  ;;  %s3171_s3 = sld [smem:[#allocation42_spill]] }
  0x1d   : > { %p2551_p6 = pnand %p1870_p4, %p3133_p1 }
  0x1f   : > { %s3170_s23 = scalar_select %p2551_p6, 1, 0 }
  0x20   : > { %p2567_p8 = pneg %p2551_p6 }
  0x22   : > { %s2033_s30 = scalar_lea.hbm %s3171_s3, 256 }
  0x23   : > { %p2034_p7 = scmp.ne.s32.totalorder %s3171_s3, %s2033_s30  ;;  %p2040_p11 = scmp.lt.u32.totalorder %s2033_s30, %s3171_s3 }
  0x24   : > { %s3172_s21 = scalar_select %p2567_p8, 1, 0 }
  0x25   : > { %p2036_p9 = pnand %p2567_p8, %p2034_p7 }
  0x27   : > { %p2037_p10 = pneg %p2036_p9 }
  0x29   : > { %p2042_p12 = pnand %p2040_p11, %p2037_p10 }
  0x2b   : > { %2045 = shalt.err (!%p2042_p12)
}
  0x2c   : > { %s2046_s28 = scalar_lea.vmem %s2544_s22, 256  ;;  %p2054_p4 = scmp.lt.s32.totalorder %s2544_s22, %s2544_s22 }
  0x2d   : > { %p2047_p13 = scmp.ne.s32.totalorder %s2544_s22, %s2046_s28  ;;  %p2055_p5 = scmp.lt.s32.totalorder %s2046_s28, %s2046_s28 }
  0x2f   : > { %p2049_p0 = pnand %p2047_p13, %p2567_p8  ;;  %p2056_p7 = por %p2055_p5, %p2054_p4 }
  0x31   : > { %p2050_p2 = pneg %p2049_p0 }
  0x33   : > { %p2057_p9 = pnand %p2056_p7, %p2050_p2 }
  0x35   : > { %2060 = shalt.err (!%p2057_p9)
}
  0x36   : > { %s3135_s29 = smov 64   ;;  %s3137_s30 = smov 4  }
  0x37   : > { %1873 = dma.hbm_to_vmem [thread:$0]  (!%p2551_p6), %s3171_s3, 256, %s2544_s22, [#allocation13], %s3135_s29, %s3135_s29, %s3137_s30  }
  0x38   : > { %s3173_s5 = sld [smem:[#allocation43_spill]] }
  0x3e   : > { %s2061_s28 = scalar_lea.hbm %s3173_s5, 256 }
  0x3f   : > { %p2062_p5 = scmp.ne.s32.totalorder %s3173_s5, %s2061_s28  ;;  %p2068_p12 = scmp.lt.u32.totalorder %s2061_s28, %s3173_s5 }
  0x41   : > { %p2064_p10 = pnand %p2062_p5, %p2567_p8 }
  0x43   : > { %p2065_p11 = pneg %p2064_p10 }
  0x45   : > { %p2070_p13 = pnand %p2068_p12, %p2065_p11 }
  0x47   : > { %2073 = shalt.err (!%p2070_p13)
}
  0x48   : > { %s2074_s22 = scalar_lea.vmem %s2555_s25, 256  ;;  %p2082_p7 = scmp.lt.s32.totalorder %s2555_s25, %s2555_s25 }
  0x49   : > { %p2075_p0 = scmp.ne.s32.totalorder %s2555_s25, %s2074_s22  ;;  %p2083_p9 = scmp.lt.s32.totalorder %s2074_s22, %s2074_s22 }
  0x4b   : > { %p2077_p2 = pnand %p2075_p0, %p2567_p8  ;;  %p2084_p5 = por %p2083_p9, %p2082_p7 }
  0x4d   : > { %p2078_p4 = pneg %p2077_p2 }
  0x4f   : > { %p2085_p10 = pnand %p2084_p5, %p2078_p4 }
  0x51   : > { %2088 = shalt.err (!%p2085_p10)
}
  0x52   : > { %1879 = dma.hbm_to_vmem [thread:$0]  (!%p2551_p6), %s3173_s5, 256, %s2555_s25, [#allocation16], %s3135_s29, %s3135_s29, %s3137_s30  }
  0x53   : > { %s3174_s7 = sld [smem:[#allocation44_spill]] }
  0x59   : > { %s2089_s11 = scalar_lea.hbm %s3174_s7, 16 }
  0x5a   : > { %p2090_p11 = scmp.ne.s32.totalorder %s3174_s7, %s2089_s11  ;;  %p2096_p0 = scmp.lt.u32.totalorder %s2089_s11, %s3174_s7 }
  0x5c   : > { %p2092_p12 = pnand %p2090_p11, %p2567_p8 }
  0x5e   : > { %p2093_p13 = pneg %p2092_p12 }
  0x60   : > { %p2098_p2 = pnand %p2096_p0, %p2093_p13 }
  0x62   : > { %2101 = shalt.err (!%p2098_p2)
}
  0x63   : > { %s2102_s22 = scalar_lea.vmem %s382_s27, 16  ;;  %s2109_s25 = scalar_lea.vmem %s382_s27, 32 }
  0x64   : > { %p2103_p4 = scmp.ne.s32.totalorder %s382_s27, %s2102_s22  ;;  %p2110_p5 = scmp.lt.s32.totalorder %s382_s27, %s382_s27 }
  0x65   : > { %p2111_p10 = scmp.lt.s32.totalorder %s2109_s25, %s2102_s22 }
  0x66   : > { %p2105_p7 = pnand %p2103_p4, %p2567_p8 }
  0x67   : > { %p2112_p1 = por %p2111_p10, %p2110_p5 }
  0x68   : > { %p2106_p9 = pneg %p2105_p7 }
  0x6a   : > { %p2113_p3 = pnand %p2112_p1, %p2106_p9 }
  0x6c   : > { %2116 = shalt.err (!%p2113_p3)
}
  0x6d   : > { %1885 = dma.hbm_to_vmem [thread:$0]  (!%p2551_p6), %s3174_s7, 16, %s382_s27, [#allocation19]  }
  0x6e   : > { %s1671_s16 = sadd.s32 4294967294, %s2421_s18   ;;  %s52_s20 = sadd.s32 1, %s2417_s17 }
  0x6f   : > { %s61_s11 = sadd.s32 1, %s2409_s15  ;;  %p54_p1 = scmp.ge.s32.totalorder %s52_s20, 2 }
  0x70   : > { %p68_p3 = scmp.ne.s32.totalorder %s2409_s15, %s2405_s14  ;;  %p69_p11 = scmp.eq.s32.totalorder %s2421_s18, 0 }
  0x71   : > { %p74_p12 = scmp.ne.s32.totalorder %s2405_s14, %s2401_s13  ;;  %s3223_s20 = smov (%p54_p1, %s52_s20), 0 }
  0x72   : > { %3175 = sst [smem:[#allocation36_spill]] %s3223_s20  ;;  %p2646_p13 = por %p69_p11, %p68_p3 }
  0x73   : > { %p3177_p0 = scmp.eq.s32.totalorder %s2535_s19, 0  ;;  %s56_s24 = ssub.s32 %s2417_s17, %s3223_s20 }
  0x74   : > { %p303_p4 = scmp.eq.s32.totalorder %s2535_s19, 1  ;;  %p59_p7 = scmp.eq.s32.totalorder %s56_s24, 0 }
  0x75   : > { %p2652_p2 = por %p3177_p0, %p74_p12  ;;  %p309_p9 = scmp.eq.s32.totalorder %s1671_s16, 1 }
  0x76   : > { %p2659_p5 = por %p303_p4, %p68_p3  ;;  %p1913_p10 = scmp.lt.s32.totalorder %s2421_s18, 2 }
  0x77   : > { %s3178_s27 = scalar_select %p2652_p2, 1, 0 }
  0x78   : > { %s3179_s26 = scalar_select %p2659_p5, 1, 0 }
  0x79   : > { %s2665_s28 = scalar_select %p59_p7, %s2409_s15, %s61_s11  }
  0x7a   : > { %3180 = sst [smem:[#allocation37_spill]] %s3179_s26  ;;  %p2667_p1 = por %p309_p9, %p74_p12 }
  0x7b   : > { %3181 = sst [smem:[#allocation38_spill]] %s2665_s28  ;;  %s3139_s25 = sand.u32 1, %s2409_s15  }
  0x7c   : > { %s3182_s22 = scalar_select %p2667_p1, 1, 0 }
  0x7d   : > { %s2674_s2 = sshll.u32 %s3139_s25, 3  ;;  %s2677_s10 = sshll.u32 %s2417_s17, 7 }
  0x7e   : > { %3183 = sst [smem:[#allocation39_spill]] %s3182_s22  ;;  %p2681_p3 = pnand %p1913_p10, %p2646_p13 }
  0x7f   : > { %s433_s11 = sand.u32 1, %s2421_s18   ;;  %s3185_s1 = sld [smem:[#allocation40_spill]] }
  0x80   : > { %s3184_s16 = scalar_select %p2681_p3, 1, 0 }
  0x81   : > { %s437_s25 = scalar_lea.vmem [#allocation9], %s2674_s2  ;;  %s2428_s12 = smov [#allocation14]  }
  0x82   : > { %s445_s3 = sshll.u32 %s437_s25, 4  ;;  %s2695_s5 = sshll.u32 %s2428_s12, 4  ;;  %s2693_s3 = int_to_ptr.vmem [resolvable:$true] %s445_s3  ;;  %s342_s5 = int_to_ptr.vmem [resolvable:$true] %s2695_s5 }
  0x83   : > { %s2697_s7 = scalar_lea.sflag [#allocation10], %s433_s11  ;;  %p2703_p12 = pneg %p2681_p3 }
  0x85   : > { %s2690_s30 = scalar_lea.hbm %s3185_s1, %s2677_s10  ;;  %s2122_s17 = scalar_lea.hbm %s3185_s1, 256 }
  0x86   : > { %s2117_s20 = scalar_lea.hbm %s2690_s30, 128  ;;  %p2123_p4 = scmp.lt.u32.totalorder %s2690_s30, %s3185_s1 }
  0x87   : > { %p2118_p11 = scmp.ne.s32.totalorder %s2690_s30, %s2117_s20  ;;  %p2124_p7 = scmp.lt.u32.totalorder %s2122_s17, %s2117_s20 }
  0x88   : > { %s3186_s29 = scalar_select %p2703_p12, 1, 0 }
  0x89   : > { %p2120_p13 = pnand %p2703_p12, %p2118_p11  ;;  %p2125_p9 = por %p2124_p7, %p2123_p4 }
  0x8a   : > { %p2126_p10 = scmp.lt.u32.totalorder %s2117_s20, %s2690_s30 }
  0x8b   : > { %p2121_p0 = pneg %p2120_p13 }
  0x8c   : > { %p2127_p1 = por %p2126_p10, %p2125_p9 }
  0x8e   : > { %p2128_p5 = pnand %p2127_p1, %p2121_p0 }
  0x90   : > { %2131 = shalt.err (!%p2128_p5)
}
  0x91   : > { %s2132_s11 = scalar_lea.vmem %s2693_s3, 128  ;;  %s2429_s24 = smov [#allocation9]  }
  0x92   : > { %p2133_p11 = scmp.ne.s32.totalorder %s2693_s3, %s2132_s11  ;;  %s2137_s25 = sshll.u32 %s2429_s24, 4  ;;  %s2138_s25 = int_to_ptr.vmem [resolvable:$false] %s2137_s25 }
  0x93   : > { %s2139_s28 = scalar_lea.vmem %s2138_s25, 256  ;;  %p2140_p6 = scmp.lt.s32.totalorder %s2693_s3, %s2138_s25 }
  0x94   : > { %p2135_p13 = pnand %p2133_p11, %p2703_p12  ;;  %p2141_p8 = scmp.lt.s32.totalorder %s2139_s28, %s2132_s11 }
  0x96   : > { %p2136_p2 = pneg %p2135_p13  ;;  %p2142_p4 = por %p2141_p8, %p2140_p6 }
  0x98   : > { %p2143_p7 = pnand %p2142_p4, %p2136_p2 }
  0x9a   : > { %2146 = shalt.err (!%p2143_p7)
}
  0x9b   : > { %1898 = dma.hbm_to_vmem [thread:$0]  (!%p2681_p3), %s2690_s30, 128, %s2693_s3, %s2697_s7  }
  0x9c   : > { %s2147_s12 = scalar_lea.hbm %s3123_s4, 256  ;;  %p3187_p6 = scmp.ne.s32.totalorder %s3172_s21, 0 }
  0x9d   : > { %p2148_p5 = scmp.ne.s32.totalorder %s3123_s4, %s2147_s12  ;;  %p2154_p1 = scmp.lt.u32.totalorder %s2147_s12, %s3123_s4 }
  0x9f   : > { %p2150_p8 = pnand %p2148_p5, %p3187_p6 }
  0xa1   : > { %p2151_p2 = pneg %p2150_p8 }
  0xa3   : > { %p2156_p0 = pnand %p2154_p1, %p2151_p2 }
  0xa5   : > { %2159 = shalt.err (!%p2156_p0)
}
  0xa6   : > { %s2160_s28 = scalar_lea.vmem %s342_s5, 256  ;;  %p2168_p13 = scmp.lt.s32.totalorder %s342_s5, %s342_s5 }
  0xa7   : > { %p2161_p9 = scmp.ne.s32.totalorder %s342_s5, %s2160_s28  ;;  %p2169_p4 = scmp.lt.s32.totalorder %s2160_s28, %s2160_s28 }
  0xa9   : > { %p2163_p10 = pnand %p2161_p9, %p3187_p6  ;;  %p2170_p7 = por %p2169_p4, %p2168_p13 }
  0xab   : > { %p2164_p11 = pneg %p2163_p10 }
  0xad   : > { %p2171_p3 = pnand %p2170_p7, %p2164_p11 }
  0xaf   : > { %2174 = shalt.err (!%p2171_p3)
}
  0xb0   : > { %p3188_p5 = scmp.ne.s32.totalorder %s3170_s23, 0  ;;  %s3189_s1 = smov 4  }
  0xb1   : > { %s3190_s3 = smov 64   ;;  %s2430_s20 = smov [#allocation17]  }
  0xb2   : > { %1876 = dma.hbm_to_vmem [thread:$0]  (!%p3188_p5), %s3123_s4, 256, %s342_s5, [#allocation13], %s3190_s3, %s3190_s3, %s3189_s1  }
  0xb3   : > { %s367_s12 = sshll.u32 %s2430_s20, 4  ;;  %s2431_s24 = smov [#allocation20]   ;;  %s368_s12 = int_to_ptr.vmem [resolvable:$true] %s367_s12 }
  0xb4   : > { %s392_s11 = sshll.u32 %s2431_s24, 4  ;;  %s2175_s18 = scalar_lea.hbm %s3125_s6, 256  ;;  %s393_s11 = int_to_ptr.vmem [resolvable:$true] %s392_s11 }
  0xb5   : > { %p2176_p3 = scmp.ne.s32.totalorder %s3125_s6, %s2175_s18  ;;  %p2182_p1 = scmp.lt.u32.totalorder %s2175_s18, %s3125_s6 }
  0xb7   : > { %p2178_p8 = pnand %p2176_p3, %p3187_p6 }
  0xb9   : > { %p2179_p2 = pneg %p2178_p8 }
  0xbb   : > { %p2184_p0 = pnand %p2182_p1, %p2179_p2 }
  0xbd   : > { %2187 = shalt.err (!%p2184_p0)
}
  0xbe   : > { %s2188_s5 = scalar_lea.vmem %s368_s12, 256  ;;  %p2196_p13 = scmp.lt.s32.totalorder %s368_s12, %s368_s12 }
  0xbf   : > { %p2189_p9 = scmp.ne.s32.totalorder %s368_s12, %s2188_s5  ;;  %p2197_p4 = scmp.lt.s32.totalorder %s2188_s5, %s2188_s5 }
  0xc1   : > { %p2191_p10 = pnand %p2189_p9, %p3187_p6  ;;  %p2198_p7 = por %p2197_p4, %p2196_p13 }
  0xc3   : > { %p2192_p11 = pneg %p2191_p10 }
  0xc5   : > { %p2199_p12 = pnand %p2198_p7, %p2192_p11 }
  0xc7   : > { %2202 = shalt.err (!%p2199_p12)
}
  0xc8   : > { %1882 = dma.hbm_to_vmem [thread:$0]  (!%p3188_p5), %s3125_s6, 256, %s368_s12, [#allocation16], %s3190_s3, %s3190_s3, %s3189_s1  }
  0xc9   : > { %s2203_s17 = scalar_lea.hbm %s3127_s8, 16 }
  0xca   : > { %p2204_p3 = scmp.ne.s32.totalorder %s3127_s8, %s2203_s17  ;;  %p2210_p2 = scmp.lt.u32.totalorder %s2203_s17, %s3127_s8 }
  0xcc   : > { %p2206_p12 = pnand %p2204_p3, %p3187_p6 }
  0xce   : > { %p2207_p8 = pneg %p2206_p12 }
  0xd0   : > { %p2212_p1 = pnand %p2210_p2, %p2207_p8 }
  0xd2   : > { %2215 = shalt.err (!%p2212_p1)
}
  0xd3   : > { %s2216_s30 = scalar_lea.vmem %s393_s11, 16  ;;  %s2223_s1 = scalar_lea.vmem %s393_s11, 32 }
  0xd4   : > { %p2217_p0 = scmp.ne.s32.totalorder %s393_s11, %s2216_s30  ;;  %p2224_p11 = scmp.lt.s32.totalorder %s393_s11, %s393_s11 }
  0xd5   : > { %p2225_p13 = scmp.lt.s32.totalorder %s2223_s1, %s2216_s30 }
  0xd6   : > { %p2219_p9 = pnand %p2217_p0, %p3187_p6 }
  0xd7   : > { %p2226_p4 = por %p2225_p13, %p2224_p11 }
  0xd8   : > { %p2220_p10 = pneg %p2219_p9 }
  0xda   : > { %p2227_p7 = pnand %p2226_p4, %p2220_p10 }
  0xdc   : > { %2230 = shalt.err (!%p2227_p7)
}
  0xdd   : > { %1888 = dma.hbm_to_vmem [thread:$0]  (!%p3188_p5), %s3127_s8, 16, %s393_s11, [#allocation19]  }
  0xde   : > { %s2432_s5 = smov [#allocation21]   ;;  %s2231_s22 = scalar_lea.hbm %s3128_s9, 16 }
  0xdf   : > { %s403_s13 = sshll.u32 %s2432_s5, 4  ;;  %p2232_p3 = scmp.ne.s32.totalorder %s3128_s9, %s2231_s22  ;;  %s404_s13 = int_to_ptr.vmem [resolvable:$true] %s403_s13 }
  0xe0   : > { %p2238_p2 = scmp.lt.u32.totalorder %s2231_s22, %s3128_s9 }
  0xe1   : > { %p2234_p12 = pnand %p2232_p3, %p3187_p6 }
  0xe3   : > { %p2235_p8 = pneg %p2234_p12 }
  0xe5   : > { %p2240_p1 = pnand %p2238_p2, %p2235_p8 }
  0xe7   : > { %2243 = shalt.err (!%p2240_p1)
}
  0xe8   : > { %s2244_s11 = scalar_lea.vmem %s404_s13, 16  ;;  %s2251_s28 = scalar_lea.vmem %s404_s13, 32 }
  0xe9   : > { %p2245_p0 = scmp.ne.s32.totalorder %s404_s13, %s2244_s11  ;;  %p2252_p11 = scmp.lt.s32.totalorder %s404_s13, %s404_s13 }
  0xea   : > { %p2253_p13 = scmp.lt.s32.totalorder %s2251_s28, %s2244_s11 }
  0xeb   : > { %p2247_p9 = pnand %p2245_p0, %p3187_p6 }
  0xec   : > { %p2254_p4 = por %p2253_p13, %p2252_p11 }
  0xed   : > { %p2248_p10 = pneg %p2247_p9 }
  0xef   : > { %p2255_p7 = pnand %p2254_p4, %p2248_p10 }
  0xf1   : > { %2258 = shalt.err (!%p2255_p7)
}
  0xf2   : > { %1891 = dma.hbm_to_vmem [thread:$0]  (!%p3188_p5), %s3128_s9, 16, %s404_s13, [#allocation22]  }
  0xf3   : > { %s2810_s12 = scalar_lea.hbm %s3119_s0, %s2677_s10  ;;  %s418_s5 = scalar_lea.vmem [#allocation6], %s2674_s2 }
  0xf4   : > { %s426_s18 = sshll.u32 %s418_s5, 4  ;;  %s3191_s23 = sand.u32 1, %s2409_s15   ;;  %s427_s18 = int_to_ptr.vmem [resolvable:$true] %s426_s18 }
  0xf5   : > { %s415_s26 = scalar_lea.sflag [#allocation7], %s3191_s23  ;;  %s2259_s22 = scalar_lea.hbm %s2810_s12, 128 }
  0xf6   : > { %p2260_p6 = scmp.ne.s32.totalorder %s2810_s12, %s2259_s22  ;;  %p3192_p3 = scmp.ne.s32.totalorder %s3186_s29, 0 }
  0xf7   : > { %s2264_s20 = scalar_lea.hbm %s3119_s0, 256  ;;  %p2265_p5 = scmp.lt.u32.totalorder %s2810_s12, %s3119_s0 }
  0xf8   : > { %p2262_p12 = pnand %p2260_p6, %p3192_p3  ;;  %p2266_p2 = scmp.lt.u32.totalorder %s2264_s20, %s2259_s22 }
  0xf9   : > { %p2268_p0 = scmp.lt.u32.totalorder %s2259_s22, %s2810_s12 }
  0xfa   : > { %p2263_p8 = pneg %p2262_p12  ;;  %p2267_p1 = por %p2266_p2, %p2265_p5 }
  0xfc   : > { %p2269_p9 = por %p2268_p0, %p2267_p1 }
  0xfe   : > { %p2270_p10 = pnand %p2269_p9, %p2263_p8 }
 0x100   : > { %2273 = shalt.err (!%p2270_p10)
}
 0x101   : > { %s2274_s11 = scalar_lea.vmem %s427_s18, 128  ;;  %s2433_s28 = smov [#allocation6]  }
 0x102   : > { %p2275_p11 = scmp.ne.s32.totalorder %s427_s18, %s2274_s11  ;;  %s2279_s30 = sshll.u32 %s2433_s28, 4  ;;  %s2280_s30 = int_to_ptr.vmem [resolvable:$false] %s2279_s30 }
 0x103   : > { %s2281_s1 = scalar_lea.vmem %s2280_s30, 256  ;;  %p2282_p7 = scmp.lt.s32.totalorder %s427_s18, %s2280_s30 }
 0x104   : > { %p2277_p13 = pnand %p2275_p11, %p3192_p3  ;;  %p2283_p6 = scmp.lt.s32.totalorder %s2281_s1, %s2274_s11 }
 0x106   : > { %p2278_p4 = pneg %p2277_p13  ;;  %p2284_p12 = por %p2283_p6, %p2282_p7 }
 0x108   : > { %p2285_p2 = pnand %p2284_p12, %p2278_p4 }
 0x10a   : > { %2288 = shalt.err (!%p2285_p2)
}
 0x10b   : > { %p3193_p5 = scmp.ne.s32.totalorder %s3184_s16, 0  ;;  %s3194_s5 = sld [smem:[#allocation41_spill]] }
 0x10c   : > { %s456_s22 = scalar_lea.vmem [#allocation11], %s2674_s2 }
 0x10d   : > { %1895 = dma.hbm_to_vmem [thread:$0]  (!%p3193_p5), %s2810_s12, 128, %s427_s18, %s415_s26  }
 0x10e   : > { %s464_s13 = sshll.u32 %s456_s22, 4  ;;  %s465_s13 = int_to_ptr.vmem [resolvable:$true] %s464_s13 }
 0x111   : > { %s2836_s23 = scalar_lea.hbm %s3194_s5, %s2677_s10  ;;  %s2294_s12 = scalar_lea.hbm %s3194_s5, 256 }
 0x112   : > { %s2289_s17 = scalar_lea.hbm %s2836_s23, 128  ;;  %p2295_p9 = scmp.lt.u32.totalorder %s2836_s23, %s3194_s5 }
 0x113   : > { %p2290_p8 = scmp.ne.s32.totalorder %s2836_s23, %s2289_s17  ;;  %p2296_p10 = scmp.lt.u32.totalorder %s2294_s12, %s2289_s17 }
 0x114   : > { %p2298_p13 = scmp.lt.u32.totalorder %s2289_s17, %s2836_s23 }
 0x115   : > { %p2292_p1 = pnand %p2290_p8, %p3192_p3  ;;  %p2297_p11 = por %p2296_p10, %p2295_p9 }
 0x117   : > { %p2293_p0 = pneg %p2292_p1  ;;  %p2299_p4 = por %p2298_p13, %p2297_p11 }
 0x119   : > { %p2300_p7 = pnand %p2299_p4, %p2293_p0 }
 0x11b   : > { %2303 = shalt.err (!%p2300_p7)
}
 0x11c   : > { %s2304_s2 = scalar_lea.vmem %s465_s13, 128  ;;  %s2434_s10 = smov [#allocation11]  }
 0x11d   : > { %p2305_p6 = scmp.ne.s32.totalorder %s465_s13, %s2304_s2  ;;  %s2309_s25 = sshll.u32 %s2434_s10, 4  ;;  %s2310_s25 = int_to_ptr.vmem [resolvable:$false] %s2309_s25 }
 0x11e   : > { %s2311_s11 = scalar_lea.vmem %s2310_s25, 256  ;;  %p2312_p8 = scmp.lt.s32.totalorder %s465_s13, %s2310_s25 }
 0x11f   : > { %p2307_p12 = pnand %p2305_p6, %p3192_p3  ;;  %p2313_p1 = scmp.lt.s32.totalorder %s2311_s11, %s2304_s2 }
 0x121   : > { %p2308_p2 = pneg %p2307_p12  ;;  %p2314_p5 = por %p2313_p1, %p2312_p8 }
 0x123   : > { %p2315_p9 = pnand %p2314_p5, %p2308_p2 }
 0x125   : > { %2318 = shalt.err (!%p2315_p9)
}
 0x126   : > { %p3195_p10 = scmp.ne.s32.totalorder %s3184_s16, 0  ;;  %s3196_s28 = sld [smem:[#allocation35_spill]] }
 0x128   : > { %1901 = dma.hbm_to_vmem [thread:$0]  (!%p3195_p10), %s2836_s23, 128, %s465_s13, %s2697_s7  }
 0x12c   : > { %p3197_p0 = scmp.ne.s32.totalorder %s3196_s28, 0 }
 0x12d   : > { %s2860_s29 = sand.u32 (!%p3197_p0), 1, %s2405_s14   ;;  %p3198_p3 = scmp.ne.s32.totalorder (!%p3197_p0), %s3178_s27, 0 }
 0x12e   : > { %473 = sbr.rel (%p3197_p0) target bundleno = 2130 (0x852), region = 60  ;;  %s2863_s30 = sshll.u32 (!%p3197_p0), %s2860_s29, 3 }
 0x12f   : > { %s476_s1 = scalar_lea.sflag (!%p3197_p0), [#allocation7], %s2860_s29  ;;  %s479_s3 = scalar_lea.vmem (!%p3197_p0), [#allocation6], %s2863_s30 }
 0x135   : > { %2372 = dma.done.wait (%p3198_p3), %s476_s1, 128  }
 0x136   : > { %2374 = vsyncadd (%p3198_p3), %s476_s1, 4294967168  ;;  %s484_s7 = sand.u32 1, %s2535_s19   ;;  %s488_s21 = scalar_lea.vmem [#allocation9], %s2863_s30 }
 0x137   : > { %s485_s16 = scalar_lea.sflag [#allocation10], %s484_s7 }
 0x138   : > { %2376 = dma.done.wait (%p3198_p3), %s485_s16, 256  }
 0x139   : > { %2378 = vsyncadd (%p3198_p3), %s485_s16, 4294967040  ;;  %s497_s23 = scalar_lea.vmem [#allocation11], %s2863_s30  ;;  %p3199_p5 = scmp.eq.s32.totalorder %s2535_s19, 0 }
 0x13b   : > { %2380 = dma.done.wait (%p3199_p5), [#allocation13], 512   ;;  %p3200_p11 = pmov %p3199_p5 }
 0x13c   : > { %p3201_p13 = pmov %p3199_p5 }
 0x13d   : > { %2382 = vsyncadd (%p3200_p11), [#allocation13], 4294966784 }
 0x13e   : > { %2384 = dma.done.wait (%p3201_p13), [#allocation16], 512   ;;  %p3202_p4 = pmov %p3199_p5 }
 0x140   : > { %2386 = vsyncadd (%p3202_p4), [#allocation16], 4294966784  ;;  %p3203_p7 = pmov %p3202_p4 }
 0x141   : > { %p3204_p6 = pmov %p3202_p4 }
 0x142   : > { %2388 = dma.done.wait (%p3203_p7), [#allocation19], 32  }
 0x143   : > { %2390 = vsyncadd (%p3204_p6), [#allocation19], 4294967264  ;;  %p3205_p12 = pmov %p3202_p4 }
 0x144   : > { %p3206_p2 = pmov %p3202_p4 }
 0x145   : > { %2392 = dma.done.wait (%p3205_p12), [#allocation22], 16  }
 0x146   : > { %2394 = vsyncadd (%p3206_p2), [#allocation22], 4294967280  ;;  %vm595_vm0 = vcmask 261120   ;;  %v2435_v0 = vmov 0.0   ;;  %vm2436_vm1 = vmmov 0   ;;  %v2005_v1 = vld [vmem:[#allocation12] sm:$0xff]   ;;  %v768_v34 = vlaneseq }
 0x147   : > { %1754 = vmatprep.subr.bf16.mxu0 %v2435_v0  ;;  %1762 = vmatprep.subr.bf16.mxu1 %v2435_v0  ;;  %643 = vst.msk [vmem:[#allocation5] sm:$0xff] %vm595_vm0, %v2435_v0  ;;  %v2006_v2 = vld [vmem:[#allocation14] sm:$0xff]   ;;  %v2007_v3 = vld [vmem:[#allocation12 + $0x8] sm:$0xff]   ;;  %v2008_v4 = vld [vmem:[#allocation14 + $0x8] sm:$0xff]   ;;  %vm785_vm2 = vcmask 64512   ;;  %s2437_s19 = smov 112  }
 0x148   : > { %1758 = vmatprep.mubr.msk.bf16.mxu0 %vm2436_vm1, %v2435_v0  ;;  %1766 = vmatprep.mubr.msk.bf16.mxu1 %vm2436_vm1, %v2435_v0  ;;  %v2906_v5 = vld [vmem:[%s479_s3] sm:$0xff]  ;;  %v644_v6 = vld [vmem:[%s488_s21] sm:$0xff]  ;;  %s2438_s27 = smov 120   ;;  %s2439_s22 = smov 104   ;;  %v769_v35 = vshrl.u32 %v768_v34, 7  ;;  %v774_v36 = vand.u32 127, %v768_v34 }
 0x149   : > { %1755 = vmatpush3.bf16.msra.mxu0 %v2005_v1  ;;  %1763 = vmatpush3.bf16.msra.mxu1 %v2006_v2  ;;  %v578_v7 = vpack.c.bf16 %v2906_v5, %v2906_v5  ;;  %v645_v8 = vpack.c.bf16 %v644_v6, %v644_v6  ;;  %v2009_v21 = vld [vmem:[#allocation15] sm:$0xff]   ;;  %v2010_v22 = vld [vmem:[#allocation15 + $0x8] sm:$0xff]   ;;  %v706_v23 = vld [vmem:[%s497_s23] sm:$0xff]  ;;  %vm640_vm4 = vcmask 31744   ;;  %v2440_v43 = vmov -1e+30  }
 0x14a   : > { %1756 = vmatprep.subr.bf16.mxu0 %v2435_v0  ;;  %1764 = vmatprep.subr.bf16.mxu1 %v2435_v0  ;;  %v707_v24 = vpack.c.bf16 %v706_v23, %v706_v23  ;;  %vm777_vm3 = vcmp.gt.s32.totalorder %v774_v36, %v769_v35  ;;  %641 = vst.msk [vmem:[#allocation3] sm:$0xff] %vm640_vm4, %v2440_v43  ;;  %642 = vst.msk [vmem:[#allocation4] sm:$0xff] %vm640_vm4, %v2435_v0  ;;  %v2441_v44 = vmov 0   ;;  %v2442_v62 = vmov 1   ;;  %s2445_s13 = smov 8   ;;  %s2446_s17 = smov 16  }
 0x14b   : > { %1992 = vset.pattern.permute.xlu1 %v2441_v44  ;;  %1993 = vset.pattern.permute.xlu0 %v2442_v62  ;;  %vm896_vm5 = vcmask 7168   ;;  %vm852_vm6 = vcmask 1043456   ;;  %vm1030_vm7 = vcmask 15368   ;;  %vm1166_vm8 = vcmask 23568   ;;  %s2447_s20 = smov 24   ;;  %s3207_s24 = sld [smem:[#allocation32_spill]] }
 0x14c   : > { %vm1302_vm9 = vcmask 31768   ;;  %vm1049_vm10 = vcmask 130112   ;;  %vm1185_vm11 = vcmask 195712   ;;  %vm1321_vm12 = vcmask 261312   ;;  %s1698_s12 = sshll.u32 %s2860_s29, 2  ;;  %s3208_s18 = sld [smem:[#allocation37_spill]] }
 0x14d   : > { %1757 = vmatpush3.bf16.msra.mxu0 %v2007_v3  ;;  %1765 = vmatpush3.bf16.msra.mxu1 %v2008_v4  ;;  %v2443_v4 = vmov 2   ;;  %s571_s2 = scalar_lea.vmem [#allocation23], %s1698_s12  ;;  %vm1458_vm13 = vcmask 257024   ;;  %s3209_s28 = sld [smem:[#allocation45_spill]] }
 0x14e   : > { %1770 = vmatprep.subr.bf16.mxu0 %v2435_v0  ;;  %1778 = vmatprep.subr.bf16.mxu1 %v2435_v0  ;;  %s1475_s10 = sshll.u32 %s571_s2, 4  ;;  %s1461_s1 = scalar_lea.sflag [#allocation8], %s2860_s29  ;;  %s3072_s10 = int_to_ptr.vmem [resolvable:$true] %s1475_s10 }
 0x14f   : > { %s2319_s3 = scalar_lea.vmem %s3072_s10, 64  ;;  %s2448_s7 = smov [#allocation23]  }
 0x150   : > { %1759 = vmatmul.mubr.msk.bf16.vlgmr.msra.gmra.mrb[0].mxu0 %vm595_vm0, %v578_v7  ;;  %1767 = vmatmul.mubr.msk.bf16.vlgmr.msra.gmra.mrb[0].mxu1 %vm595_vm0, %v645_v8  ;;  %p2320_p8 = scmp.ne.s32.totalorder %s3072_s10, %s2319_s3  ;;  %s2323_s16 = sshll.u32 %s2448_s7, 4  ;;  %s2324_s16 = int_to_ptr.vmem [resolvable:$false] %s2323_s16 }
 0x151   : > { %1774 = vmatprep.mubr.msk.bf16.mxu0 %vm2436_vm1, %v2435_v0  ;;  %1780 = vmatprep.mubr.msk.bf16.mxu1 %vm2436_vm1, %v2435_v0  ;;  %v2975_v1 = vld [vmem:[#allocation3] sm:$0xff]  ;;  %s1723_s26 = sshll.u32 %s3207_s24, 6  ;;  %s2325_s21 = scalar_lea.vmem %s2324_s16, 128 }
 0x152   : > { %1771 = vmatpush3.bf16.msra.mxu0 %v2009_v21  ;;  %p3210_p1 = scmp.ne.s32.totalorder %s3208_s18, 0  ;;  %p2326_p0 = scmp.lt.s32.totalorder %s3072_s10, %s2324_s16 }
 0x153   : > { %1772 = vmatprep.subr.bf16.mxu0 %v2435_v0  ;;  %s3070_s30 = scalar_lea.hbm %s3209_s28, %s1723_s26  ;;  %p2327_p3 = scmp.lt.s32.totalorder %s2325_s21, %s2319_s3 }
 0x154   : > { %p2321_p9 = pnand %p2320_p8, %p3210_p1 }
 0x155   : > { %p2328_p5 = por %p2327_p3, %p2326_p0 }
 0x156   : > { %1773 = vmatpush3.bf16.msra.mxu0 %v2010_v22  ;;  %p2322_p10 = pneg %p2321_p9 }
 0x157   : > { %1784 = vmatprep.subr.bf16.mxu0 %v2435_v0 }
 0x158   : > { %p2329_p11 = pnand %p2328_p5, %p2322_p10 }
 0x159   : > { %1775 = vmatmul.mubr.msk.bf16.vlgmr.msra.gmra.mrb[4].mxu0 %vm595_vm0, %v707_v24 }
 0x15a   : > { %1786 = vmatprep.mubr.msk.bf16.mxu0 %vm2436_vm1, %v2435_v0 }
 0x223   : > { %v633_v9 = vpop.f32.mrb[0].mxu0  ;;  %v700_v10 = vpop.f32.mrb[0].mxu1 }
 0x224   : > { %639 = vst.msk [vmem:[#allocation2] sm:$0xff] %vm595_vm0, %v633_v9  ;;  %v1760_v11 = vpop.f32.mrb[1].mxu0  ;;  %v783_v12 = vpack.c.bf16 %v700_v10, %v700_v10  ;;  %v1768_v13 = vpop.f32.mrb[1].mxu1 }
 0x225   : > { %v636_v14 = vpop.f32.mrb[2].mxu0  ;;  %v703_v15 = vpop.f32.mrb[2].mxu1 }
 0x226   : > { %v1761_v16 = vpop.f32.mrb[3].mxu0  ;;  %1053 = vrot.lane.b32.xlu1 %v783_v12, %s2437_s19  ;;  %916 = vrot.lane.b32.xlu0 %v783_v12, %s2438_s27  ;;  %v1769_v17 = vpop.f32.mrb[3].mxu1  ;;  %v790_v18 = vsel %vm785_vm2, %v783_v12, 0 }
 0x227   : > { %1779 = vmatpush3.bf16.xpose.msra.mxu1 %v790_v18  ;;  %v2444_v17 = vmov 3  }
 0x228   : > { %1790 = vmatprep.subr.bf16.mxu1 %v2435_v0 }
 0x22b   : > { %v778_v19 = vld [vmem:[#allocation2] sm:$0xff] }
 0x22c   : > { %v782_v20 = vpack.c.bf16 %v778_v19, %v778_v19  ;;  %v761_v6 = vpop.f32.mrb[4].mxu0 }
 0x22d   : > { %v1776_v7 = vpop.f32.mrb[5].mxu0  ;;  %v784_v10 = vpack.c.bf16 %v761_v6, %v761_v6 }
 0x22e   : > { %1051 = vrot.lane.b32.xlu1 %v782_v20, %s2437_s19  ;;  %913 = vrot.lane.b32.xlu0 %v782_v20, %s2438_s27  ;;  %v764_v8 = vpop.f32.mrb[6].mxu0 }
 0x22f   : > { %1781 = vmatmul.mubr.msk.bf16.vlgmr.msra.gmra.mrb[4].mxu1 %vm785_vm2, %v782_v20  ;;  %v1777_v9 = vpop.f32.mrb[7].mxu0  ;;  %v854_v11 = vsel %vm852_vm6, %v784_v10, 0 }
 0x230   : > { %1792 = vmatprep.mubr.msk.bf16.mxu1 %vm2436_vm1, %v2435_v0  ;;  %1785 = vmatpush3.bf16.msra.mxu0 %v854_v11 }
 0x231   : > { %1796 = vmatprep.subr.bf16.mxu0 %v2435_v0 }
 0x232   : > { %1187 = vrot.lane.b32.xlu1 %v782_v20, %s2439_s22  ;;  %1189 = vrot.lane.b32.xlu0 %v783_v12, %s2439_s22 }
 0x298   : > { %v917_v25 = vpop.permute.xlu0 %916  ;;  %v1054_v27 = vpop.permute.xlu1 %1053 }
 0x299   : > { %v922_v26 = vsel %vm785_vm2, %v917_v25, 0  ;;  %v1059_v29 = vsel %vm785_vm2, %v1054_v27, 0 }
 0x29a   : > { %1791 = vmatpush3.bf16.xpose.msra.mxu1 %v922_v26 }
 0x29b   : > { %1802 = vmatprep.subr.bf16.mxu1 %v2435_v0 }
 0x2a0   : > { %v914_v28 = vpop.permute.xlu0 %913  ;;  %v1052_v31 = vpop.permute.xlu1 %1051 }
 0x2a1   : > { %1793 = vmatmul.mubr.msk.bf16.vlgmr.msra.gmra.mrb[8].mxu1 %vm785_vm2, %v914_v28 }
 0x2a2   : > { %1803 = vmatpush3.bf16.xpose.msra.mxu1 %v1059_v29  ;;  %1804 = vmatprep.mubr.msk.bf16.mxu1 %vm2436_vm1, %v2435_v0 }
 0x2a3   : > { %1814 = vmatprep.subr.bf16.mxu1 %v2435_v0 }
 0x2a4   : > { %v1190_v30 = vpop.permute.xlu0 %1189  ;;  %v1188_v33 = vpop.permute.xlu1 %1187 }
 0x2a5   : > { %v1195_v32 = vsel %vm785_vm2, %v1190_v30, 0 }
 0x2a9   : > { %1805 = vmatmul.mubr.msk.bf16.vlgmr.msra.gmra.mrb[12].mxu1 %vm785_vm2, %v1052_v31 }
 0x2aa   : > { %1815 = vmatpush3.bf16.xpose.msra.mxu1 %v1195_v32  ;;  %1816 = vmatprep.mubr.msk.bf16.mxu1 %vm2436_vm1, %v2435_v0 }
 0x2ab   : > { %1826 = vmatprep.subr.bf16.mxu1 %v2435_v0 }
 0x2b1   : > { %1817 = vmatmul.mubr.msk.bf16.vlgmr.msra.gmra.mrb[16].mxu1 %vm785_vm2, %v1188_v33 }
 0x2b2   : > { %1830 = vmatprep.mubr.msk.bf16.mxu1 %vm2436_vm1, %v2435_v0 }
 0x302   : > { %v826_v37 = vpop.f32.mrb[4].mxu1 }
 0x303   : > { %v2953_v38 = vsel %vm777_vm3, -1e+20, %v826_v37  ;;  %v1782_v39 = vpop.f32.mrb[5].mxu1 }
 0x304   : > { %v829_v40 = vpop.f32.mrb[6].mxu1  ;;  %v833_v41 = vsel %vm785_vm2, %v2953_v38, -inf }
 0x305   : > { %834 = vmax.xlane.f32.xlu0 %v833_v41  ;;  %v1783_v42 = vpop.f32.mrb[7].mxu1 }
 0x374   : > { %v958_v45 = vpop.f32.mrb[8].mxu1 }
 0x375   : > { %v2960_v46 = vsel %vm777_vm3, -1e+20, %v958_v45  ;;  %v1794_v47 = vpop.f32.mrb[9].mxu1 }
 0x376   : > { %v961_v48 = vpop.f32.mrb[10].mxu1  ;;  %v965_v49 = vsel %vm785_vm2, %v2960_v46, -inf }
 0x377   : > { %966 = vmax.xlane.f32.xlu1 %v965_v49  ;;  %v1795_v50 = vpop.f32.mrb[11].mxu1 }
 0x37c   : > { %v1095_v51 = vpop.f32.mrb[12].mxu1 }
 0x37d   : > { %v2965_v52 = vsel %vm777_vm3, -1e+20, %v1095_v51  ;;  %v1806_v53 = vpop.f32.mrb[13].mxu1 }
 0x37e   : > { %v1098_v54 = vpop.f32.mrb[14].mxu1  ;;  %v1102_v55 = vsel %vm785_vm2, %v2965_v52, -inf }
 0x37f   : > { %1103 = vmax.xlane.f32.xlu0 %v1102_v55  ;;  %v1807_v56 = vpop.f32.mrb[15].mxu1 }
 0x384   : > { %v1231_v57 = vpop.f32.mrb[16].mxu1 }
 0x385   : > { %v2970_v58 = vsel %vm777_vm3, -1e+20, %v1231_v57  ;;  %v1818_v59 = vpop.f32.mrb[17].mxu1 }
 0x386   : > { %v1234_v60 = vpop.f32.mrb[18].mxu1  ;;  %v1238_v61 = vsel %vm785_vm2, %v2970_v58, -inf }
 0x387   : > { %1239 = vmax.xlane.f32.xlu0 %v1238_v61  ;;  %v1819_v63 = vpop.f32.mrb[19].mxu1 }
 0x388   : > { %v780_v63 = vld [vmem:[#allocation4] sm:$0xff] }
 0x392   : > { %v835_v2 = vpop.xlane.xlu0 %834 }
 0x393   : > { %v2978_v3 = vmax.f32 %v2975_v1, %v835_v2 }
 0x395   : > { %842 = vperm.xlu1 %1992, %v2978_v3   ;;  %897 = vst.msk [vmem:[#allocation3] sm:$0xff] %vm896_vm5, %v2978_v3  ;;  %v837_v36 = vsub.f32 %v2975_v1, %v2978_v3 }
 0x397   : > { %v838_v41 = vmul.f32 1.442695, %v837_v36  ;;  %v2011_v36 = vld [vmem:[#allocation17] sm:$0xff]  }
 0x398   : > { %1827 = vmatpush3.bf16.msra.mxu1 %v2011_v36 }
 0x399   : > { %1994 = vset.pattern.permute.xlu1 %v2443_v4  ;;  %1828 = vmatprep.subr.bf16.mxu1 %v2435_v0 }
 0x404   : > { %v967_v12 = vpop.xlane.xlu1 %966 }
 0x405   : > { %v2987_v13 = vmax.f32 %v2975_v1, %v967_v12  ;;  %v781_v12 = vld [vmem:[#allocation5] sm:$0xff] }
 0x407   : > { %1031 = vst.msk [vmem:[#allocation3] sm:$0xff] %vm1030_vm7, %v2987_v13  ;;  %974 = vperm.xlu0 %1993, %v2987_v13   ;;  %v969_v48 = vsub.f32 %v2975_v1, %v2987_v13 }
 0x40b   : > { %1996 = vset.pattern.permute.xlu0 %v2441_v44 }
 0x40c   : > { %v1104_v14 = vpop.xlane.xlu0 %1103 }
 0x40d   : > { %v2994_v15 = vmax.f32 %v2975_v1, %v1104_v14 }
 0x40f   : > { %1167 = vst.msk [vmem:[#allocation3] sm:$0xff] %vm1166_vm8, %v2994_v15  ;;  %1111 = vperm.xlu1 %1994, %v2994_v15   ;;  %v1106_v53 = vsub.f32 %v2975_v1, %v2994_v15 }
 0x411   : > { %v1107_v56 = vmul.f32 1.442695, %v1106_v53 }
 0x413   : > { %1995 = vset.pattern.permute.xlu1 %v2444_v17 }
 0x414   : > { %v843_v16 = vpop.permute.xlu1 %842  ;;  %v1240_v19 = vpop.xlane.xlu0 %1239 }
 0x415   : > { %v845_v18 = vsub.f32 %v2953_v38, %v843_v16  ;;  %v3002_v20 = vmax.f32 %v2975_v1, %v1240_v19 }
 0x417   : > { %v846_v21 = vmul.f32 1.442695, %v845_v18  ;;  %1303 = vst.msk [vmem:[#allocation3] sm:$0xff] %vm1302_vm9, %v3002_v20  ;;  %1247 = vperm.xlu1 %1995, %v3002_v20   ;;  %v1242_v57 = vsub.f32 %v2975_v1, %v3002_v20 }
 0x419   : > { %2013 = vpow2.f32 %v846_v21 }
 0x41b   : > { %982 = vrot.lane.b32.xlu1 %v784_v10, %s2438_s27 }
 0x41c   : > { %1997 = vset.pattern.permute.xlu1 %v2442_v62 }
 0x41f   : > { %1118 = vrot.lane.b32.xlu1 %v784_v10, %s2437_s19 }
 0x423   : > { %v2014_v22 = vpop.eup %2013  ;;  %1254 = vrot.lane.b32.xlu1 %v784_v10, %s2439_s22 }
 0x424   : > { %v848_v23 = vpack.c.bf16 %v2014_v22, %v2014_v22  ;;  %v899_v24 = vsel %vm785_vm2, %v2014_v22, 0.0 }
 0x426   : > { %1787 = vmatmul.mubr.msk.bf16.vlgmr.msra.gmra.mrb[8].mxu0 %vm785_vm2, %v848_v23 }
 0x427   : > { %1798 = vmatprep.mubr.msk.bf16.mxu0 %vm2436_vm1, %v2435_v0 }
 0x447   : > { %900 = vadd.xlane.f32.xlu1 %v899_v24 }
 0x486   : > { %v975_v25 = vpop.permute.xlu0 %974 }
 0x487   : > { %v977_v26 = vsub.f32 %v2960_v46, %v975_v25 }
 0x489   : > { %v978_v27 = vmul.f32 1.442695, %v977_v26 }
 0x48b   : > { %2015 = vpow2.f32 %v978_v27 }
 0x48e   : > { %v1112_v28 = vpop.permute.xlu1 %1111 }
 0x48f   : > { %v1114_v29 = vsub.f32 %v2965_v52, %v1112_v28  ;;  %v970_v52 = vmul.f32 1.442695, %v969_v48 }
 0x491   : > { %v1115_v30 = vmul.f32 1.442695, %v1114_v29 }
 0x493   : > { %2017 = vpow2.f32 %v1115_v30 }
 0x495   : > { %v2016_v31 = vpop.eup %2015 }
 0x496   : > { %v1248_v32 = vpop.permute.xlu1 %1247  ;;  %v1033_v33 = vsel %vm785_vm2, %v2016_v31, 0.0  ;;  %v980_v40 = vpack.c.bf16 %v2016_v31, %v2016_v31 }
 0x497   : > { %v1250_v34 = vsub.f32 %v2970_v58, %v1248_v32  ;;  %1034 = vadd.xlane.f32.xlu0 %v1033_v33  ;;  %v1243_v58 = vmul.f32 1.442695, %v1242_v57 }
 0x499   : > { %v1251_v35 = vmul.f32 1.442695, %v1250_v34 }
 0x49a   : > { %v983_v37 = vpop.permute.xlu1 %982 }
 0x49b   : > { %2019 = vpow2.f32 %v1251_v35  ;;  %v988_v38 = vsel %vm852_vm6, %v983_v37, 0  ;;  %v2012_v37 = vld [vmem:[#allocation17 + $0x8] sm:$0xff]  }
 0x49c   : > { %1797 = vmatpush3.bf16.msra.mxu0 %v988_v38  ;;  %2021 = vpow2.f32 %v838_v41  ;;  %1829 = vmatpush3.bf16.msra.mxu1 %v2012_v37 }
 0x49d   : > { %v2018_v39 = vpop.eup %2017  ;;  %1808 = vmatprep.subr.bf16.mxu0 %v2435_v0  ;;  %2023 = vpow2.f32 %v970_v52 }
 0x49e   : > { %v1119_v42 = vpop.permute.xlu1 %1118  ;;  %v1169_v43 = vsel %vm785_vm2, %v2018_v39, 0.0  ;;  %v1117_v49 = vpack.c.bf16 %v2018_v39, %v2018_v39  ;;  %2025 = vpow2.f32 %v1107_v56 }
 0x49f   : > { %v1124_v45 = vsel %vm852_vm6, %v1119_v42, 0  ;;  %1170 = vadd.xlane.f32.xlu1 %v1169_v43  ;;  %1799 = vmatmul.mubr.msk.bf16.vlgmr.msra.gmra.mrb[12].mxu0 %vm785_vm2, %v980_v40  ;;  %2027 = vpow2.f32 %v1243_v58 }
 0x4a0   : > { %1809 = vmatpush3.bf16.msra.mxu0 %v1124_v45  ;;  %1810 = vmatprep.mubr.msk.bf16.mxu0 %vm2436_vm1, %v2435_v0 }
 0x4a1   : > { %1820 = vmatprep.subr.bf16.mxu0 %v2435_v0 }
 0x4a2   : > { %v1255_v46 = vpop.permute.xlu1 %1254 }
 0x4a3   : > { %v1260_v51 = vsel %vm852_vm6, %v1255_v46, 0 }
 0x4a5   : > { %v2020_v47 = vpop.eup %2019 }
 0x4a6   : > { %v1305_v50 = vsel %vm785_vm2, %v2020_v47, 0.0  ;;  %v2022_v54 = vpop.eup %2021  ;;  %v1253_v55 = vpack.c.bf16 %v2020_v47, %v2020_v47 }
 0x4a7   : > { %1306 = vadd.xlane.f32.xlu1 %v1305_v50  ;;  %1811 = vmatmul.mubr.msk.bf16.vlgmr.msra.gmra.mrb[16].mxu0 %vm785_vm2, %v1117_v49  ;;  %v2024_v59 = vpop.eup %2023  ;;  %v898_v1 = vmul.f32 %v2022_v54, %v780_v63 }
 0x4a8   : > { %1821 = vmatpush3.bf16.msra.mxu0 %v1260_v51  ;;  %1822 = vmatprep.mubr.msk.bf16.mxu0 %vm2436_vm1, %v2435_v0  ;;  %v2026_v60 = vpop.eup %2025  ;;  %v1032_v9 = vmul.f32 %v2024_v59, %v780_v63 }
 0x4a9   : > { %v2028_v61 = vpop.eup %2027  ;;  %v1168_v13 = vmul.f32 %v2026_v60, %v780_v63 }
 0x4aa   : > { %v1304_v19 = vmul.f32 %v2028_v61, %v780_v63  ;;  %v1716_v63 = vld [vmem:[#allocation18] ss:$0 sm:$0xff] }
 0x4ad   : > { %906 = vperm.xlu0 %1996, %v2022_v54  }
 0x4af   : > { %1823 = vmatmul.mubr.msk.bf16.vlgmr.msra.gmra.mrb[20].mxu0 %vm785_vm2, %v1253_v55 }
 0x4b1   : > { %2001 = vset.pattern.permute.xlu0 %v2442_v62 }
 0x4b8   : > { %1040 = vperm.xlu1 %1997, %v2024_v59  }
 0x4bc   : > { %1998 = vset.pattern.permute.xlu1 %v2443_v4 }
 0x4bd   : > { %1176 = vperm.xlu1 %1998, %v2026_v60  }
 0x4c1   : > { %1999 = vset.pattern.permute.xlu1 %v2444_v17 }
 0x4c2   : > { %1312 = vperm.xlu1 %1999, %v2028_v61  }
 0x4c6   : > { %2000 = vset.pattern.permute.xlu1 %v2441_v44 }
 0x4d4   : > { %v901_v2 = vpop.xlane.xlu1 %900 }
 0x4d5   : > { %v902_v3 = vadd.f32 %v901_v2, %v898_v1 }
 0x4d7   : > { %903 = vst.msk [vmem:[#allocation4] sm:$0xff] %vm896_vm5, %v902_v3 }
 0x4f9   : > { %v890_v62 = vpop.f32.mrb[8].mxu0 }
 0x4fa   : > { %v1788_v6 = vpop.f32.mrb[9].mxu0 }
 0x4fb   : > { %v893_v7 = vpop.f32.mrb[10].mxu0 }
 0x4fc   : > { %v1789_v8 = vpop.f32.mrb[11].mxu0 }
 0x524   : > { %v1035_v10 = vpop.xlane.xlu0 %1034 }
 0x525   : > { %v1036_v11 = vadd.f32 %v1035_v10, %v1032_v9 }
 0x527   : > { %1037 = vst.msk [vmem:[#allocation4] sm:$0xff] %vm1030_vm7, %v1036_v11 }
 0x52c   : > { %v907_v14 = vpop.permute.xlu0 %906  ;;  %v1171_v15 = vpop.xlane.xlu1 %1170 }
 0x52d   : > { %v909_v44 = vmul.f32 %v907_v14, %v781_v12  ;;  %v1172_v16 = vadd.f32 %v1171_v15, %v1168_v13 }
 0x52f   : > { %v910_v18 = vadd.f32 %v909_v44, %v890_v62  ;;  %1173 = vst.msk [vmem:[#allocation4] sm:$0xff] %vm1166_vm8, %v1172_v16 }
 0x531   : > { %911 = vst.msk [vmem:[#allocation5] sm:$0xff] %vm785_vm2, %v910_v18  ;;  %v1720_v18 = vld [vmem:[#allocation20] ss:$0 sm:$0xff] }
 0x534   : > { %v1307_v20 = vpop.xlane.xlu1 %1306 }
 0x535   : > { %v1308_v21 = vadd.f32 %v1307_v20, %v1304_v19  ;;  %v1721_v19 = vld [vmem:[#allocation21] ss:$0 sm:$0xff] }
 0x537   : > { %1309 = vst.msk [vmem:[#allocation4] sm:$0xff] %vm1302_vm9, %v1308_v21 }
 0x538   : > { %v1041_v38 = vpop.permute.xlu1 %1040 }
 0x539   : > { %v1043_v41 = vmul.f32 %v1041_v38, %v781_v12 }
 0x53c   : > { %v1177_v39 = vpop.permute.xlu1 %1176 }
 0x53e   : > { %v1326_v22 = vld [vmem:[#allocation4] sm:$0xff] }
 0x53f   : > { %2029 = vrcp.f32 %v1326_v22 }
 0x541   : > { %v1313_v40 = vpop.permute.xlu1 %1312 }
 0x542   : > { %v1315_v46 = vmul.f32 %v1313_v40, %v781_v12 }
 0x549   : > { %v2030_v23 = vpop.eup %2029 }
 0x54a   : > { %1338 = vperm.xlu0 %2001, %v2030_v23  }
 0x54e   : > { %2004 = vset.pattern.permute.xlu0 %v2444_v17 }
 0x572   : > { %v1024_v24 = vpop.f32.mrb[12].mxu0 }
 0x573   : > { %1045 = vrot.lane.b32.xlu1 %v1024_v24, %s2445_s13  ;;  %v1800_v25 = vpop.f32.mrb[13].mxu0 }
 0x574   : > { %v1027_v26 = vpop.f32.mrb[14].mxu0 }
 0x575   : > { %v1801_v27 = vpop.f32.mrb[15].mxu0 }
 0x57a   : > { %v1160_v28 = vpop.f32.mrb[16].mxu0 }
 0x57b   : > { %1181 = vrot.lane.b32.xlu1 %v1160_v28, %s2446_s17  ;;  %v1812_v29 = vpop.f32.mrb[17].mxu0 }
 0x57c   : > { %v1163_v30 = vpop.f32.mrb[18].mxu0 }
 0x57d   : > { %v1813_v31 = vpop.f32.mrb[19].mxu0 }
 0x582   : > { %v1296_v32 = vpop.f32.mrb[20].mxu0 }
 0x583   : > { %1317 = vrot.lane.b32.xlu1 %v1296_v32, %s2447_s20  ;;  %v1824_v33 = vpop.f32.mrb[21].mxu0 }
 0x584   : > { %v1299_v34 = vpop.f32.mrb[22].mxu0 }
 0x585   : > { %v1825_v35 = vpop.f32.mrb[23].mxu0 }
 0x587   : > { %1331 = vperm.xlu1 %2000, %v2030_v23  }
 0x58b   : > { %2002 = vset.pattern.permute.xlu1 %v2443_v4  ;;  %v1179_v4 = vmul.f32 %v1177_v39, %v781_v12 }
 0x58c   : > { %1345 = vperm.xlu1 %2002, %v2030_v23  }
 0x590   : > { %2003 = vset.pattern.permute.xlu1 %v2444_v17 }
 0x591   : > { %1352 = vperm.xlu1 %2003, %v2030_v23  }
 0x5c9   : > { %v1339_v51 = vpop.permute.xlu0 %1338 }
 0x5e5   : > { %v1046_v42 = vpop.permute.xlu1 %1045 }
 0x5e6   : > { %v1048_v43 = vadd.f32 %v1046_v42, %v1043_v41 }
 0x5e8   : > { %1050 = vst.msk [vmem:[#allocation5] sm:$0xff] %vm1049_vm10, %v1048_v43 }
 0x5ed   : > { %v1182_v45 = vpop.permute.xlu1 %1181 }
 0x5ee   : > { %v1184_v17 = vadd.f32 %v1182_v45, %v1179_v4 }
 0x5f0   : > { %1186 = vst.msk [vmem:[#allocation5] sm:$0xff] %vm1185_vm11, %v1184_v17 }
 0x5f5   : > { %v1318_v47 = vpop.permute.xlu1 %1317 }
 0x5f6   : > { %v1320_v0 = vadd.f32 %v1318_v47, %v1315_v46 }
 0x5f8   : > { %1322 = vst.msk [vmem:[#allocation5] sm:$0xff] %vm1321_vm12, %v1320_v0 }
 0x5ff   : > { %v1328_v48 = vld [vmem:[#allocation5] sm:$0xff] }
 0x606   : > { %v1332_v49 = vpop.permute.xlu1 %1331 }
 0x607   : > { %v1334_v50 = vmul.f32 %v1332_v49, %v1328_v48 }
 0x609   : > { %1335 = vst.msk [vmem:[#allocation5] sm:$0xff] %vm785_vm2, %v1334_v50 }
 0x60b   : > { %v1346_v55 = vpop.permute.xlu1 %1345 }
 0x610   : > { %v1336_v52 = vld [vmem:[#allocation5] sm:$0xff]  ;;  %v1353_v58 = vpop.permute.xlu1 %1352 }
 0x611   : > { %v1341_v53 = vmul.f32 %v1339_v51, %v1336_v52 }
 0x613   : > { %1342 = vst.msk [vmem:[#allocation5] sm:$0xff] %vm1049_vm10, %v1341_v53 }
 0x61a   : > { %v1343_v54 = vld [vmem:[#allocation5] sm:$0xff] }
 0x61b   : > { %v1348_v56 = vmul.f32 %v1346_v55, %v1343_v54 }
 0x61d   : > { %1349 = vst.msk [vmem:[#allocation5] sm:$0xff] %vm1185_vm11, %v1348_v56 }
 0x624   : > { %v1350_v57 = vld [vmem:[#allocation5] sm:$0xff] }
 0x625   : > { %v1355_v59 = vmul.f32 %v1353_v58, %v1350_v57 }
 0x627   : > { %1356 = vst.msk [vmem:[#allocation5] sm:$0xff] %vm1321_vm12, %v1355_v59 }
 0x62e   : > { %v1357_v60 = vld [vmem:[#allocation5] sm:$0xff] }
 0x62f   : > { %v1358_v61 = vpack.c.bf16 %v1357_v60, %v1357_v60 }
 0x631   : > { %1831 = vmatmul.mubr.msk.bf16.vlgmr.msra.gmra.mrb[20].mxu1 %vm595_vm0, %v1358_v61 }
 0x704   : > { %v1419_v1 = vpop.f32.mrb[20].mxu1 }
 0x705   : > { %v1420_v2 = vadd.f32 %v1716_v63, %v1419_v1  ;;  %v1832_v3 = vpop.f32.mrb[21].mxu1 }
 0x706   : > { %v1422_v62 = vpop.f32.mrb[22].mxu1 }
 0x707   : > { %v1833_v6 = vpop.f32.mrb[23].mxu1  ;;  %v1426_v7 = vadd.f32 %v1420_v2, %v2906_v5 }
 0x709   : > { %v1427_v8 = vsel %vm595_vm0, %v1426_v7, 0.0 }
 0x70a   : > { %1428 = vadd.xlane.f32.xlu0 %v1427_v8 }
 0x797   : > { %v1429_v9 = vpop.xlane.xlu0 %1428 }
 0x798   : > { %v1431_v10 = vmul.f32 0.03125, %v1429_v9 }
 0x79a   : > { %v1432_v11 = vsub.f32 %v1426_v7, %v1431_v10 }
 0x79c   : > { %v1433_v12 = vmul.f32 %v1432_v11, %v1432_v11 }
 0x79e   : > { %v1434_v13 = vsel %vm595_vm0, %v1433_v12, 0.0 }
 0x79f   : > { %1435 = vadd.xlane.f32.xlu1 %v1434_v13 }
 0x82c   : > { %v1436_v14 = vpop.xlane.xlu1 %1435 }
 0x82d   : > { %v1437_v15 = vmul.f32 0.03125, %v1436_v14 }
 0x82f   : > { %v1438_v44 = vadd.f32 1e-05, %v1437_v15 }
 0x831   : > { %2031 = vrsqrt.f32 %v1438_v44 }
 0x83b   : > { %v2032_v16 = vpop.eup %2031 }
 0x83c   : > { %v1440_v5 = vmul.f32 %v2032_v16, %v1432_v11 }
 0x83e   : > { %v1448_v20 = vmul.f32 %v1720_v18, %v1440_v5 }
 0x840   : > { %v1456_v21 = vadd.f32 %v1721_v19, %v1448_v20 }
 0x842   : > { %v1457_v22 = vpack.c.bf16 %v1456_v21, %v1456_v21 }
 0x844   : > { %1459 = vst.msk [vmem:[%s571_s2] sm:$0xf] %vm1458_vm13, %v1457_v22 }
 0x845   : > { %2332 = shalt.err (!%p2329_p11)
}
 0x846   : > { %s2333_s29 = scalar_lea.hbm %s3070_s30, 64  ;;  %s2337_s27 = scalar_lea.hbm %s3209_s28, 128 }
 0x847   : > { %p2334_p13 = scmp.ne.s32.totalorder %s3070_s30, %s2333_s29  ;;  %p2338_p6 = scmp.lt.u32.totalorder %s3070_s30, %s3209_s28 }
 0x848   : > { %p2339_p12 = scmp.lt.u32.totalorder %s2337_s27, %s2333_s29  ;;  %p2341_p8 = scmp.lt.u32.totalorder %s2333_s29, %s3070_s30 }
 0x849   : > { %p2335_p4 = pnand %p2334_p13, %p3210_p1 }
 0x84a   : > { %p2340_p2 = por %p2339_p12, %p2338_p6 }
 0x84b   : > { %p2336_p7 = pneg %p2335_p4 }
 0x84c   : > { %p2342_p9 = por %p2341_p8, %p2340_p2 }
 0x84e   : > { %p2343_p10 = pnand %p2342_p9, %p2336_p7 }
 0x850   : > { %2346 = shalt.err (!%p2343_p10)
}
 0x851   : > { %1868 = dma.vmem_to_hbm [thread:$0]  (%p3210_p1), %s3072_s10, 64, %s3070_s30, %s1461_s1  }
 0x852 PF: > { %s3211_s17 = sld [smem:[#allocation31_spill]]  ;;  %s3212_s20 = sld [smem:[#allocation39_spill]] }
 0x853   : > { %s3213_s24 = sld [smem:[#allocation34_spill]] }
 0x858   : > { %s1487_s12 = sand.u32 1, %s3211_s17   ;;  %p3214_p0 = scmp.ne.s32.totalorder %s3212_s20, 0 }
 0x859   : > { %p3215_p3 = scmp.ge.s32.totalorder %s3213_s24, 2  ;;  %s1488_s26 = scalar_lea.sflag [#allocation8], %s1487_s12 }
 0x85b   : > { %p1903_p5 = pnand %p3215_p3, %p3214_p0 }
 0x85d   : > { %2396 = dma.done.wait (!%p1903_p5), %s1488_s26, 64  }
 0x85e   : > { %2398 = vsyncadd (!%p1903_p5), %s1488_s26, 4294967232  ;;  %s33_s18 = sadd.s32 1, %s3213_s24   ;;  %s3216_s2 = sld [smem:[#allocation38_spill]] }
 0x85f   : > { %p30_p11 = scmp.ge.s32.totalorder %s33_s18, 4   ;;  %s3217_s16 = sld [smem:[#allocation33_spill]] }
 0x860   : > { %s3218_s17 = sld [smem:[#allocation36_spill]]  ;;  %s3219_s13 = smov %s2405_s14 }
 0x861   : > { %s3220_s14 = smov %s2409_s15  ;;  %32 = sbr.rel (!%p30_p11) target bundleno = 19 (0x13), region = 165 }
 0x864   : > { %s3221_s15 = smov %s3216_s2 }
 0x868   :  { %1493 = vsyncpa [#allocation7], 1 }
 0x869   :  { %1495 = vsyncpa [#allocation7 + $0x1], 1 }
 0x86a   :  { %1496 = vsyncpa [#allocation10], 1 }
 0x86b   :  { %1498 = vsyncpa [#allocation10 + $0x1], 1 }
 0x86c   :  { %1499 = vsyncpa [#allocation13], 1 }
 0x86d   :  { %1500 = vsyncpa [#allocation16], 1 }
 0x86e   :  { %1501 = vsyncpa [#allocation19], 1 }
 0x86f   :  { %1502 = vsyncpa [#allocation22], 1 }
 0x870   :  { %1503 = vsyncpa [#allocation8], 1 }
 0x871   :  { %1505 = vsyncpa [#allocation8 + $0x1], 1 }

</bundles_post_ra>
